<compile_context>
chip_gen: v6e
topology: v6e:2x2x1
jax: 0.10.0
libtpu: 0.0.40
codegen_flags: <defaults>
</compile_context>

<pallas_src>
import functools

import jax
import jax.numpy as jnp
import numpy as np
from jax.experimental import pallas as pl
from jax.experimental.pallas import tpu as pltpu

BN_EPS = 1e-5  # nn.BatchNorm2d default


# ----------------------------- Pallas kernel ---------------------------------
def _dsconv_kernel(x_ref, dw_w_ref, bn1_s_ref, bn1_b_ref,
                   se_w1_ref, se_b1_ref, se_w2_ref, se_b2_ref,
                   pw_w_ref, bn2_s_ref, bn2_b_ref,
                   out_ref, xpad_ref,
                   *, H, W, K, pad_lo_w, has_skip):
    C = x_ref.shape[-1]
    Cout = out_ref.shape[-1]
    pad = K // 2

    x = x_ref[...]                                   # (H, W, C) f32 -- single DMA per image

    # ---- build the zero-padded image in a VMEM scratch (no wrapper-side jnp.pad) ----
    # Store offsets: H is the untiled leading dim (any offset is fine); the W offset
    # is `pad_lo_w` (a multiple of 8), so the interior store stays sublane-tile aligned.
    xpad_ref[...] = jnp.zeros(xpad_ref.shape, xpad_ref.dtype)
    xpad_ref[pad:pad + H, pad_lo_w:pad_lo_w + W, :] = x
    xp = xpad_ref[...]                               # (H + 2*pad, pad_lo_w + W + pad, C)

    # ---- depthwise KxK conv, stride 1, 'same' padding ----
    # Pre-build the K W-shifted views once; inside the kh loop only slice along the
    # untiled H axis (K misaligned windows instead of K*K).
    w_taps = dw_w_ref[...]                           # (K*K, C), taps row-major (kh, kw)
    acc = jnp.zeros((H, W, C), jnp.float32)
    for kw in range(K):
        col0 = pad_lo_w - pad + kw
        x_wshift = xp[:, col0:col0 + W, :]           # (H + 2*pad, W, C)
        for kh in range(K):
            tap = w_taps[kh * K + kw: kh * K + kw + 1, :]      # (1, C)
            acc = acc + x_wshift[kh:kh + H, :, :] * tap

    # ---- bn1 (folded) + SiLU ----
    y = acc * bn1_s_ref[...] + bn1_b_ref[...]
    y = y * jax.nn.sigmoid(y)

    # ---- Squeeze-and-Excite (tiny (1,C) matmuls; kept as-is, negligible either way) ----
    y2 = y.reshape(H * W, C)
    s = jnp.mean(y2, axis=0, keepdims=True)          # global avg pool -> (1, C)
    r = jnp.dot(s, se_w1_ref[...], preferred_element_type=jnp.float32) + se_b1_ref[...]
    r = r * jax.nn.sigmoid(r)                        # SiLU
    e = jnp.dot(r, se_w2_ref[...], preferred_element_type=jnp.float32) + se_b2_ref[...]
    y2 = y2 * jax.nn.sigmoid(e)                      # gate, (1, C) broadcast

    # ---- pointwise 1x1 conv on the MXU: bf16 operands, f32 accumulation + bn2 ----
    z = jnp.dot(y2.astype(jnp.bfloat16), pw_w_ref[...],
                preferred_element_type=jnp.float32)  # (H*W, Cout)
    z = z * bn2_s_ref[...] + bn2_b_ref[...]

    # ---- residual skip (DropPath is identity in eval / dprate=0.0) ----
    if has_skip:
        z = z + x.reshape(H * W, C)

    out_ref[...] = z.reshape(H, W, Cout)


# ------------------------------- wrapper --------------------------------------
def depthwise_separable_conv2d(x_nchw, p, dw_k=3, stride=1, noskip=False):
    N, C, H, W = x_nchw.shape
    Cout = p["pw_w"].shape[0]
    assert stride == 1, "only stride=1 implemented (module default)"
    # TODO(synk): stride=2 depthwise variant.
    has_skip = (stride == 1 and C == Cout) and (not noskip)
    pad = dw_k // 2
    pad_lo_w = ((pad + 7) // 8) * 8                  # sublane-tile aligned left halo on W

    # NCHW -> NHWC (single boundary copy; the old extra jnp.pad HBM pass is gone)
    x = jnp.transpose(x_nchw, (0, 2, 3, 1)).astype(jnp.float32)

    # fold BatchNorm (eval) into per-channel scale / bias
    bn1_s = (p["bn1_gamma"] / jnp.sqrt(p["bn1_var"] + BN_EPS)).reshape(1, C)
    bn1_b = (p["bn1_beta"] - p["bn1_mean"] * bn1_s[0]).reshape(1, C)
    bn2_s = (p["bn2_gamma"] / jnp.sqrt(p["bn2_var"] + BN_EPS)).reshape(1, Cout)
    bn2_b = (p["bn2_beta"] - p["bn2_mean"] * bn2_s[0]).reshape(1, Cout)

    dw_w = jnp.transpose(p["dw_w"], (1, 2, 0)).reshape(dw_k * dw_k, C)    # (K*K, C)
    se_w1 = jnp.transpose(p["se_w1"])                                     # (C, Cr)
    Cr = se_w1.shape[1]
    se_b1 = p["se_b1"].reshape(1, Cr)
    se_w2 = jnp.transpose(p["se_w2"])                                     # (Cr, C)
    se_b2 = p["se_b2"].reshape(1, C)
    pw_w = jnp.transpose(p["pw_w"]).astype(jnp.bfloat16)                  # (C, Cout) bf16 MXU operand

    kernel = functools.partial(_dsconv_kernel, H=H, W=W, K=dw_k,
                               pad_lo_w=pad_lo_w, has_skip=has_skip)

    # explicit VMEM budget: per-step block footprint with generous headroom, capped
    # safely below v7x's 64 MiB physical VMEM.
    blk_bytes = 4 * (H * W * C + H * W * Cout
                     + (H + 2 * pad) * (pad_lo_w + W + pad) * C)
    vmem_limit = int(min(48 * 2 ** 20, max(16 * 2 ** 20, 32 * blk_bytes)))

    # TODO(synk): for large H*W*C (real EfficientNet shapes) switch to spatial tiling
    # with a two-pass SE (pass 1: DW+BN+SiLU + partial channel sums; pass 2: gate +
    # PW matmul + BN2 + skip) so blocks fit v7x's 64 MiB VMEM.
    # TODO(synk): for C << 128 a channels-on-sublanes / spatial-on-lanes DW layout
    # (pltpu.roll + edge masks) would raise lane utilisation ~16x.

    out_nhwc = pl.pallas_call(
        kernel,
        out_shape=jax.ShapeDtypeStruct((N, H, W, Cout), jnp.float32),
        grid=(N,),
        in_specs=[
            pl.BlockSpec((None, H, W, C), lambda n: (n, 0, 0, 0)),   # image (also the skip)
            pl.BlockSpec((dw_k * dw_k, C), lambda n: (0, 0)),        # dw weights
            pl.BlockSpec((1, C), lambda n: (0, 0)),                  # bn1 scale
            pl.BlockSpec((1, C), lambda n: (0, 0)),                  # bn1 bias
            pl.BlockSpec((C, Cr), lambda n: (0, 0)),                 # SE reduce W
            pl.BlockSpec((1, Cr), lambda n: (0, 0)),                 # SE reduce b
            pl.BlockSpec((Cr, C), lambda n: (0, 0)),                 # SE expand W
            pl.BlockSpec((1, C), lambda n: (0, 0)),                  # SE expand b
            pl.BlockSpec((C, Cout), lambda n: (0, 0)),               # pw weights (bf16)
            pl.BlockSpec((1, Cout), lambda n: (0, 0)),               # bn2 scale
            pl.BlockSpec((1, Cout), lambda n: (0, 0)),               # bn2 bias
        ],
        out_specs=pl.BlockSpec((None, H, W, Cout), lambda n: (n, 0, 0, 0)),
        scratch_shapes=[
            pltpu.VMEM((H + 2 * pad, pad_lo_w + W + pad, C), jnp.float32),  # padded image
        ],
        compiler_params=pltpu.CompilerParams(
            dimension_semantics=("parallel",),       # batch is embarrassingly parallel
            vmem_limit_bytes=vmem_limit,
        ),
    )(x, dw_w, bn1_s, bn1_b, se_w1, se_b1, se_w2, se_b2, pw_w, bn2_s, bn2_b)

    return jnp.transpose(out_nhwc, (0, 3, 1, 2))                          # NHWC -> NCHW


# -------------------- deterministic synthetic parameters ----------------------
def make_params(key, in_ch, out_ch, dw_k=3, se_ratio=0.25):
    reduced = int(in_ch * se_ratio)                  # SE2D: int(in_ch * se_ratio / divisor)
    ks = jax.random.split(key, 14)
    n = lambda k, shape, s=0.2: s * jax.random.normal(k, shape, jnp.float32)
    return {
        "dw_w":      n(ks[0], (in_ch, dw_k, dw_k)),            # conv_dw.weight[:, 0]
        "bn1_gamma": 1.0 + n(ks[1], (in_ch,), 0.1),
        "bn1_beta":  n(ks[2], (in_ch,), 0.1),
        "bn1_mean":  n(ks[3], (in_ch,), 0.1),
        "bn1_var":   0.5 + jnp.abs(jax.random.normal(ks[4], (in_ch,), jnp.float32)),
        "se_w1":     n(ks[5], (reduced, in_ch)),               # conv_reduce.weight[:, :, 0, 0]
        "se_b1":     n(ks[6], (reduced,), 0.1),
        "se_w2":     n(ks[7], (in_ch, reduced)),               # conv_expand.weight[:, :, 0, 0]
        "se_b2":     n(ks[8], (in_ch,), 0.1),
        "pw_w":      n(ks[9], (out_ch, in_ch)),                # conv_pw.weight[:, :, 0, 0]
        "bn2_gamma": 1.0 + n(ks[10], (out_ch,), 0.1),
        "bn2_beta":  n(ks[11], (out_ch,), 0.1),
        "bn2_mean":  n(ks[12], (out_ch,), 0.1),
        "bn2_var":   0.5 + jnp.abs(jax.random.normal(ks[13], (out_ch,), jnp.float32)),
    }


# ---------------------------- pure-JAX reference ------------------------------
def reference(x_nchw, p, dw_k=3):
    N, C, H, W = x_nchw.shape
    pad = dw_k // 2
    x = x_nchw.astype(jnp.float32)
    xp = jnp.pad(x, ((0, 0), (0, 0), (pad, pad), (pad, pad)))
    dw = jnp.zeros((N, C, H, W), jnp.float32)
    for kh in range(dw_k):
        for kw in range(dw_k):
            dw = dw + xp[:, :, kh:kh + H, kw:kw + W] * p["dw_w"][None, :, kh, kw, None, None]

    def bn(v, g, b, m, var):
        return ((v - m[None, :, None, None]) / jnp.sqrt(var[None, :, None, None] + BN_EPS)
                * g[None, :, None, None] + b[None, :, None, None])

    y = bn(dw, p["bn1_gamma"], p["bn1_beta"], p["bn1_mean"], p["bn1_var"])
    y = y * jax.nn.sigmoid(y)
    s = jnp.mean(y, axis=(2, 3))                                # (N, C)
    r = s @ p["se_w1"].T + p["se_b1"]
    r = r * jax.nn.sigmoid(r)
    e = r @ p["se_w2"].T + p["se_b2"]
    y = y * jax.nn.sigmoid(e)[:, :, None, None]
    z = jnp.einsum("nchw,oc->nohw", y, p["pw_w"])
    z = bn(z, p["bn2_gamma"], p["bn2_beta"], p["bn2_mean"], p["bn2_var"])
    return z + x                                                # has_skip is True here


if __name__ == "__main__":
    key = jax.random.PRNGKey(0)
    kx, kp = jax.random.split(key)

    N, C, H, W = 2, 8, 16, 16     # small shapes; in_ch == out_ch -> skip connection active
    Cout = 8
    x = jax.random.normal(kx, (N, C, H, W), jnp.float32)
    params = make_params(kp, C, Cout)

    out = depthwise_separable_conv2d(x, params)
    out = jax.block_until_ready(out)

    ref = reference(x, params)
    # tolerance loosened vs. the pure-f32 version: the pointwise 1x1 conv now uses
    # bf16 MXU operands (f32 accumulation), giving ~1e-2-level deviations at most.
    np.testing.assert_allclose(np.asarray(out), np.asarray(ref), atol=1e-2, rtol=1e-2)
    assert out.shape == (N, Cout, H, W)
    print("KERNEL_OK")
</pallas_src>

<mosaic_0001>
module attributes {stable_mosaic.version = 11 : i64} {
  func.func @_dsconv_kernel(%arg0: i32, %arg1: memref<1x16x16x8xf32, #tpu.memory_space<vmem>>, %arg2: memref<9x8xf32, #tpu.memory_space<vmem>>, %arg3: memref<1x8xf32, #tpu.memory_space<vmem>>, %arg4: memref<1x8xf32, #tpu.memory_space<vmem>>, %arg5: memref<8x2xf32, #tpu.memory_space<vmem>>, %arg6: memref<1x2xf32, #tpu.memory_space<vmem>>, %arg7: memref<2x8xf32, #tpu.memory_space<vmem>>, %arg8: memref<1x8xf32, #tpu.memory_space<vmem>>, %arg9: memref<8x8xbf16, #tpu.memory_space<vmem>>, %arg10: memref<1x8xf32, #tpu.memory_space<vmem>>, %arg11: memref<1x8xf32, #tpu.memory_space<vmem>>, %arg12: memref<1x16x16x8xf32, #tpu.memory_space<vmem>>, %arg13: memref<18x25x8xf32, #tpu.memory_space<vmem>>) attributes {dimension_semantics = [#tpu.dimension_semantics<parallel>], iteration_bounds = array<i64: 2>, scalar_prefetch = 0 : i64, scratch_operands = 1 : i64, tpu.core_type = #tpu.core_type<tc>, window_params = [{transform_indices = @transform_0, window_bounds = array<i64: 1, 16, 16, 8>}, {pipeline_mode = #tpu.pipeline_mode<synchronous>, transform_indices = @transform_1, window_bounds = array<i64: 9, 8>}, {pipeline_mode = #tpu.pipeline_mode<synchronous>, transform_indices = @transform_2, window_bounds = array<i64: 1, 8>}, {pipeline_mode = #tpu.pipeline_mode<synchronous>, transform_indices = @transform_3, window_bounds = array<i64: 1, 8>}, {pipeline_mode = #tpu.pipeline_mode<synchronous>, transform_indices = @transform_4, window_bounds = array<i64: 8, 2>}, {pipeline_mode = #tpu.pipeline_mode<synchronous>, transform_indices = @transform_5, window_bounds = array<i64: 1, 2>}, {pipeline_mode = #tpu.pipeline_mode<synchronous>, transform_indices = @transform_6, window_bounds = array<i64: 2, 8>}, {pipeline_mode = #tpu.pipeline_mode<synchronous>, transform_indices = @transform_7, window_bounds = array<i64: 1, 8>}, {pipeline_mode = #tpu.pipeline_mode<synchronous>, transform_indices = @transform_8, window_bounds = array<i64: 8, 8>}, {pipeline_mode = #tpu.pipeline_mode<synchronous>, transform_indices = @transform_9, window_bounds = array<i64: 1, 8>}, {pipeline_mode = #tpu.pipeline_mode<synchronous>, transform_indices = @transform_10, window_bounds = array<i64: 1, 8>}, {transform_indices = @transform_11, window_bounds = array<i64: 1, 16, 16, 8>}]} {
    %c0 = arith.constant 0 : index
    %c0_0 = arith.constant 0 : index
    %c0_1 = arith.constant 0 : index
    %c0_2 = arith.constant 0 : index
    %0 = vector.load %arg1[%c0, %c0_0, %c0_1, %c0_2] : memref<1x16x16x8xf32, #tpu.memory_space<vmem>>, vector<1x16x16x8xf32>
    %1 = vector.shape_cast %0 : vector<1x16x16x8xf32> to vector<16x16x8xf32>
    %cst = arith.constant 0.000000e+00 : f32
    %2 = vector.broadcast %cst : f32 to vector<18x25x8xf32>
    %c0_3 = arith.constant 0 : index
    %c0_4 = arith.constant 0 : index
    %c0_5 = arith.constant 0 : index
    %3 = vector.load %arg13[%c0_3, %c0_4, %c0_5] : memref<18x25x8xf32, #tpu.memory_space<vmem>>, vector<18x25x8xf32>
    tpu.vector_store %arg13[%c0_3, %c0_4, %c0_5], %2 {strides = array<i32>} : memref<18x25x8xf32, #tpu.memory_space<vmem>>, vector<18x25x8xf32>,
    %c1 = arith.constant 1 : index
    %c8 = arith.constant 8 : index
    %c0_6 = arith.constant 0 : index
    %4 = vector.load %arg13[%c1, %c8, %c0_6] : memref<18x25x8xf32, #tpu.memory_space<vmem>>, vector<16x16x8xf32>
    tpu.vector_store %arg13[%c1, %c8, %c0_6], %1 {strides = array<i32>} : memref<18x25x8xf32, #tpu.memory_space<vmem>>, vector<16x16x8xf32>,
    %c0_7 = arith.constant 0 : index
    %c0_8 = arith.constant 0 : index
    %c0_9 = arith.constant 0 : index
    %5 = vector.load %arg13[%c0_7, %c0_8, %c0_9] : memref<18x25x8xf32, #tpu.memory_space<vmem>>, vector<18x25x8xf32>
    %c0_10 = arith.constant 0 : index
    %c0_11 = arith.constant 0 : index
    %6 = vector.load %arg2[%c0_10, %c0_11] : memref<9x8xf32, #tpu.memory_space<vmem>>, vector<9x8xf32>
    %cst_12 = arith.constant 0.000000e+00 : f32
    %7 = vector.broadcast %cst_12 : f32 to vector<16x16x8xf32>
    %8 = vector.extract_strided_slice %5 {offsets = [0, 7, 0], sizes = [18, 16, 8], strides = [1, 1, 1]} : vector<18x25x8xf32> to vector<18x16x8xf32>
    %9 = vector.extract_strided_slice %6 {offsets = [0, 0], sizes = [1, 8], strides = [1, 1]} : vector<9x8xf32> to vector<1x8xf32>
    %10 = vector.extract_strided_slice %8 {offsets = [0, 0, 0], sizes = [16, 16, 8], strides = [1, 1, 1]} : vector<18x16x8xf32> to vector<16x16x8xf32>
    %11 = vector.shape_cast %9 : vector<1x8xf32> to vector<1x1x8xf32>
    %12 = vector.broadcast %11 : vector<1x1x8xf32> to vector<16x16x8xf32>
    %13 = arith.mulf %10, %12 : vector<16x16x8xf32>
    %14 = arith.addf %7, %13 : vector<16x16x8xf32>
    %15 = vector.extract_strided_slice %6 {offsets = [3, 0], sizes = [1, 8], strides = [1, 1]} : vector<9x8xf32> to vector<1x8xf32>
    %16 = vector.extract_strided_slice %8 {offsets = [1, 0, 0], sizes = [16, 16, 8], strides = [1, 1, 1]} : vector<18x16x8xf32> to vector<16x16x8xf32>
    %17 = vector.shape_cast %15 : vector<1x8xf32> to vector<1x1x8xf32>
    %18 = vector.broadcast %17 : vector<1x1x8xf32> to vector<16x16x8xf32>
    %19 = arith.mulf %16, %18 : vector<16x16x8xf32>
    %20 = arith.addf %14, %19 : vector<16x16x8xf32>
    %21 = vector.extract_strided_slice %6 {offsets = [6, 0], sizes = [1, 8], strides = [1, 1]} : vector<9x8xf32> to vector<1x8xf32>
    %22 = vector.extract_strided_slice %8 {offsets = [2, 0, 0], sizes = [16, 16, 8], strides = [1, 1, 1]} : vector<18x16x8xf32> to vector<16x16x8xf32>
    %23 = vector.shape_cast %21 : vector<1x8xf32> to vector<1x1x8xf32>
    %24 = vector.broadcast %23 : vector<1x1x8xf32> to vector<16x16x8xf32>
    %25 = arith.mulf %22, %24 : vector<16x16x8xf32>
    %26 = arith.addf %20, %25 : vector<16x16x8xf32>
    %27 = vector.extract_strided_slice %5 {offsets = [0, 8, 0], sizes = [18, 16, 8], strides = [1, 1, 1]} : vector<18x25x8xf32> to vector<18x16x8xf32>
    %28 = vector.extract_strided_slice %6 {offsets = [1, 0], sizes = [1, 8], strides = [1, 1]} : vector<9x8xf32> to vector<1x8xf32>
    %29 = vector.extract_strided_slice %27 {offsets = [0, 0, 0], sizes = [16, 16, 8], strides = [1, 1, 1]} : vector<18x16x8xf32> to vector<16x16x8xf32>
    %30 = vector.shape_cast %28 : vector<1x8xf32> to vector<1x1x8xf32>
    %31 = vector.broadcast %30 : vector<1x1x8xf32> to vector<16x16x8xf32>
    %32 = arith.mulf %29, %31 : vector<16x16x8xf32>
    %33 = arith.addf %26, %32 : vector<16x16x8xf32>
    %34 = vector.extract_strided_slice %6 {offsets = [4, 0], sizes = [1, 8], strides = [1, 1]} : vector<9x8xf32> to vector<1x8xf32>
    %35 = vector.extract_strided_slice %27 {offsets = [1, 0, 0], sizes = [16, 16, 8], strides = [1, 1, 1]} : vector<18x16x8xf32> to vector<16x16x8xf32>
    %36 = vector.shape_cast %34 : vector<1x8xf32> to vector<1x1x8xf32>
    %37 = vector.broadcast %36 : vector<1x1x8xf32> to vector<16x16x8xf32>
    %38 = arith.mulf %35, %37 : vector<16x16x8xf32>
    %39 = arith.addf %33, %38 : vector<16x16x8xf32>
    %40 = vector.extract_strided_slice %6 {offsets = [7, 0], sizes = [1, 8], strides = [1, 1]} : vector<9x8xf32> to vector<1x8xf32>
    %41 = vector.extract_strided_slice %27 {offsets = [2, 0, 0], sizes = [16, 16, 8], strides = [1, 1, 1]} : vector<18x16x8xf32> to vector<16x16x8xf32>
    %42 = vector.shape_cast %40 : vector<1x8xf32> to vector<1x1x8xf32>
    %43 = vector.broadcast %42 : vector<1x1x8xf32> to vector<16x16x8xf32>
    %44 = arith.mulf %41, %43 : vector<16x16x8xf32>
    %45 = arith.addf %39, %44 : vector<16x16x8xf32>
    %46 = vector.extract_strided_slice %5 {offsets = [0, 9, 0], sizes = [18, 16, 8], strides = [1, 1, 1]} : vector<18x25x8xf32> to vector<18x16x8xf32>
    %47 = vector.extract_strided_slice %6 {offsets = [2, 0], sizes = [1, 8], strides = [1, 1]} : vector<9x8xf32> to vector<1x8xf32>
    %48 = vector.extract_strided_slice %46 {offsets = [0, 0, 0], sizes = [16, 16, 8], strides = [1, 1, 1]} : vector<18x16x8xf32> to vector<16x16x8xf32>
    %49 = vector.shape_cast %47 : vector<1x8xf32> to vector<1x1x8xf32>
    %50 = vector.broadcast %49 : vector<1x1x8xf32> to vector<16x16x8xf32>
    %51 = arith.mulf %48, %50 : vector<16x16x8xf32>
    %52 = arith.addf %45, %51 : vector<16x16x8xf32>
    %53 = vector.extract_strided_slice %6 {offsets = [5, 0], sizes = [1, 8], strides = [1, 1]} : vector<9x8xf32> to vector<1x8xf32>
    %54 = vector.extract_strided_slice %46 {offsets = [1, 0, 0], sizes = [16, 16, 8], strides = [1, 1, 1]} : vector<18x16x8xf32> to vector<16x16x8xf32>
    %55 = vector.shape_cast %53 : vector<1x8xf32> to vector<1x1x8xf32>
    %56 = vector.broadcast %55 : vector<1x1x8xf32> to vector<16x16x8xf32>
    %57 = arith.mulf %54, %56 : vector<16x16x8xf32>
    %58 = arith.addf %52, %57 : vector<16x16x8xf32>
    %59 = vector.extract_strided_slice %6 {offsets = [8, 0], sizes = [1, 8], strides = [1, 1]} : vector<9x8xf32> to vector<1x8xf32>
    %60 = vector.extract_strided_slice %46 {offsets = [2, 0, 0], sizes = [16, 16, 8], strides = [1, 1, 1]} : vector<18x16x8xf32> to vector<16x16x8xf32>
    %61 = vector.shape_cast %59 : vector<1x8xf32> to vector<1x1x8xf32>
    %62 = vector.broadcast %61 : vector<1x1x8xf32> to vector<16x16x8xf32>
    %63 = arith.mulf %60, %62 : vector<16x16x8xf32>
    %64 = arith.addf %58, %63 : vector<16x16x8xf32>
    %c0_13 = arith.constant 0 : index
    %c0_14 = arith.constant 0 : index
    %65 = vector.load %arg3[%c0_13, %c0_14] : memref<1x8xf32, #tpu.memory_space<vmem>>, vector<1x8xf32>
    %66 = vector.shape_cast %65 : vector<1x8xf32> to vector<1x1x8xf32>
    %67 = vector.broadcast %66 : vector<1x1x8xf32> to vector<16x16x8xf32>
    %68 = arith.mulf %64, %67 : vector<16x16x8xf32>
    %c0_15 = arith.constant 0 : index
    %c0_16 = arith.constant 0 : index
    %69 = vector.load %arg4[%c0_15, %c0_16] : memref<1x8xf32, #tpu.memory_space<vmem>>, vector<1x8xf32>
    %70 = vector.shape_cast %69 : vector<1x8xf32> to vector<1x1x8xf32>
    %71 = vector.broadcast %70 : vector<1x1x8xf32> to vector<16x16x8xf32>
    %72 = arith.addf %68, %71 : vector<16x16x8xf32>
    %73 = arith.negf %72 : vector<16x16x8xf32>
    %74 = math.exp %73 : vector<16x16x8xf32>
    %cst_17 = arith.constant 1.000000e+00 : f32
    %75 = vector.broadcast %cst_17 : f32 to vector<16x16x8xf32>
    %76 = arith.addf %75, %74 : vector<16x16x8xf32>
    %77 = arith.divf %75, %76 : vector<16x16x8xf32>
    %78 = arith.mulf %72, %77 : vector<16x16x8xf32>
    %79 = vector.shape_cast %78 : vector<16x16x8xf32> to vector<256x8xf32>
    %cst_18 = arith.constant dense<0.000000e+00> : vector<8xf32>
    %80 = vector.multi_reduction <add>, %79, %cst_18 [0] : vector<256x8xf32> to vector<8xf32>
    %81 = vector.shape_cast %80 : vector<8xf32> to vector<1x8xf32>
    %cst_19 = arith.constant 2.560000e+02 : f32
    %82 = vector.broadcast %cst_19 : f32 to vector<1x8xf32>
    %83 = arith.divf %81, %82 : vector<1x8xf32>
    %c0_20 = arith.constant 0 : index
    %c0_21 = arith.constant 0 : index
    %84 = vector.load %arg5[%c0_20, %c0_21] : memref<8x2xf32, #tpu.memory_space<vmem>>, vector<8x2xf32>
    %cst_22 = arith.constant dense<0.000000e+00> : vector<1x2xf32>
    %85 = tpu.matmul %83, %84, %cst_22 {dimension_numbers = #tpu.dot_dimension_numbers<[1], [0], [0], [1], [0, 0, 1, 1], [], []>} : vector<1x8xf32>, vector<8x2xf32>, vector<1x2xf32> -> vector<1x2xf32>
    %c0_23 = arith.constant 0 : index
    %c0_24 = arith.constant 0 : index
    %86 = vector.load %arg6[%c0_23, %c0_24] : memref<1x2xf32, #tpu.memory_space<vmem>>, vector<1x2xf32>
    %87 = arith.addf %85, %86 : vector<1x2xf32>
    %88 = arith.negf %87 : vector<1x2xf32>
    %89 = math.exp %88 : vector<1x2xf32>
    %cst_25 = arith.constant 1.000000e+00 : f32
    %90 = vector.broadcast %cst_25 : f32 to vector<1x2xf32>
    %91 = arith.addf %90, %89 : vector<1x2xf32>
    %92 = arith.divf %90, %91 : vector<1x2xf32>
    %93 = arith.mulf %87, %92 : vector<1x2xf32>
    %c0_26 = arith.constant 0 : index
    %c0_27 = arith.constant 0 : index
    %94 = vector.load %arg7[%c0_26, %c0_27] : memref<2x8xf32, #tpu.memory_space<vmem>>, vector<2x8xf32>
    %cst_28 = arith.constant dense<0.000000e+00> : vector<1x8xf32>
    %95 = tpu.matmul %93, %94, %cst_28 {dimension_numbers = #tpu.dot_dimension_numbers<[1], [0], [0], [1], [0, 0, 1, 1], [], []>} : vector<1x2xf32>, vector<2x8xf32>, vector<1x8xf32> -> vector<1x8xf32>
    %c0_29 = arith.constant 0 : index
    %c0_30 = arith.constant 0 : index
    %96 = vector.load %arg8[%c0_29, %c0_30] : memref<1x8xf32, #tpu.memory_space<vmem>>, vector<1x8xf32>
    %97 = arith.addf %95, %96 : vector<1x8xf32>
    %98 = arith.negf %97 : vector<1x8xf32>
    %99 = math.exp %98 : vector<1x8xf32>
    %cst_31 = arith.constant 1.000000e+00 : f32
    %100 = vector.broadcast %cst_31 : f32 to vector<1x8xf32>
    %101 = arith.addf %100, %99 : vector<1x8xf32>
    %102 = arith.divf %100, %101 : vector<1x8xf32>
    %103 = vector.broadcast %102 : vector<1x8xf32> to vector<256x8xf32>
    %104 = arith.mulf %79, %103 : vector<256x8xf32>
    %105 = arith.truncf %104 : vector<256x8xf32> to vector<256x8xbf16>
    %c0_32 = arith.constant 0 : index
    %c0_33 = arith.constant 0 : index
    %106 = vector.load %arg9[%c0_32, %c0_33] : memref<8x8xbf16, #tpu.memory_space<vmem>>, vector<8x8xbf16>
    %cst_34 = arith.constant dense<0.000000e+00> : vector<256x8xf32>
    %107 = tpu.matmul %105, %106, %cst_34 {dimension_numbers = #tpu.dot_dimension_numbers<[1], [0], [0], [1], [0, 0, 1, 1], [], []>} : vector<256x8xbf16>, vector<8x8xbf16>, vector<256x8xf32> -> vector<256x8xf32>
    %c0_35 = arith.constant 0 : index
    %c0_36 = arith.constant 0 : index
    %108 = vector.load %arg10[%c0_35, %c0_36] : memref<1x8xf32, #tpu.memory_space<vmem>>, vector<1x8xf32>
    %109 = vector.broadcast %108 : vector<1x8xf32> to vector<256x8xf32>
    %110 = arith.mulf %107, %109 : vector<256x8xf32>
    %c0_37 = arith.constant 0 : index
    %c0_38 = arith.constant 0 : index
    %111 = vector.load %arg11[%c0_37, %c0_38] : memref<1x8xf32, #tpu.memory_space<vmem>>, vector<1x8xf32>
    %112 = vector.broadcast %111 : vector<1x8xf32> to vector<256x8xf32>
    %113 = arith.addf %110, %112 : vector<256x8xf32>
    %114 = vector.shape_cast %1 : vector<16x16x8xf32> to vector<256x8xf32>
    %115 = arith.addf %113, %114 : vector<256x8xf32>
    %116 = vector.shape_cast %115 : vector<256x8xf32> to vector<16x16x8xf32>
    %c0_39 = arith.constant 0 : index
    %c0_40 = arith.constant 0 : index
    %c0_41 = arith.constant 0 : index
    %c0_42 = arith.constant 0 : index
    %117 = vector.load %arg12[%c0_39, %c0_40, %c0_41, %c0_42] : memref<1x16x16x8xf32, #tpu.memory_space<vmem>>, vector<1x16x16x8xf32>
    %118 = vector.shape_cast %117 : vector<1x16x16x8xf32> to vector<16x16x8xf32>
    %119 = vector.shape_cast %116 : vector<16x16x8xf32> to vector<1x16x16x8xf32>
    tpu.vector_store %arg12[%c0_39, %c0_40, %c0_41, %c0_42], %119 {strides = array<i32>} : memref<1x16x16x8xf32, #tpu.memory_space<vmem>>, vector<1x16x16x8xf32>,
    return
  }
  func.func @transform_0(%arg0: i32) -> (i32, i32, i32, i32) {
    %c0_i32 = arith.constant 0 : i32
    %c0_i32_0 = arith.constant 0 : i32
    %c0_i32_1 = arith.constant 0 : i32
    %c0_i32_2 = arith.constant 0 : i32
    return %arg0, %c0_i32, %c0_i32_0, %c0_i32_1 : i32, i32, i32, i32
  }
  func.func @transform_1(%arg0: i32) -> (i32, i32) {
    %c0_i32 = arith.constant 0 : i32
    %c0_i32_0 = arith.constant 0 : i32
    %c0_i32_1 = arith.constant 0 : i32
    return %c0_i32, %c0_i32_0 : i32, i32
  }
  func.func @transform_2(%arg0: i32) -> (i32, i32) {
    %c0_i32 = arith.constant 0 : i32
    %c0_i32_0 = arith.constant 0 : i32
    %c0_i32_1 = arith.constant 0 : i32
    return %c0_i32, %c0_i32_0 : i32, i32
  }
  func.func @transform_3(%arg0: i32) -> (i32, i32) {
    %c0_i32 = arith.constant 0 : i32
    %c0_i32_0 = arith.constant 0 : i32
    %c0_i32_1 = arith.constant 0 : i32
    return %c0_i32, %c0_i32_0 : i32, i32
  }
  func.func @transform_4(%arg0: i32) -> (i32, i32) {
    %c0_i32 = arith.constant 0 : i32
    %c0_i32_0 = arith.constant 0 : i32
    %c0_i32_1 = arith.constant 0 : i32
    return %c0_i32, %c0_i32_0 : i32, i32
  }
  func.func @transform_5(%arg0: i32) -> (i32, i32) {
    %c0_i32 = arith.constant 0 : i32
    %c0_i32_0 = arith.constant 0 : i32
    %c0_i32_1 = arith.constant 0 : i32
    return %c0_i32, %c0_i32_0 : i32, i32
  }
  func.func @transform_6(%arg0: i32) -> (i32, i32) {
    %c0_i32 = arith.constant 0 : i32
    %c0_i32_0 = arith.constant 0 : i32
    %c0_i32_1 = arith.constant 0 : i32
    return %c0_i32, %c0_i32_0 : i32, i32
  }
  func.func @transform_7(%arg0: i32) -> (i32, i32) {
    %c0_i32 = arith.constant 0 : i32
    %c0_i32_0 = arith.constant 0 : i32
    %c0_i32_1 = arith.constant 0 : i32
    return %c0_i32, %c0_i32_0 : i32, i32
  }
  func.func @transform_8(%arg0: i32) -> (i32, i32) {
    %c0_i32 = arith.constant 0 : i32
    %c0_i32_0 = arith.constant 0 : i32
    %c0_i32_1 = arith.constant 0 : i32
    return %c0_i32, %c0_i32_0 : i32, i32
  }
  func.func @transform_9(%arg0: i32) -> (i32, i32) {
    %c0_i32 = arith.constant 0 : i32
    %c0_i32_0 = arith.constant 0 : i32
    %c0_i32_1 = arith.constant 0 : i32
    return %c0_i32, %c0_i32_0 : i32, i32
  }
  func.func @transform_10(%arg0: i32) -> (i32, i32) {
    %c0_i32 = arith.constant 0 : i32
    %c0_i32_0 = arith.constant 0 : i32
    %c0_i32_1 = arith.constant 0 : i32
    return %c0_i32, %c0_i32_0 : i32, i32
  }
  func.func @transform_11(%arg0: i32) -> (i32, i32, i32, i32) {
    %c0_i32 = arith.constant 0 : i32
    %c0_i32_0 = arith.constant 0 : i32
    %c0_i32_1 = arith.constant 0 : i32
    %c0_i32_2 = arith.constant 0 : i32
    return %arg0, %c0_i32, %c0_i32_0, %c0_i32_1 : i32, i32, i32, i32
  }
}

</mosaic_0001>

<bundles_post_ra>
// kernel: tpu_custom_call.1
= control target key start
LH: loop header
LB: loop body
LE: loop exit
PB: predicated region body
PF: predicated region fallthrough
CT: control target
= control target key end

     0   :  { %s4149_s17 = smov 0   ;;  %s8788_s0 = inlined_call_operand.vmem [shape: f32[2,16,16,8], index: 0, kind: input, shape index: {}]   ;;  %s8789_s1 = inlined_call_operand.vmem [shape: f32[9,8], index: 1, kind: input, shape index: {}]   ;;  %s8790_s2 = inlined_call_operand.vmem [shape: f32[1,8], index: 2, kind: input, shape index: {}]   ;;  %s8791_s3 = inlined_call_operand.vmem [shape: f32[1,8], index: 3, kind: input, shape index: {}]   ;;  %s8792_s4 = inlined_call_operand.vmem [shape: f32[8,2], index: 4, kind: input, shape index: {}]   ;;  %s8793_s5 = inlined_call_operand.vmem [shape: f32[1,2], index: 5, kind: input, shape index: {}]   ;;  %s8794_s6 = inlined_call_operand.vmem [shape: f32[2,8], index: 6, kind: input, shape index: {}]   ;;  %s8795_s7 = inlined_call_operand.vmem [shape: f32[1,8], index: 7, kind: input, shape index: {}]   ;;  %s8796_s8 = inlined_call_operand.vmem [shape: bf16[8,8], index: 8, kind: input, shape index: {}]   ;;  %s8797_s9 = inlined_call_operand.vmem [shape: f32[1,8], index: 9, kind: input, shape index: {}]   ;;  %s8798_s10 = inlined_call_operand.vmem [shape: f32[1,8], index: 10, kind: input, shape index: {}]   ;;  %s8799_s11 = inlined_call_operand.vmem [shape: f32[2,16,16,8], index: 11, kind: output, shape index: {}]  }
   0x1 LB: > { %s3676_s18 = sadd.s32 4294967295, %s4085_s17   ;;  %p3680_p0 = scmp.ge.s32.totalorder %s4085_s17, 1  ;;  %s4085_s17 = sphi %s4149_s17, %s21_s17  }
   0x2   : > { %p337_p1 = scmp.lt.s32.totalorder %s4085_s17, 3 }
   0x4   : > { %p338_p2 = pnand %p3680_p0, %p337_p1 }
   0x6   : > { %341 = sbr.rel (%p338_p2) target bundleno = 1323 (0x52b), region = 64 }
   0xb   : > { %v4160_v0 = vld [vmem:[%s8792_s4] sm:$0xff]  ;;  %p4164_p3 = scmp.lt.s32.totalorder %s3676_s18, 1  ;;  %vm420_vm0 = vcmask 64512   ;;  %vm424_vm1 = vcmask 57344   ;;  %v4087_v1 = vmov 0.0   ;;  %vm4088_vm2 = vmmov 0  }
   0xc   : > { %3784 = vmatprep.subr.mxu0 %v4087_v1  ;;  %3786 = vmatprep.mubr.msk.f32.mxu0 %vm4088_vm2, %v4087_v1  ;;  %421 = vst.msk [vmem:[#allocation2] sm:$0xff] %vm420_vm0, %v4087_v1  ;;  %422 = vst.msk [vmem:[#allocation2 + $0x8] sm:$0xff] %vm420_vm0, %v4087_v1  ;;  %v601_v34 = vlaneseq  ;;  %v599_v37 = vld [vmem:[%s8789_s1] sm:$0xff]  ;;  %vm969_vm3 = vcmask 1046528   ;;  %vm1638_vm4 = vcmask 1045504   ;;  %vm2861_vm5 = vcmask 1040384  }
   0xd   : > { %423 = vst.msk [vmem:[#allocation2 + $0x10] sm:$0xff] %vm420_vm0, %v4087_v1  ;;  %426 = vst.msk [vmem:[#allocation2 + $0x20] sm:$0xff] %vm420_vm0, %v4087_v1  ;;  %3785 = vmatpush3.msra.mxu0 %v4160_v0  ;;  %s10299_s18 = smov (!%p4164_p3, %s3676_s18), 1  ;;  %3789 = vmatprep.subr.mxu1 %v4087_v1  ;;  %vm3133_vm6 = vcmask 1041408   ;;  %vm3129_vm7 = vcmask 15360   ;;  %vm3314_vm8 = vcmask 1043456  }
   0xe   : > { %425 = vst.msk [vmem:[#allocation2 + $0x18] sm:$0x1] %vm424_vm1, %v4087_v1  ;;  %429 = vst.msk [vmem:[#allocation2 + $0x38] sm:$0x1] %vm424_vm1, %v4087_v1  ;;  %3791 = vmatprep.mubr.msk.f32.mxu1 %vm4088_vm2, %v4087_v1  ;;  %s3761_s22 = sshll.u32 %s10299_s18, 8  ;;  %v4493_v35 = vshrl.u32 %v601_v34, 7 }
   0xf   : > { %427 = vst.msk [vmem:[#allocation2 + $0x28] sm:$0xff] %vm420_vm0, %v4087_v1  ;;  %428 = vst.msk [vmem:[#allocation2 + $0x30] sm:$0xff] %vm420_vm0, %v4087_v1  ;;  %s4331_s25 = scalar_lea.vmem %s8788_s0, %s3761_s22  ;;  %s8629_s15 = scalar_lea.vmem %s8799_s11, %s3761_s22 }
  0x10   : > { %430 = vst.msk [vmem:[#allocation2 + $0x40] sm:$0xff] %vm420_vm0, %v4087_v1  ;;  %431 = vst.msk [vmem:[#allocation2 + $0x48] sm:$0xff] %vm420_vm0, %v4087_v1  ;;  %v4334_v2 = vld [vmem:[%s4331_s25] sm:$0xff]  ;;  %v4337_v3 = vld [vmem:[%s4331_s25 + $0x8] sm:$0xff]  ;;  %v8800_v36 = vsub.s32 0, %v4493_v35  ;;  %v903_v38 = vsub.s32 1, %v4493_v35 }
  0x11   : > { %432 = vst.msk [vmem:[#allocation2 + $0x50] sm:$0xff] %vm420_vm0, %v4087_v1  ;;  %434 = vst.msk [vmem:[#allocation2 + $0x60] sm:$0xff] %vm420_vm0, %v4087_v1  ;;  %v4340_v4 = vld [vmem:[%s4331_s25 + $0x10] sm:$0xff]  ;;  %v4343_v5 = vld [vmem:[%s4331_s25 + $0x18] sm:$0xff]  ;;  %v703_v39 = vsub.s32 3, %v4493_v35  ;;  %v803_v40 = vsub.s32 6, %v4493_v35 }
  0x12   : > { %433 = vst.msk [vmem:[#allocation2 + $0x58] sm:$0x1] %vm424_vm1, %v4087_v1  ;;  %437 = vst.msk [vmem:[#allocation2 + $0x78] sm:$0x1] %vm424_vm1, %v4087_v1  ;;  %v4346_v6 = vld [vmem:[%s4331_s25 + $0x20] sm:$0xff]  ;;  %v4349_v7 = vld [vmem:[%s4331_s25 + $0x28] sm:$0xff]  ;;  %v4504_v41 = vrot.slane %v599_v37, %v8800_v36  ;;  %v4508_v46 = vrot.slane %v599_v37, %v903_v38 }
  0x13   : > { %435 = vst.msk [vmem:[#allocation2 + $0x68] sm:$0xff] %vm420_vm0, %v4087_v1  ;;  %436 = vst.msk [vmem:[#allocation2 + $0x70] sm:$0xff] %vm420_vm0, %v4087_v1  ;;  %v4358_v8 = vld [vmem:[%s4331_s25 + $0x30] sm:$0xff]  ;;  %v4361_v9 = vld [vmem:[%s4331_s25 + $0x38] sm:$0xff]  ;;  %v1116_v42 = vsub.s32 4, %v4493_v35  ;;  %v1328_v43 = vsub.s32 7, %v4493_v35  ;;  %v4510_v48 = vrot.slane %v599_v37, %v703_v39  ;;  %v4512_v50 = vrot.slane %v599_v37, %v803_v40 }
  0x14   : > { %438 = vst.msk [vmem:[#allocation2 + $0x80] sm:$0xff] %vm420_vm0, %v4087_v1  ;;  %439 = vst.msk [vmem:[#allocation2 + $0x88] sm:$0xff] %vm420_vm0, %v4087_v1  ;;  %v4364_v10 = vld [vmem:[%s4331_s25 + $0x40] sm:$0xff]  ;;  %v4373_v11 = vld [vmem:[%s4331_s25 + $0x48] sm:$0xff] }
  0x15   : > { %440 = vst.msk [vmem:[#allocation2 + $0x90] sm:$0xff] %vm420_vm0, %v4087_v1  ;;  %442 = vst.msk [vmem:[#allocation2 + $0xa0] sm:$0xff] %vm420_vm0, %v4087_v1  ;;  %v4376_v12 = vld [vmem:[%s4331_s25 + $0x50] sm:$0xff]  ;;  %v4379_v13 = vld [vmem:[%s4331_s25 + $0x58] sm:$0xff]  ;;  %v4524_v55 = vrot.slane %v599_v37, %v1116_v42  ;;  %v4526_v56 = vrot.slane %v599_v37, %v1328_v43 }
  0x16   : > { %441 = vst.msk [vmem:[#allocation2 + $0x98] sm:$0x1] %vm424_vm1, %v4087_v1  ;;  %445 = vst.msk [vmem:[#allocation2 + $0xb8] sm:$0x1] %vm424_vm1, %v4087_v1  ;;  %v4388_v14 = vld [vmem:[%s4331_s25 + $0x60] sm:$0xff]  ;;  %v4391_v15 = vld [vmem:[%s4331_s25 + $0x68] sm:$0xff] }
  0x17   : > { %443 = vst.msk [vmem:[#allocation2 + $0xa8] sm:$0xff] %vm420_vm0, %v4087_v1  ;;  %444 = vst.msk [vmem:[#allocation2 + $0xb0] sm:$0xff] %vm420_vm0, %v4087_v1  ;;  %v4394_v16 = vld [vmem:[%s4331_s25 + $0x70] sm:$0xff]  ;;  %v4403_v17 = vld [vmem:[%s4331_s25 + $0x78] sm:$0xff] }
  0x18   : > { %446 = vst.msk [vmem:[#allocation2 + $0xc0] sm:$0xff] %vm420_vm0, %v4087_v1  ;;  %447 = vst.msk [vmem:[#allocation2 + $0xc8] sm:$0xff] %vm420_vm0, %v4087_v1  ;;  %v4406_v18 = vld [vmem:[%s4331_s25 + $0x80] sm:$0xff]  ;;  %v4409_v19 = vld [vmem:[%s4331_s25 + $0x88] sm:$0xff] }
  0x19   : > { %448 = vst.msk [vmem:[#allocation2 + $0xd0] sm:$0xff] %vm420_vm0, %v4087_v1  ;;  %450 = vst.msk [vmem:[#allocation2 + $0xe0] sm:$0xff] %vm420_vm0, %v4087_v1  ;;  %v4418_v20 = vld [vmem:[%s4331_s25 + $0x90] sm:$0xff]  ;;  %v4421_v21 = vld [vmem:[%s4331_s25 + $0x98] sm:$0xff] }
  0x1a   : > { %449 = vst.msk [vmem:[#allocation2 + $0xd8] sm:$0x1] %vm424_vm1, %v4087_v1  ;;  %453 = vst.msk [vmem:[#allocation2 + $0xf8] sm:$0x1] %vm424_vm1, %v4087_v1  ;;  %v4424_v22 = vld [vmem:[%s4331_s25 + $0xa0] sm:$0xff]  ;;  %v4433_v23 = vld [vmem:[%s4331_s25 + $0xa8] sm:$0xff] }
  0x1b   : > { %451 = vst.msk [vmem:[#allocation2 + $0xe8] sm:$0xff] %vm420_vm0, %v4087_v1  ;;  %452 = vst.msk [vmem:[#allocation2 + $0xf0] sm:$0xff] %vm420_vm0, %v4087_v1  ;;  %v4436_v24 = vld [vmem:[%s4331_s25 + $0xb0] sm:$0xff]  ;;  %v4439_v25 = vld [vmem:[%s4331_s25 + $0xb8] sm:$0xff] }
  0x1c   : > { %454 = vst.msk [vmem:[#allocation2 + $0x100] sm:$0xff] %vm420_vm0, %v4087_v1  ;;  %455 = vst.msk [vmem:[#allocation2 + $0x108] sm:$0xff] %vm420_vm0, %v4087_v1  ;;  %v4448_v26 = vld [vmem:[%s4331_s25 + $0xc0] sm:$0xff]  ;;  %v4451_v27 = vld [vmem:[%s4331_s25 + $0xc8] sm:$0xff] }
  0x1d   : > { %456 = vst.msk [vmem:[#allocation2 + $0x110] sm:$0xff] %vm420_vm0, %v4087_v1  ;;  %458 = vst.msk [vmem:[#allocation2 + $0x120] sm:$0xff] %vm420_vm0, %v4087_v1  ;;  %v4454_v28 = vld [vmem:[%s4331_s25 + $0xd0] sm:$0xff]  ;;  %v4463_v29 = vld [vmem:[%s4331_s25 + $0xd8] sm:$0xff] }
  0x1e   : > { %457 = vst.msk [vmem:[#allocation2 + $0x118] sm:$0x1] %vm424_vm1, %v4087_v1  ;;  %461 = vst.msk [vmem:[#allocation2 + $0x138] sm:$0x1] %vm424_vm1, %v4087_v1  ;;  %v4466_v30 = vld [vmem:[%s4331_s25 + $0xe0] sm:$0xff]  ;;  %v4469_v31 = vld [vmem:[%s4331_s25 + $0xe8] sm:$0xff] }
  0x1f   : > { %459 = vst.msk [vmem:[#allocation2 + $0x128] sm:$0xff] %vm420_vm0, %v4087_v1  ;;  %460 = vst.msk [vmem:[#allocation2 + $0x130] sm:$0xff] %vm420_vm0, %v4087_v1  ;;  %v4478_v32 = vld [vmem:[%s4331_s25 + $0xf0] sm:$0xff]  ;;  %v4481_v33 = vld [vmem:[%s4331_s25 + $0xf8] sm:$0xff] }
  0x20   : > { %462 = vst.msk [vmem:[#allocation2 + $0x140] sm:$0xff] %vm420_vm0, %v4087_v1  ;;  %463 = vst.msk [vmem:[#allocation2 + $0x148] sm:$0xff] %vm420_vm0, %v4087_v1  ;;  %v527_v44 = vld [vmem:[#allocation2] sm:$0xff]  ;;  %v528_v45 = vld [vmem:[#allocation2 + $0x8] sm:$0xff] }
  0x21   : > { %464 = vst.msk [vmem:[#allocation2 + $0x150] sm:$0xff] %vm420_vm0, %v4087_v1  ;;  %466 = vst.msk [vmem:[#allocation2 + $0x160] sm:$0xff] %vm420_vm0, %v4087_v1  ;;  %v529_v47 = vld [vmem:[#allocation2 + $0x10] sm:$0xff]  ;;  %v531_v49 = vld [vmem:[#allocation2 + $0x20] sm:$0xff]  ;;  %v4519_v53 = vmul.f32 %v4504_v41, %v527_v44  ;;  %v4522_v54 = vmul.f32 %v4504_v41, %v528_v45  ;;  %v4539_v61 = vmul.f32 %v4508_v46, %v528_v45 }
  0x22   : > { %465 = vst.msk [vmem:[#allocation2 + $0x158] sm:$0x1] %vm424_vm1, %v4087_v1  ;;  %469 = vst.msk [vmem:[#allocation2 + $0x178] sm:$0x1] %vm424_vm1, %v4087_v1  ;;  %v4528_v57 = vld [vmem:[#allocation2 + $0x40] sm:$0xff]  ;;  %v4533_v59 = vmul.f32 %v4504_v41, %v529_v47  ;;  %v4536_v60 = vmul.f32 %v4504_v41, %v531_v49  ;;  %v4542_v62 = vmul.f32 %v4508_v46, %v529_v47 }
  0x23   : > { %467 = vst.msk [vmem:[#allocation2 + $0x168] sm:$0xff] %vm420_vm0, %v4087_v1  ;;  %468 = vst.msk [vmem:[#allocation2 + $0x170] sm:$0xff] %vm420_vm0, %v4087_v1  ;;  %v4556_v34 = vmul.f32 %v4504_v41, %v4528_v57  ;;  %v4559_v37 = vmul.f32 %v4510_v48, %v531_v49  ;;  %v4561_v38 = vld [vmem:[#allocation2 + $0x60] sm:$0xff] }
  0x24   : > { %470 = vst.msk [vmem:[#allocation2 + $0x180] sm:$0xff] %vm420_vm0, %v4087_v1  ;;  %471 = vst.msk [vmem:[#allocation2 + $0x188] sm:$0xff] %vm420_vm0, %v4087_v1  ;;  %v4583_v47 = vld [vmem:[#allocation2 + $0x80] sm:$0xff]  ;;  %v4587_v49 = vmul.f32 %v4504_v41, %v4561_v38 }
  0x25   : > { %472 = vst.msk [vmem:[#allocation2 + $0x190] sm:$0xff] %vm420_vm0, %v4087_v1  ;;  %474 = vst.msk [vmem:[#allocation2 + $0x1a0] sm:$0xff] %vm420_vm0, %v4087_v1 }
  0x26   : > { %473 = vst.msk [vmem:[#allocation2 + $0x198] sm:$0x1] %vm424_vm1, %v4087_v1  ;;  %477 = vst.msk [vmem:[#allocation2 + $0x1b8] sm:$0x1] %vm424_vm1, %v4087_v1 }
  0x27   : > { %475 = vst.msk [vmem:[#allocation2 + $0x1a8] sm:$0xff] %vm420_vm0, %v4087_v1  ;;  %476 = vst.msk [vmem:[#allocation2 + $0x1b0] sm:$0xff] %vm420_vm0, %v4087_v1 }
  0x28   : > { %478 = vst.msk [vmem:[#allocation2 + $0x1c0] sm:$0xff] %vm420_vm0, %v4087_v1  ;;  %479 = vst.msk [vmem:[#allocation2 + $0x1c8] sm:$0xff] %vm420_vm0, %v4087_v1 }
  0x29   : > { %480 = vst.msk [vmem:[#allocation2 + $0x1d0] sm:$0xff] %vm420_vm0, %v4087_v1  ;;  %482 = vst.msk [vmem:[#allocation2 + $0x1e0] sm:$0xff] %vm420_vm0, %v4087_v1 }
  0x2a   : > { %481 = vst.msk [vmem:[#allocation2 + $0x1d8] sm:$0x1] %vm424_vm1, %v4087_v1  ;;  %485 = vst.msk [vmem:[#allocation2 + $0x1f8] sm:$0x1] %vm424_vm1, %v4087_v1 }
  0x2b   : > { %483 = vst.msk [vmem:[#allocation2 + $0x1e8] sm:$0xff] %vm420_vm0, %v4087_v1  ;;  %484 = vst.msk [vmem:[#allocation2 + $0x1f0] sm:$0xff] %vm420_vm0, %v4087_v1 }
  0x2c   : > { %486 = vst.msk [vmem:[#allocation2 + $0x200] sm:$0xff] %vm420_vm0, %v4087_v1  ;;  %487 = vst.msk [vmem:[#allocation2 + $0x208] sm:$0xff] %vm420_vm0, %v4087_v1 }
  0x2d   : > { %488 = vst.msk [vmem:[#allocation2 + $0x210] sm:$0xff] %vm420_vm0, %v4087_v1  ;;  %490 = vst.msk [vmem:[#allocation2 + $0x220] sm:$0xff] %vm420_vm0, %v4087_v1 }
  0x2e   : > { %489 = vst.msk [vmem:[#allocation2 + $0x218] sm:$0x1] %vm424_vm1, %v4087_v1  ;;  %493 = vst.msk [vmem:[#allocation2 + $0x238] sm:$0x1] %vm424_vm1, %v4087_v1 }
  0x2f   : > { %491 = vst.msk [vmem:[#allocation2 + $0x228] sm:$0xff] %vm420_vm0, %v4087_v1  ;;  %492 = vst.msk [vmem:[#allocation2 + $0x230] sm:$0xff] %vm420_vm0, %v4087_v1 }
  0x30   : > { %9060 = vst [vmem:[#allocation3_spill] sm:$0xff] %v4334_v2  ;;  %9061 = vst [vmem:[#allocation4_spill] sm:$0xff] %v4337_v3 }
  0x31   : > { %9062 = vst [vmem:[#allocation5_spill] sm:$0xff] %v4340_v4  ;;  %9063 = vst [vmem:[#allocation6_spill] sm:$0xff] %v4343_v5 }
  0x32   : > { %9064 = vst [vmem:[#allocation7_spill] sm:$0xff] %v4346_v6  ;;  %9065 = vst [vmem:[#allocation8_spill] sm:$0xff] %v4349_v7 }
  0x33   : > { %495 = vst.msk [vmem:[#allocation2 + $0x28] sm:$0xff] %vm420_vm0, %v4334_v2  ;;  %496 = vst.msk [vmem:[#allocation2 + $0x30] sm:$0xff] %vm420_vm0, %v4337_v3  ;;  %v4687_v2 = vld [vmem:[#allocation2 + $0x100] sm:$0xff] }
  0x34   : > { %497 = vst.msk [vmem:[#allocation2 + $0x48] sm:$0xff] %vm420_vm0, %v4340_v4  ;;  %9066 = vst [vmem:[#allocation9_spill] sm:$0xff] %v4358_v8 }
  0x35   : > { %9067 = vst [vmem:[#allocation10_spill] sm:$0xff] %v4361_v9  ;;  %9068 = vst [vmem:[#allocation11_spill] sm:$0xff] %v4364_v10 }
  0x36   : > { %498 = vst.msk [vmem:[#allocation2 + $0x50] sm:$0xff] %vm420_vm0, %v4343_v5  ;;  %499 = vst.msk [vmem:[#allocation2 + $0x68] sm:$0xff] %vm420_vm0, %v4346_v6 }
  0x37   : > { %500 = vst.msk [vmem:[#allocation2 + $0x70] sm:$0xff] %vm420_vm0, %v4349_v7  ;;  %9069 = vst [vmem:[#allocation12_spill] sm:$0xff] %v4373_v11 }
  0x38   : > { %9070 = vst [vmem:[#allocation13_spill] sm:$0xff] %v4376_v12  ;;  %9071 = vst [vmem:[#allocation14_spill] sm:$0xff] %v4379_v13 }
  0x39   : > { %501 = vst.msk [vmem:[#allocation2 + $0x88] sm:$0xff] %vm420_vm0, %v4358_v8  ;;  %502 = vst.msk [vmem:[#allocation2 + $0x90] sm:$0xff] %vm420_vm0, %v4361_v9 }
  0x3a   : > { %503 = vst.msk [vmem:[#allocation2 + $0xa8] sm:$0xff] %vm420_vm0, %v4364_v10  ;;  %9072 = vst [vmem:[#allocation15_spill] sm:$0xff] %v4388_v14  ;;  %v4514_v51 = vld [vmem:[#allocation2 + $0x28] sm:$0xff]  ;;  %v4516_v52 = vld [vmem:[#allocation2 + $0x30] sm:$0xff] }
  0x3b   : > { %9073 = vst [vmem:[#allocation16_spill] sm:$0xff] %v4391_v15  ;;  %9074 = vst [vmem:[#allocation17_spill] sm:$0xff] %v4394_v16  ;;  %v4530_v58 = vld [vmem:[#allocation2 + $0x48] sm:$0xff]  ;;  %v4548_v0 = vmul.f32 %v4504_v41, %v4514_v51  ;;  %v4552_v1 = vmul.f32 %v4504_v41, %v4516_v52  ;;  %v4575_v43 = vmul.f32 %v4510_v48, %v4514_v51 }
  0x3c   : > { %504 = vst.msk [vmem:[#allocation2 + $0xb0] sm:$0xff] %vm420_vm0, %v4373_v11  ;;  %505 = vst.msk [vmem:[#allocation2 + $0xc8] sm:$0xff] %vm420_vm0, %v4376_v12  ;;  %v4567_v40 = vmul.f32 %v4504_v41, %v4530_v58  ;;  %v4579_v44 = vmul.f32 %v4510_v48, %v4516_v52  ;;  %v4643_v12 = vld [vmem:[#allocation2 + $0xc0] sm:$0xff] }
  0x3d   : > { %506 = vst.msk [vmem:[#allocation2 + $0xd0] sm:$0xff] %vm420_vm0, %v4379_v13  ;;  %9075 = vst [vmem:[#allocation18_spill] sm:$0xff] %v4403_v17  ;;  %v4544_v63 = vld [vmem:[#allocation2 + $0x50] sm:$0xff]  ;;  %v4563_v39 = vld [vmem:[#allocation2 + $0x68] sm:$0xff]  ;;  %v4669_v8 = vmul.f32 %v4504_v41, %v4643_v12 }
  0x3e   : > { %9076 = vst [vmem:[#allocation19_spill] sm:$0xff] %v4406_v18  ;;  %9077 = vst [vmem:[#allocation20_spill] sm:$0xff] %v4409_v19  ;;  %v4571_v42 = vmul.f32 %v4504_v41, %v4544_v63  ;;  %v4581_v45 = vld [vmem:[#allocation2 + $0x70] sm:$0xff]  ;;  %v4591_v36 = vmul.f32 %v4504_v41, %v4563_v39 }
  0x3f   : > { %507 = vst.msk [vmem:[#allocation2 + $0xe8] sm:$0xff] %vm420_vm0, %v4388_v14  ;;  %508 = vst.msk [vmem:[#allocation2 + $0xf0] sm:$0xff] %vm420_vm0, %v4391_v15  ;;  %v4599_v15 = vmul.f32 %v4510_v48, %v4530_v58  ;;  %v4609_v14 = vmul.f32 %v4504_v41, %v4581_v45  ;;  %v4657_v9 = vmul.f32 %v4510_v48, %v4581_v45 }
  0x40   : > { %509 = vst.msk [vmem:[#allocation2 + $0x108] sm:$0xff] %vm420_vm0, %v4394_v16  ;;  %9078 = vst [vmem:[#allocation21_spill] sm:$0xff] %v4418_v20  ;;  %v4617_v16 = vmul.f32 %v4510_v48, %v4544_v63 }
  0x41   : > { %9079 = vst [vmem:[#allocation22_spill] sm:$0xff] %v4421_v21  ;;  %9080 = vst [vmem:[#allocation23_spill] sm:$0xff] %v4424_v22  ;;  %v4623_v11 = vld [vmem:[#allocation2 + $0xa8] sm:$0xff] }
  0x42   : > { %510 = vst.msk [vmem:[#allocation2 + $0x110] sm:$0xff] %vm420_vm0, %v4403_v17  ;;  %511 = vst.msk [vmem:[#allocation2 + $0x128] sm:$0xff] %vm420_vm0, %v4406_v18  ;;  %v4603_v17 = vld [vmem:[#allocation2 + $0x90] sm:$0xff]  ;;  %v4649_v7 = vmul.f32 %v4504_v41, %v4623_v11 }
  0x43   : > { %512 = vst.msk [vmem:[#allocation2 + $0x130] sm:$0xff] %vm420_vm0, %v4409_v19  ;;  %9081 = vst [vmem:[#allocation24_spill] sm:$0xff] %v4433_v23 }
  0x44   : > { %9082 = vst [vmem:[#allocation25_spill] sm:$0xff] %v4436_v24  ;;  %9083 = vst [vmem:[#allocation26_spill] sm:$0xff] %v4439_v25  ;;  %v4663_v6 = vld [vmem:[#allocation2 + $0xd0] sm:$0xff] }
  0x45   : > { %513 = vst.msk [vmem:[#allocation2 + $0x148] sm:$0xff] %vm420_vm0, %v4418_v20  ;;  %514 = vst.msk [vmem:[#allocation2 + $0x150] sm:$0xff] %vm420_vm0, %v4421_v21  ;;  %v4681_v21 = vmul.f32 %v4510_v48, %v4603_v17  ;;  %v4691_v20 = vmul.f32 %v4504_v41, %v4663_v6 }
  0x46   : > { %515 = vst.msk [vmem:[#allocation2 + $0x168] sm:$0xff] %vm420_vm0, %v4424_v22  ;;  %9084 = vst [vmem:[#allocation27_spill] sm:$0xff] %v4448_v26  ;;  %v4661_v22 = vmul.f32 %v4510_v48, %v4583_v47  ;;  %v4683_v5 = vld [vmem:[#allocation2 + $0xe8] sm:$0xff]  ;;  %v4685_v18 = vld [vmem:[#allocation2 + $0xf0] sm:$0xff] }
  0x47   : > { %9085 = vst [vmem:[#allocation28_spill] sm:$0xff] %v4451_v27  ;;  %9086 = vst [vmem:[#allocation29_spill] sm:$0xff] %v4454_v28 }
  0x48   : > { %516 = vst.msk [vmem:[#allocation2 + $0x170] sm:$0xff] %vm420_vm0, %v4433_v23  ;;  %517 = vst.msk [vmem:[#allocation2 + $0x188] sm:$0xff] %vm420_vm0, %v4436_v24  ;;  %v4645_v23 = vld [vmem:[#allocation2 + $0xc8] sm:$0xff]  ;;  %v4665_v24 = vld [vmem:[#allocation2 + $0xe0] sm:$0xff] }
  0x49   : > { %518 = vst.msk [vmem:[#allocation2 + $0x190] sm:$0xff] %vm420_vm0, %v4439_v25  ;;  %9087 = vst [vmem:[#allocation30_spill] sm:$0xff] %v4463_v29  ;;  %v4673_v19 = vmul.f32 %v4504_v41, %v4645_v23  ;;  %v4695_v4 = vmul.f32 %v4504_v41, %v4665_v24 }
  0x4a   : > { %9088 = vst [vmem:[#allocation31_spill] sm:$0xff] %v4466_v30  ;;  %9089 = vst [vmem:[#allocation32_spill] sm:$0xff] %v4469_v31 }
  0x4b   : > { %519 = vst.msk [vmem:[#allocation2 + $0x1a8] sm:$0xff] %vm420_vm0, %v4448_v26  ;;  %520 = vst.msk [vmem:[#allocation2 + $0x1b0] sm:$0xff] %vm420_vm0, %v4451_v27  ;;  %v4621_v27 = vmul.f32 %v4510_v48, %v4561_v38  ;;  %v4633_v26 = vmul.f32 %v4504_v41, %v4603_v17 }
  0x4c   : > { %521 = vst.msk [vmem:[#allocation2 + $0x1c8] sm:$0xff] %vm420_vm0, %v4454_v28  ;;  %9090 = vst [vmem:[#allocation33_spill] sm:$0xff] %v4478_v32  ;;  %v4641_v28 = vmul.f32 %v4510_v48, %v4563_v39 }
  0x4d   : > { %9091 = vst [vmem:[#allocation34_spill] sm:$0xff] %v4481_v33  ;;  %522 = vst.msk [vmem:[#allocation2 + $0x1d0] sm:$0xff] %vm420_vm0, %v4463_v29  ;;  %v4625_v29 = vld [vmem:[#allocation2 + $0xb0] sm:$0xff] }
  0x4e   : > { %523 = vst.msk [vmem:[#allocation2 + $0x1e8] sm:$0xff] %vm420_vm0, %v4466_v30  ;;  %524 = vst.msk [vmem:[#allocation2 + $0x1f0] sm:$0xff] %vm420_vm0, %v4469_v31  ;;  %v4595_v31 = vmul.f32 %v4510_v48, %v4528_v57  ;;  %v4605_v30 = vld [vmem:[#allocation2 + $0xa0] sm:$0xff]  ;;  %v4653_v25 = vmul.f32 %v4504_v41, %v4625_v29 }
  0x4f   : > { %525 = vst.msk [vmem:[#allocation2 + $0x208] sm:$0xff] %vm420_vm0, %v4478_v32  ;;  %526 = vst.msk [vmem:[#allocation2 + $0x210] sm:$0xff] %vm420_vm0, %v4481_v33  ;;  %v4601_v33 = vld [vmem:[#allocation2 + $0x88] sm:$0xff]  ;;  %v4613_v32 = vmul.f32 %v4504_v41, %v4583_v47  ;;  %v4637_v10 = vmul.f32 %v4504_v41, %v4605_v30 }
  0x50   : > { %9092 = vst [vmem:[#allocation35_spill] sm:$0xff] %v4493_v35  ;;  %9093 = vst [vmem:[#allocation36_spill] sm:$0xff] %v4508_v46  ;;  %v4629_v13 = vmul.f32 %v4504_v41, %v4601_v33  ;;  %v4677_v3 = vmul.f32 %v4510_v48, %v4601_v33  ;;  %v4699_v35 = vmul.f32 %v4510_v48, %v4605_v30 }
  0x51   : > { %9094 = vst [vmem:[#allocation37_spill] sm:$0xff] %v4512_v50  ;;  %9095 = vst [vmem:[#allocation38_spill] sm:$0xff] %v4514_v51  ;;  %v4719_v46 = vmul.f32 %v4504_v41, %v4687_v2  ;;  %v4723_v51 = vmul.f32 %v4510_v48, %v4625_v29  ;;  %v4767_v50 = vld [vmem:[#allocation2 + $0x150] sm:$0xff] }
  0x52   : > { %9096 = vst [vmem:[#allocation39_spill] sm:$0xff] %v4516_v52  ;;  %9097 = vst [vmem:[#allocation40_spill] sm:$0xff] %v4524_v55  ;;  %v4705_v55 = vld [vmem:[#allocation2 + $0x108] sm:$0xff]  ;;  %v4715_v52 = vmul.f32 %v4504_v41, %v4685_v18 }
  0x53   : > { %9098 = vst [vmem:[#allocation41_spill] sm:$0xff] %v4526_v56  ;;  %9099 = vst [vmem:[#allocation42_spill] sm:$0xff] %v4528_v57  ;;  %v4703_v56 = vmul.f32 %v4510_v48, %v4623_v11  ;;  %v4769_v57 = vld [vmem:[#allocation2 + $0x160] sm:$0xff] }
  0x54   : > { %9100 = vst [vmem:[#allocation43_spill] sm:$0xff] %v4530_v58  ;;  %9101 = vst [vmem:[#allocation44_spill] sm:$0xff] %v4539_v61  ;;  %v4711_v61 = vmul.f32 %v4504_v41, %v4683_v5  ;;  %v4765_v58 = vld [vmem:[#allocation2 + $0x148] sm:$0xff] }
  0x55   : > { %9102 = vst [vmem:[#allocation45_spill] sm:$0xff] %v4542_v62  ;;  %9103 = vst [vmem:[#allocation46_spill] sm:$0xff] %v4544_v63  ;;  %v4707_v62 = vld [vmem:[#allocation2 + $0x110] sm:$0xff] }
  0x56   : > { %9104 = vst [vmem:[#allocation47_spill] sm:$0xff] %v4561_v38  ;;  %9105 = vst [vmem:[#allocation48_spill] sm:$0xff] %v4563_v39  ;;  %v4747_v39 = vld [vmem:[#allocation2 + $0x140] sm:$0xff] }
  0x57   : > { %9106 = vst [vmem:[#allocation49_spill] sm:$0xff] %v4581_v45  ;;  %9107 = vst [vmem:[#allocation50_spill] sm:$0xff] %v4583_v47  ;;  %v4739_v47 = vmul.f32 %v4510_v48, %v4643_v12  ;;  %v4745_v45 = vld [vmem:[#allocation2 + $0x130] sm:$0xff] }
  0x58   : > { %9108 = vst [vmem:[#allocation51_spill] sm:$0xff] %v4601_v33  ;;  %9109 = vst [vmem:[#allocation52_spill] sm:$0xff] %v4603_v17  ;;  %v4731_v17 = vmul.f32 %v4504_v41, %v4705_v55  ;;  %v4735_v33 = vmul.f32 %v4504_v41, %v4707_v62 }
  0x59   : > { %9110 = vst [vmem:[#allocation53_spill] sm:$0xff] %v4605_v30  ;;  %9111 = vst [vmem:[#allocation54_spill] sm:$0xff] %v4623_v11  ;;  %v4725_v11 = vld [vmem:[#allocation2 + $0x120] sm:$0xff]  ;;  %v4727_v30 = vld [vmem:[#allocation2 + $0x128] sm:$0xff] }
  0x5a   : > { %9112 = vst [vmem:[#allocation55_spill] sm:$0xff] %v4625_v29  ;;  %9113 = vst [vmem:[#allocation56_spill] sm:$0xff] %v4643_v12  ;;  %v4743_v29 = vmul.f32 %v4510_v48, %v4645_v23  ;;  %v4751_v38 = vmul.f32 %v4504_v41, %v4725_v11  ;;  %v4755_v63 = vmul.f32 %v4504_v41, %v4727_v30 }
  0x5b   : > { %9114 = vst [vmem:[#allocation57_spill] sm:$0xff] %v4645_v23  ;;  %9115 = vst [vmem:[#allocation58_spill] sm:$0xff] %v4663_v6  ;;  %v4759_v12 = vmul.f32 %v4510_v48, %v4663_v6  ;;  %v4763_v23 = vmul.f32 %v4510_v48, %v4665_v24  ;;  %v4781_v6 = vmul.f32 %v4510_v48, %v4683_v5 }
  0x5c   : > { %9116 = vst [vmem:[#allocation59_spill] sm:$0xff] %v4665_v24  ;;  %9117 = vst [vmem:[#allocation60_spill] sm:$0xff] %v4669_v8  ;;  %v4785_v24 = vmul.f32 %v4510_v48, %v4685_v18 }
  0x5d   : > { %9118 = vst [vmem:[#allocation61_spill] sm:$0xff] %v4673_v19  ;;  %9119 = vst [vmem:[#allocation62_spill] sm:$0xff] %v4683_v5  ;;  %v4801_v5 = vmul.f32 %v4504_v41, %v4769_v57 }
  0x5e   : > { %9120 = vst [vmem:[#allocation63_spill] sm:$0xff] %v4685_v18  ;;  %9121 = vst [vmem:[#allocation64_spill] sm:$0xff] %v4687_v2  ;;  %v4805_v18 = vmul.f32 %v4510_v48, %v4687_v2  ;;  %v4825_v2 = vmul.f32 %v4510_v48, %v4707_v62 }
  0x5f   : > { %9122 = vst [vmem:[#allocation65_spill] sm:$0xff] %v4691_v20  ;;  %9123 = vst [vmem:[#allocation66_spill] sm:$0xff] %v4695_v4  ;;  %v4903_v20 = vld [vmem:[#allocation2 + $0x1f0] sm:$0xff] }
  0x60   : > { %9124 = vst [vmem:[#allocation67_spill] sm:$0xff] %v4705_v55  ;;  %9125 = vst [vmem:[#allocation68_spill] sm:$0xff] %v4707_v62  ;;  %v4845_v62 = vmul.f32 %v4510_v48, %v4727_v30 }
  0x61   : > { %9126 = vst [vmem:[#allocation69_spill] sm:$0xff] %v4711_v61  ;;  %9127 = vst [vmem:[#allocation70_spill] sm:$0xff] %v4715_v52  ;;  %v4809_v52 = vld [vmem:[#allocation2 + $0x188] sm:$0xff] }
  0x62   : > { %9128 = vst [vmem:[#allocation71_spill] sm:$0xff] %v4719_v46  ;;  %9129 = vst [vmem:[#allocation72_spill] sm:$0xff] %v4725_v11  ;;  %v4793_v46 = vmul.f32 %v4504_v41, %v4765_v58 }
  0x63   : > { %9130 = vst [vmem:[#allocation73_spill] sm:$0xff] %v4727_v30  ;;  %9131 = vst [vmem:[#allocation74_spill] sm:$0xff] %v4731_v17  ;;  %v4789_v17 = vld [vmem:[#allocation2 + $0x170] sm:$0xff]  ;;  %v4867_v30 = vmul.f32 %v4510_v48, %v4747_v39 }
  0x64   : > { %9132 = vst [vmem:[#allocation75_spill] sm:$0xff] %v4735_v33  ;;  %9133 = vst [vmem:[#allocation76_spill] sm:$0xff] %v4745_v45  ;;  %v4787_v33 = vld [vmem:[#allocation2 + $0x168] sm:$0xff] }
  0x65   : > { %9134 = vst [vmem:[#allocation77_spill] sm:$0xff] %v4747_v39  ;;  %9135 = vst [vmem:[#allocation78_spill] sm:$0xff] %v4751_v38  ;;  %v4773_v38 = vmul.f32 %v4504_v41, %v4745_v45  ;;  %v4813_v61 = vmul.f32 %v4504_v41, %v4787_v33 }
  0x66   : > { %9136 = vst [vmem:[#allocation79_spill] sm:$0xff] %v4755_v63  ;;  %9137 = vst [vmem:[#allocation80_spill] sm:$0xff] %v4763_v23  ;;  %v4777_v63 = vmul.f32 %v4504_v41, %v4747_v39  ;;  %v733_v39 = vmul.f32 %v4510_v48, %v4765_v58 }
  0x67   : > { %9138 = vst [vmem:[#allocation81_spill] sm:$0xff] %v4765_v58  ;;  %9139 = vst [vmem:[#allocation82_spill] sm:$0xff] %v4767_v50 }
  0x68   : > { %9140 = vst [vmem:[#allocation83_spill] sm:$0xff] %v4769_v57  ;;  %9141 = vst [vmem:[#allocation84_spill] sm:$0xff] %v4773_v38  ;;  %v4797_v38 = vmul.f32 %v4504_v41, %v4767_v50 }
  0x69   : > { %9142 = vst [vmem:[#allocation85_spill] sm:$0xff] %v4777_v63  ;;  %9143 = vst [vmem:[#allocation86_spill] sm:$0xff] %v4781_v6  ;;  %v4807_v63 = vld [vmem:[#allocation2 + $0x180] sm:$0xff] }
  0x6a   : > { %9144 = vst [vmem:[#allocation87_spill] sm:$0xff] %v4785_v24  ;;  %9145 = vst [vmem:[#allocation88_spill] sm:$0xff] %v4787_v33  ;;  %v4833_v4 = vmul.f32 %v4504_v41, %v4807_v63 }
  0x6b   : > { %9146 = vst [vmem:[#allocation89_spill] sm:$0xff] %v4789_v17  ;;  %9147 = vst [vmem:[#allocation90_spill] sm:$0xff] %v4793_v46  ;;  %v4817_v46 = vmul.f32 %v4504_v41, %v4789_v17 }
  0x6c   : > { %9148 = vst [vmem:[#allocation91_spill] sm:$0xff] %v4797_v38  ;;  %9149 = vst [vmem:[#allocation92_spill] sm:$0xff] %v4801_v5  ;;  %v4821_v38 = vmul.f32 %v4510_v48, %v4705_v55  ;;  %v4827_v5 = vld [vmem:[#allocation2 + $0x190] sm:$0xff]  ;;  %v4841_v55 = vmul.f32 %v4510_v48, %v4725_v11  ;;  %v4863_v11 = vmul.f32 %v4510_v48, %v4745_v45 }
  0x6d   : > { %9150 = vst [vmem:[#allocation93_spill] sm:$0xff] %v4805_v18  ;;  %9151 = vst [vmem:[#allocation94_spill] sm:$0xff] %v4807_v63  ;;  %v4829_v18 = vld [vmem:[#allocation2 + $0x1a0] sm:$0xff]  ;;  %v740_v19 = vmul.f32 %v4510_v48, %v4827_v5 }
  0x6e   : > { %9152 = vst [vmem:[#allocation95_spill] sm:$0xff] %v4809_v52  ;;  %9153 = vst [vmem:[#allocation96_spill] sm:$0xff] %v4813_v61  ;;  %v4837_v61 = vmul.f32 %v4504_v41, %v4809_v52 }
  0x6f   : > { %9154 = vst [vmem:[#allocation97_spill] sm:$0xff] %v4817_v46  ;;  %9155 = vst [vmem:[#allocation98_spill] sm:$0xff] %v4821_v38  ;;  %v4847_v46 = vld [vmem:[#allocation2 + $0x1a8] sm:$0xff]  ;;  %v4851_v38 = vld [vmem:[#allocation2 + $0x1c0] sm:$0xff] }
  0x70   : > { %9156 = vst [vmem:[#allocation99_spill] sm:$0xff] %v4825_v2  ;;  %9157 = vst [vmem:[#allocation100_spill] sm:$0xff] %v4827_v5  ;;  %v4849_v2 = vld [vmem:[#allocation2 + $0x1b0] sm:$0xff]  ;;  %v4875_v24 = vmul.f32 %v4504_v41, %v4847_v46  ;;  %v4883_v45 = vmul.f32 %v4504_v41, %v4851_v38 }
  0x71   : > { %9158 = vst [vmem:[#allocation101_spill] sm:$0xff] %v4829_v18  ;;  %9159 = vst [vmem:[#allocation102_spill] sm:$0xff] %v4833_v4  ;;  %v4855_v4 = vmul.f32 %v4504_v41, %v4827_v5 }
  0x72   : > { %9160 = vst [vmem:[#allocation103_spill] sm:$0xff] %v4837_v61  ;;  %9161 = vst [vmem:[#allocation104_spill] sm:$0xff] %v4841_v55  ;;  %v4859_v61 = vmul.f32 %v4504_v41, %v4829_v18  ;;  %v4871_v55 = vld [vmem:[#allocation2 + $0x1d0] sm:$0xff] }
  0x73   : > { %9162 = vst [vmem:[#allocation105_spill] sm:$0xff] %v4845_v62  ;;  %9163 = vst [vmem:[#allocation106_spill] sm:$0xff] %v4847_v46  ;;  %v4869_v62 = vld [vmem:[#allocation2 + $0x1c8] sm:$0xff] }
  0x74   : > { %9164 = vst [vmem:[#allocation107_spill] sm:$0xff] %v4849_v2  ;;  %9165 = vst [vmem:[#allocation108_spill] sm:$0xff] %v4851_v38  ;;  %v745_v5 = vmul.f32 %v4510_v48, %v4869_v62 }
  0x75   : > { %9166 = vst [vmem:[#allocation109_spill] sm:$0xff] %v4855_v4  ;;  %9167 = vst [vmem:[#allocation110_spill] sm:$0xff] %v4859_v61  ;;  %v4879_v4 = vmul.f32 %v4504_v41, %v4849_v2  ;;  %v4887_v61 = vld [vmem:[#allocation2 + $0x1e0] sm:$0xff] }
  0x76   : > { %9168 = vst [vmem:[#allocation111_spill] sm:$0xff] %v4863_v11  ;;  %9169 = vst [vmem:[#allocation112_spill] sm:$0xff] %v4867_v30  ;;  %v4889_v30 = vld [vmem:[#allocation2 + $0x1e8] sm:$0xff]  ;;  %v4893_v11 = vmul.f32 %v4504_v41, %v4869_v62  ;;  %v4907_v58 = vmul.f32 %v4504_v41, %v4887_v61 }
  0x77   : > { %9170 = vst [vmem:[#allocation113_spill] sm:$0xff] %v4869_v62  ;;  %9171 = vst [vmem:[#allocation114_spill] sm:$0xff] %v4871_v55  ;;  %v4911_v6 = vmul.f32 %v4504_v41, %v4889_v30 }
  0x78   : > { %9172 = vst [vmem:[#allocation115_spill] sm:$0xff] %v4875_v24  ;;  %9173 = vst [vmem:[#allocation116_spill] sm:$0xff] %v4879_v4  ;;  %v4897_v24 = vmul.f32 %v4504_v41, %v4871_v55  ;;  %v734_v4 = vmul.f32 %v4510_v48, %v4767_v50  ;;  %v4919_v50 = vmul.f32 %v4504_v41, %v4903_v20 }
  0x79   : > { %9174 = vst [vmem:[#allocation117_spill] sm:$0xff] %v4883_v45  ;;  %9175 = vst [vmem:[#allocation118_spill] sm:$0xff] %v4887_v61  ;;  %v735_v45 = vmul.f32 %v4510_v48, %v4769_v57  ;;  %v738_v57 = vmul.f32 %v4510_v48, %v4807_v63  ;;  %v744_v41 = vmul.f32 %v4510_v48, %v4851_v38  ;;  %v4937_v63 = vld [vmem:[#allocation2 + $0x208] sm:$0xff] }
  0x7a   : > { %9176 = vst [vmem:[#allocation119_spill] sm:$0xff] %v4889_v30  ;;  %9177 = vst [vmem:[#allocation120_spill] sm:$0xff] %v4893_v11  ;;  %v736_v11 = vmul.f32 %v4510_v48, %v4787_v33  ;;  %v742_v33 = vmul.f32 %v4510_v48, %v4847_v46  ;;  %v747_v46 = vmul.f32 %v4510_v48, %v4887_v61 }
  0x7b   : > { %9178 = vst [vmem:[#allocation121_spill] sm:$0xff] %v4897_v24  ;;  %9179 = vst [vmem:[#allocation122_spill] sm:$0xff] %v4903_v20  ;;  %v737_v24 = vmul.f32 %v4510_v48, %v4789_v17  ;;  %v743_v17 = vmul.f32 %v4510_v48, %v4849_v2  ;;  %v748_v2 = vmul.f32 %v4510_v48, %v4889_v30 }
  0x7c   : > { %9180 = vst [vmem:[#allocation123_spill] sm:$0xff] %v4907_v58  ;;  %9181 = vst [vmem:[#allocation124_spill] sm:$0xff] %v4911_v6  ;;  %v739_v58 = vmul.f32 %v4510_v48, %v4809_v52  ;;  %v741_v6 = vmul.f32 %v4510_v48, %v4829_v18  ;;  %v4939_v52 = vld [vmem:[#allocation2 + $0x210] sm:$0xff]  ;;  %v746_v18 = vmul.f32 %v4510_v48, %v4871_v55 }
  0x7d   : > { %9182 = vst [vmem:[#allocation125_spill] sm:$0xff] %v4919_v50  ;;  %v4935_v50 = vld [vmem:[#allocation2 + $0x200] sm:$0xff]  ;;  %9184 = vst [vmem:[#allocation127_spill] sm:$0xff] %v4937_v63  ;;  %v749_v38 = vmul.f32 %v4510_v48, %v4903_v20  ;;  %v751_v8 = vmul.f32 %v4510_v48, %v4937_v63  ;;  %v752_v62 = vmul.f32 %v4510_v48, %v4939_v52 }
  0x7e   : > { %9183 = vst [vmem:[#allocation126_spill] sm:$0xff] %v4935_v50  ;;  %9185 = vst [vmem:[#allocation128_spill] sm:$0xff] %v4939_v52  ;;  %v750_v23 = vmul.f32 %v4510_v48, %v4935_v50  ;;  %v4959_v55 = vadd.f32 %v4559_v37, %v4519_v53  ;;  %v4963_v61 = vadd.f32 %v4575_v43, %v4522_v54 }
  0x7f   : > { %v4967_v20 = vadd.f32 %v4579_v44, %v4533_v59  ;;  %v4971_v50 = vadd.f32 %v4595_v31, %v4536_v60  ;;  %v4975_v63 = vadd.f32 %v4599_v15, %v4548_v0  ;;  %v4979_v48 = vadd.f32 %v4617_v16, %v4552_v1  ;;  %v9204_v59 = vld [vmem:[#allocation87_spill] sm:$0xff]  ;;  %v9206_v60 = vld [vmem:[#allocation66_spill] sm:$0xff]  ;;  %v9207_v0 = vld [vmem:[#allocation93_spill] sm:$0xff] }
  0x80   : > { %v4983_v53 = vadd.f32 %v4621_v27, %v4556_v34  ;;  %v4987_v54 = vadd.f32 %v4641_v28, %v4567_v40  ;;  %v4991_v31 = vadd.f32 %v4657_v9, %v4571_v42  ;;  %v4995_v15 = vadd.f32 %v4661_v22, %v4587_v49  ;;  %v9210_v1 = vld [vmem:[#allocation98_spill] sm:$0xff]  ;;  %v9213_v34 = vld [vmem:[#allocation99_spill] sm:$0xff]  ;;  %v9216_v42 = vld [vmem:[#allocation104_spill] sm:$0xff] }
  0x81   : > { %v4999_v16 = vadd.f32 %v4677_v3, %v4591_v36  ;;  %v5003_v27 = vadd.f32 %v4681_v21, %v4609_v14  ;;  %v5007_v28 = vadd.f32 %v4699_v35, %v4613_v32  ;;  %v5011_v9 = vadd.f32 %v4703_v56, %v4629_v13  ;;  %v9197_v32 = vld [vmem:[#allocation60_spill] sm:$0xff]  ;;  %v9200_v36 = vld [vmem:[#allocation61_spill] sm:$0xff]  ;;  %v9201_v56 = vld [vmem:[#allocation86_spill] sm:$0xff] }
  0x82   : > { %9186 = vst [vmem:[#allocation129_spill] sm:$0xff] %v4987_v54  ;;  %9187 = vst [vmem:[#allocation130_spill] sm:$0xff] %v4991_v31  ;;  %v5015_v22 = vadd.f32 %v4723_v51, %v4633_v26  ;;  %v5019_v3 = vadd.f32 %v4739_v47, %v4637_v10  ;;  %v5023_v14 = vadd.f32 %v4743_v29, %v4649_v7  ;;  %v9198_v35 = vld [vmem:[#allocation80_spill] sm:$0xff]  ;;  %v9203_v51 = vld [vmem:[#allocation65_spill] sm:$0xff] }
  0x83   : > { %9188 = vst [vmem:[#allocation131_spill] sm:$0xff] %v4995_v15  ;;  %9189 = vst [vmem:[#allocation132_spill] sm:$0xff] %v4999_v16  ;;  %v5027_v21 = vadd.f32 %v4759_v12, %v4653_v25  ;;  %v5031_v13 = vadd.f32 %v9198_v35, %v9197_v32  ;;  %v5035_v26 = vadd.f32 %v9201_v56, %v9200_v36  ;;  %v9209_v29 = vld [vmem:[#allocation69_spill] sm:$0xff]  ;;  %v9212_v25 = vld [vmem:[#allocation70_spill] sm:$0xff] }
  0x84   : > { %9190 = vst [vmem:[#allocation133_spill] sm:$0xff] %v5003_v27  ;;  %9191 = vst [vmem:[#allocation134_spill] sm:$0xff] %v5007_v28  ;;  %v5039_v10 = vadd.f32 %v9204_v59, %v9203_v51  ;;  %v5043_v7 = vadd.f32 %v9207_v0, %v9206_v60  ;;  %v5047_v12 = vadd.f32 %v9210_v1, %v9209_v29  ;;  %v9215_v40 = vld [vmem:[#allocation71_spill] sm:$0xff]  ;;  %v9218_v44 = vld [vmem:[#allocation74_spill] sm:$0xff] }
  0x85   : > { %9192 = vst [vmem:[#allocation135_spill] sm:$0xff] %v5011_v9  ;;  %9193 = vst [vmem:[#allocation136_spill] sm:$0xff] %v5015_v22  ;;  %v5051_v37 = vadd.f32 %v9213_v34, %v9212_v25  ;;  %v5055_v43 = vadd.f32 %v9216_v42, %v9215_v40  ;;  %v9219_v47 = vld [vmem:[#allocation105_spill] sm:$0xff]  ;;  %v9221_v32 = vld [vmem:[#allocation75_spill] sm:$0xff] }
  0x86   : > { %9194 = vst [vmem:[#allocation137_spill] sm:$0xff] %v5019_v3  ;;  %9195 = vst [vmem:[#allocation138_spill] sm:$0xff] %v5023_v14  ;;  %v5059_v49 = vadd.f32 %v9219_v47, %v9218_v44  ;;  %v9222_v35 = vld [vmem:[#allocation111_spill] sm:$0xff]  ;;  %v9224_v56 = vld [vmem:[#allocation78_spill] sm:$0xff] }
  0x87   : > { %9196 = vst [vmem:[#allocation139_spill] sm:$0xff] %v5027_v21  ;;  %9199 = vst [vmem:[#allocation60_spill] sm:$0xff] %v5031_v13  ;;  %v5063_v36 = vadd.f32 %v9222_v35, %v9221_v32  ;;  %v9225_v51 = vld [vmem:[#allocation112_spill] sm:$0xff]  ;;  %v9227_v60 = vld [vmem:[#allocation79_spill] sm:$0xff] }
  0x88   : > { %9202 = vst [vmem:[#allocation80_spill] sm:$0xff] %v5035_v26  ;;  %9205 = vst [vmem:[#allocation61_spill] sm:$0xff] %v5039_v10  ;;  %v5067_v59 = vadd.f32 %v9225_v51, %v9224_v56  ;;  %v5070_v0 = vadd.f32 %v733_v39, %v9227_v60  ;;  %v9229_v29 = vld [vmem:[#allocation84_spill] sm:$0xff]  ;;  %v9231_v25 = vld [vmem:[#allocation85_spill] sm:$0xff] }
  0x89   : > { %9208 = vst [vmem:[#allocation86_spill] sm:$0xff] %v5043_v7  ;;  %9211 = vst [vmem:[#allocation65_spill] sm:$0xff] %v5047_v12  ;;  %v5073_v1 = vadd.f32 %v734_v4, %v9229_v29  ;;  %v5076_v34 = vadd.f32 %v735_v45, %v9231_v25  ;;  %v9233_v40 = vld [vmem:[#allocation90_spill] sm:$0xff]  ;;  %v9235_v44 = vld [vmem:[#allocation91_spill] sm:$0xff] }
  0x8a   : > { %9214 = vst [vmem:[#allocation87_spill] sm:$0xff] %v5051_v37  ;;  %9217 = vst [vmem:[#allocation66_spill] sm:$0xff] %v5055_v43  ;;  %v5079_v42 = vadd.f32 %v736_v11, %v9233_v40  ;;  %v5082_v47 = vadd.f32 %v737_v24, %v9235_v44  ;;  %v9237_v32 = vld [vmem:[#allocation92_spill] sm:$0xff]  ;;  %v9241_v39 = vld [vmem:[#allocation97_spill] sm:$0xff] }
  0x8b   : > { %9220 = vst [vmem:[#allocation93_spill] sm:$0xff] %v5059_v49  ;;  %9223 = vst [vmem:[#allocation69_spill] sm:$0xff] %v5063_v36  ;;  %v5085_v35 = vadd.f32 %v738_v57, %v9237_v32  ;;  %v9239_v56 = vld [vmem:[#allocation96_spill] sm:$0xff]  ;;  %v5091_v60 = vadd.f32 %v740_v19, %v9241_v39  ;;  %v9243_v4 = vld [vmem:[#allocation102_spill] sm:$0xff] }
  0x8c   : > { %9226 = vst [vmem:[#allocation98_spill] sm:$0xff] %v5067_v59  ;;  %9228 = vst [vmem:[#allocation70_spill] sm:$0xff] %v5070_v0  ;;  %v5088_v51 = vadd.f32 %v739_v58, %v9239_v56  ;;  %v5094_v29 = vadd.f32 %v741_v6, %v9243_v4  ;;  %v9245_v45 = vld [vmem:[#allocation103_spill] sm:$0xff]  ;;  %v9247_v11 = vld [vmem:[#allocation109_spill] sm:$0xff] }
  0x8d   : > { %9230 = vst [vmem:[#allocation99_spill] sm:$0xff] %v5073_v1  ;;  %9232 = vst [vmem:[#allocation71_spill] sm:$0xff] %v5076_v34  ;;  %v5097_v25 = vadd.f32 %v742_v33, %v9245_v45  ;;  %v5100_v40 = vadd.f32 %v743_v17, %v9247_v11  ;;  %v9249_v24 = vld [vmem:[#allocation110_spill] sm:$0xff]  ;;  %v9251_v57 = vld [vmem:[#allocation115_spill] sm:$0xff] }
  0x8e   : > { %9234 = vst [vmem:[#allocation104_spill] sm:$0xff] %v5079_v42  ;;  %9236 = vst [vmem:[#allocation74_spill] sm:$0xff] %v5082_v47  ;;  %v5103_v44 = vadd.f32 %v744_v41, %v9249_v24  ;;  %v5106_v32 = vadd.f32 %v745_v5, %v9251_v57  ;;  %v9253_v58 = vld [vmem:[#allocation116_spill] sm:$0xff]  ;;  %v9255_v19 = vld [vmem:[#allocation117_spill] sm:$0xff] }
  0x8f   : > { %9238 = vst [vmem:[#allocation105_spill] sm:$0xff] %v5085_v35  ;;  %9240 = vst [vmem:[#allocation75_spill] sm:$0xff] %v5088_v51  ;;  %v5109_v56 = vadd.f32 %v746_v18, %v9253_v58  ;;  %v5112_v39 = vadd.f32 %v747_v46, %v9255_v19  ;;  %v9257_v6 = vld [vmem:[#allocation120_spill] sm:$0xff]  ;;  %v9259_v33 = vld [vmem:[#allocation121_spill] sm:$0xff] }
  0x90   : > { %9242 = vst [vmem:[#allocation111_spill] sm:$0xff] %v5091_v60  ;;  %9244 = vst [vmem:[#allocation78_spill] sm:$0xff] %v5094_v29  ;;  %v5115_v4 = vadd.f32 %v748_v2, %v9257_v6  ;;  %v5118_v45 = vadd.f32 %v749_v38, %v9259_v33  ;;  %v9261_v17 = vld [vmem:[#allocation123_spill] sm:$0xff]  ;;  %v9263_v41 = vld [vmem:[#allocation124_spill] sm:$0xff] }
  0x91   : > { %9246 = vst [vmem:[#allocation112_spill] sm:$0xff] %v5097_v25  ;;  %9248 = vst [vmem:[#allocation79_spill] sm:$0xff] %v5100_v40  ;;  %v5121_v11 = vadd.f32 %v750_v23, %v9261_v17  ;;  %v5124_v24 = vadd.f32 %v751_v8, %v9263_v41  ;;  %v9265_v5 = vld [vmem:[#allocation125_spill] sm:$0xff]  ;;  %v9267_v18 = vld [vmem:[#allocation42_spill] sm:$0xff] }
  0x92   : > { %9250 = vst [vmem:[#allocation84_spill] sm:$0xff] %v5103_v44  ;;  %9252 = vst [vmem:[#allocation85_spill] sm:$0xff] %v5106_v32  ;;  %v5127_v57 = vadd.f32 %v752_v62, %v9265_v5  ;;  %v9268_v58 = vld [vmem:[#allocation37_spill] sm:$0xff]  ;;  %v9269_v46 = vld [vmem:[#allocation43_spill] sm:$0xff] }
  0x93   : > { %9254 = vst [vmem:[#allocation90_spill] sm:$0xff] %v5109_v56  ;;  %9256 = vst [vmem:[#allocation91_spill] sm:$0xff] %v5112_v39  ;;  %v805_v56 = vmul.f32 %v9268_v58, %v9267_v18  ;;  %v806_v19 = vmul.f32 %v9268_v58, %v9269_v46  ;;  %v9270_v2 = vld [vmem:[#allocation46_spill] sm:$0xff]  ;;  %v9271_v38 = vld [vmem:[#allocation47_spill] sm:$0xff] }
  0x94   : > { %9258 = vst [vmem:[#allocation92_spill] sm:$0xff] %v5115_v4  ;;  %9260 = vst [vmem:[#allocation96_spill] sm:$0xff] %v5118_v45  ;;  %v807_v6 = vmul.f32 %v9268_v58, %v9270_v2  ;;  %v808_v33 = vmul.f32 %v9268_v58, %v9271_v38  ;;  %v9272_v23 = vld [vmem:[#allocation48_spill] sm:$0xff]  ;;  %v9273_v8 = vld [vmem:[#allocation49_spill] sm:$0xff] }
  0x95   : > { %9262 = vst [vmem:[#allocation97_spill] sm:$0xff] %v5121_v11  ;;  %9264 = vst [vmem:[#allocation102_spill] sm:$0xff] %v5124_v24  ;;  %v809_v17 = vmul.f32 %v9268_v58, %v9272_v23  ;;  %v810_v41 = vmul.f32 %v9268_v58, %v9273_v8  ;;  %v9274_v62 = vld [vmem:[#allocation50_spill] sm:$0xff]  ;;  %v9276_v24 = vld [vmem:[#allocation52_spill] sm:$0xff]  ;;  %v5229_v54 = vadd.f32 %v805_v56, %v4959_v55 }
  0x96   : > { %9266 = vst [vmem:[#allocation103_spill] sm:$0xff] %v5127_v57  ;;  %v811_v5 = vmul.f32 %v9268_v58, %v9274_v62  ;;  %v9275_v57 = vld [vmem:[#allocation51_spill] sm:$0xff]  ;;  %v813_v46 = vmul.f32 %v9268_v58, %v9276_v24  ;;  %v9277_v11 = vld [vmem:[#allocation53_spill] sm:$0xff]  ;;  %v9278_v45 = vld [vmem:[#allocation54_spill] sm:$0xff] }
  0x97   : > { %v812_v18 = vmul.f32 %v9268_v58, %v9275_v57  ;;  %v814_v2 = vmul.f32 %v9268_v58, %v9277_v11  ;;  %v815_v38 = vmul.f32 %v9268_v58, %v9278_v45  ;;  %v9279_v4 = vld [vmem:[#allocation55_spill] sm:$0xff]  ;;  %v9280_v39 = vld [vmem:[#allocation56_spill] sm:$0xff]  ;;  %v9281_v32 = vld [vmem:[#allocation57_spill] sm:$0xff] }
  0x98   : > { %v816_v23 = vmul.f32 %v9268_v58, %v9279_v4  ;;  %v817_v8 = vmul.f32 %v9268_v58, %v9280_v39  ;;  %v818_v62 = vmul.f32 %v9268_v58, %v9281_v32  ;;  %v9282_v44 = vld [vmem:[#allocation58_spill] sm:$0xff]  ;;  %v9283_v40 = vld [vmem:[#allocation59_spill] sm:$0xff]  ;;  %v9286_v60 = vld [vmem:[#allocation64_spill] sm:$0xff] }
  0x99   : > { %v819_v57 = vmul.f32 %v9268_v58, %v9282_v44  ;;  %v820_v24 = vmul.f32 %v9268_v58, %v9283_v40  ;;  %v9284_v25 = vld [vmem:[#allocation62_spill] sm:$0xff]  ;;  %v9285_v29 = vld [vmem:[#allocation63_spill] sm:$0xff]  ;;  %v823_v4 = vmul.f32 %v9268_v58, %v9286_v60  ;;  %v9288_v35 = vld [vmem:[#allocation68_spill] sm:$0xff] }
  0x9a   : > { %v821_v11 = vmul.f32 %v9268_v58, %v9284_v25  ;;  %v822_v45 = vmul.f32 %v9268_v58, %v9285_v29  ;;  %v9287_v51 = vld [vmem:[#allocation67_spill] sm:$0xff]  ;;  %v825_v32 = vmul.f32 %v9268_v58, %v9288_v35  ;;  %v9289_v47 = vld [vmem:[#allocation72_spill] sm:$0xff]  ;;  %v9290_v42 = vld [vmem:[#allocation73_spill] sm:$0xff] }
  0x9b   : > { %v824_v39 = vmul.f32 %v9268_v58, %v9287_v51  ;;  %v826_v44 = vmul.f32 %v9268_v58, %v9289_v47  ;;  %v827_v40 = vmul.f32 %v9268_v58, %v9290_v42  ;;  %v9291_v34 = vld [vmem:[#allocation76_spill] sm:$0xff]  ;;  %v9292_v1 = vld [vmem:[#allocation77_spill] sm:$0xff]  ;;  %v9294_v59 = vld [vmem:[#allocation82_spill] sm:$0xff] }
  0x9c   : > { %v828_v25 = vmul.f32 %v9268_v58, %v9291_v34  ;;  %v829_v29 = vmul.f32 %v9268_v58, %v9292_v1  ;;  %v9293_v0 = vld [vmem:[#allocation81_spill] sm:$0xff]  ;;  %v831_v51 = vmul.f32 %v9268_v58, %v9294_v59  ;;  %v9295_v36 = vld [vmem:[#allocation83_spill] sm:$0xff]  ;;  %v9296_v49 = vld [vmem:[#allocation88_spill] sm:$0xff] }
  0x9d   : > { %v830_v60 = vmul.f32 %v9268_v58, %v9293_v0  ;;  %v832_v35 = vmul.f32 %v9268_v58, %v9295_v36  ;;  %v833_v47 = vmul.f32 %v9268_v58, %v9296_v49  ;;  %v9297_v43 = vld [vmem:[#allocation89_spill] sm:$0xff]  ;;  %v9298_v37 = vld [vmem:[#allocation94_spill] sm:$0xff]  ;;  %v9299_v12 = vld [vmem:[#allocation95_spill] sm:$0xff] }
  0x9e   : > { %v834_v42 = vmul.f32 %v9268_v58, %v9297_v43  ;;  %v835_v34 = vmul.f32 %v9268_v58, %v9298_v37  ;;  %v836_v1 = vmul.f32 %v9268_v58, %v9299_v12  ;;  %v595_v7 = vld [vmem:[#allocation2 + $0x220] sm:$0xff]  ;;  %v5193_v0 = vld [vmem:[#allocation2 + $0x228] sm:$0xff]  ;;  %v5195_v10 = vld [vmem:[#allocation2 + $0x230] sm:$0xff] }
  0x9f   : > { %9300 = vst [vmem:[#allocation109_spill] sm:$0xff] %v5193_v0  ;;  %9301 = vst [vmem:[#allocation110_spill] sm:$0xff] %v5195_v10  ;;  %v9302_v59 = vld [vmem:[#allocation100_spill] sm:$0xff]  ;;  %v9303_v26 = vld [vmem:[#allocation101_spill] sm:$0xff] }
  0xa0   : > { %v837_v36 = vmul.f32 %v9268_v58, %v9302_v59  ;;  %v838_v49 = vmul.f32 %v9268_v58, %v9303_v26  ;;  %v9304_v13 = vld [vmem:[#allocation106_spill] sm:$0xff]  ;;  %v9305_v21 = vld [vmem:[#allocation107_spill] sm:$0xff]  ;;  %v9306_v14 = vld [vmem:[#allocation108_spill] sm:$0xff]  ;;  %v845_v26 = vmul.f32 %v9268_v58, %v4889_v30  ;;  %v852_v30 = vmul.f32 %v9268_v58, %v5195_v10 }
  0xa1   : > { %v839_v43 = vmul.f32 %v9268_v58, %v9304_v13  ;;  %v840_v37 = vmul.f32 %v9268_v58, %v9305_v21  ;;  %v841_v12 = vmul.f32 %v9268_v58, %v9306_v14  ;;  %v9307_v3 = vld [vmem:[#allocation113_spill] sm:$0xff]  ;;  %v9308_v9 = vld [vmem:[#allocation114_spill] sm:$0xff]  ;;  %v9312_v31 = vld [vmem:[#allocation127_spill] sm:$0xff] }
  0xa2   : > { %v842_v22 = vmul.f32 %v9268_v58, %v9307_v3  ;;  %v843_v28 = vmul.f32 %v9268_v58, %v9308_v9  ;;  %v9309_v27 = vld [vmem:[#allocation118_spill] sm:$0xff]  ;;  %v848_v14 = vmul.f32 %v9268_v58, %v9312_v31  ;;  %v849_v3 = vmul.f32 %v9268_v58, %v4939_v52  ;;  %v9313_v55 = vld [vmem:[#allocation129_spill] sm:$0xff]  ;;  %v9400_v52 = vld [vmem:[#allocation52_spill] sm:$0xff] }
  0xa3   : > { %v844_v59 = vmul.f32 %v9268_v58, %v9309_v27  ;;  %v9310_v16 = vld [vmem:[#allocation122_spill] sm:$0xff]  ;;  %v850_v9 = vmul.f32 %v9268_v58, %v595_v7  ;;  %v851_v27 = vmul.f32 %v9268_v58, %v5193_v0  ;;  %v5238_v31 = vadd.f32 %v808_v33, %v4971_v50  ;;  %v9316_v50 = vld [vmem:[#allocation132_spill] sm:$0xff] }
  0xa4   : > { %v846_v13 = vmul.f32 %v9268_v58, %v9310_v16  ;;  %v9311_v15 = vld [vmem:[#allocation126_spill] sm:$0xff]  ;;  %v5232_v16 = vadd.f32 %v806_v19, %v4963_v61  ;;  %v5241_v7 = vadd.f32 %v809_v17, %v4975_v63  ;;  %v5244_v0 = vadd.f32 %v810_v41, %v4979_v48  ;;  %v9318_v63 = vld [vmem:[#allocation133_spill] sm:$0xff] }
  0xa5   : > { %v847_v21 = vmul.f32 %v9268_v58, %v9311_v15  ;;  %v5235_v15 = vadd.f32 %v807_v6, %v4967_v20  ;;  %v5247_v58 = vadd.f32 %v811_v5, %v4983_v53  ;;  %v5250_v56 = vadd.f32 %v812_v18, %v9313_v55  ;;  %v9314_v61 = vld [vmem:[#allocation130_spill] sm:$0xff]  ;;  %v9315_v20 = vld [vmem:[#allocation131_spill] sm:$0xff]  ;;  %v9324_v18 = vld [vmem:[#allocation136_spill] sm:$0xff] }
  0xa6   : > { %v5253_v19 = vadd.f32 %v813_v46, %v9314_v61  ;;  %v5256_v6 = vadd.f32 %v814_v2, %v9315_v20  ;;  %v5259_v33 = vadd.f32 %v815_v38, %v9316_v50  ;;  %v5262_v17 = vadd.f32 %v816_v23, %v9318_v63  ;;  %v9320_v48 = vld [vmem:[#allocation134_spill] sm:$0xff]  ;;  %v9322_v53 = vld [vmem:[#allocation135_spill] sm:$0xff]  ;;  %v9326_v46 = vld [vmem:[#allocation137_spill] sm:$0xff] }
  0xa7   : > { %v5265_v41 = vadd.f32 %v817_v8, %v9320_v48  ;;  %v5268_v5 = vadd.f32 %v818_v62, %v9322_v53  ;;  %v5271_v55 = vadd.f32 %v819_v57, %v9324_v18  ;;  %v5274_v61 = vadd.f32 %v820_v24, %v9326_v46  ;;  %v9328_v2 = vld [vmem:[#allocation138_spill] sm:$0xff]  ;;  %v9330_v38 = vld [vmem:[#allocation139_spill] sm:$0xff]  ;;  %v9332_v23 = vld [vmem:[#allocation60_spill] sm:$0xff] }
  0xa8   : > { %9317 = vst [vmem:[#allocation115_spill] sm:$0xff] %v5259_v33  ;;  %9319 = vst [vmem:[#allocation116_spill] sm:$0xff] %v5262_v17  ;;  %v5277_v20 = vadd.f32 %v821_v11, %v9328_v2  ;;  %v5280_v50 = vadd.f32 %v822_v45, %v9330_v38  ;;  %v5283_v63 = vadd.f32 %v823_v4, %v9332_v23  ;;  %v9334_v8 = vld [vmem:[#allocation80_spill] sm:$0xff]  ;;  %v9336_v62 = vld [vmem:[#allocation61_spill] sm:$0xff] }
  0xa9   : > { %9321 = vst [vmem:[#allocation117_spill] sm:$0xff] %v5265_v41  ;;  %9323 = vst [vmem:[#allocation120_spill] sm:$0xff] %v5268_v5  ;;  %v5286_v48 = vadd.f32 %v824_v39, %v9334_v8  ;;  %v5289_v53 = vadd.f32 %v825_v32, %v9336_v62  ;;  %v9338_v57 = vld [vmem:[#allocation86_spill] sm:$0xff]  ;;  %v9340_v24 = vld [vmem:[#allocation65_spill] sm:$0xff] }
  0xaa   : > { %9325 = vst [vmem:[#allocation121_spill] sm:$0xff] %v5271_v55  ;;  %9327 = vst [vmem:[#allocation123_spill] sm:$0xff] %v5274_v61  ;;  %v5292_v18 = vadd.f32 %v826_v44, %v9338_v57  ;;  %v5295_v46 = vadd.f32 %v827_v40, %v9340_v24  ;;  %v9342_v11 = vld [vmem:[#allocation87_spill] sm:$0xff]  ;;  %v9344_v45 = vld [vmem:[#allocation66_spill] sm:$0xff] }
  0xab   : > { %9329 = vst [vmem:[#allocation124_spill] sm:$0xff] %v5277_v20  ;;  %9331 = vst [vmem:[#allocation125_spill] sm:$0xff] %v5280_v50  ;;  %v5298_v2 = vadd.f32 %v828_v25, %v9342_v11  ;;  %v5301_v38 = vadd.f32 %v829_v29, %v9344_v45  ;;  %v9346_v4 = vld [vmem:[#allocation93_spill] sm:$0xff]  ;;  %v9350_v32 = vld [vmem:[#allocation98_spill] sm:$0xff] }
  0xac   : > { %9333 = vst [vmem:[#allocation42_spill] sm:$0xff] %v5283_v63  ;;  %9335 = vst [vmem:[#allocation37_spill] sm:$0xff] %v5286_v48  ;;  %v5304_v23 = vadd.f32 %v830_v60, %v9346_v4  ;;  %v9348_v39 = vld [vmem:[#allocation69_spill] sm:$0xff]  ;;  %v5310_v62 = vadd.f32 %v832_v35, %v9350_v32  ;;  %v9352_v44 = vld [vmem:[#allocation70_spill] sm:$0xff] }
  0xad   : > { %9337 = vst [vmem:[#allocation47_spill] sm:$0xff] %v5289_v53  ;;  %9339 = vst [vmem:[#allocation50_spill] sm:$0xff] %v5292_v18  ;;  %v5307_v8 = vadd.f32 %v831_v51, %v9348_v39  ;;  %v5313_v57 = vadd.f32 %v833_v47, %v9352_v44  ;;  %v9354_v40 = vld [vmem:[#allocation99_spill] sm:$0xff]  ;;  %v9358_v29 = vld [vmem:[#allocation104_spill] sm:$0xff] }
  0xae   : > { %9341 = vst [vmem:[#allocation53_spill] sm:$0xff] %v5295_v46  ;;  %9343 = vst [vmem:[#allocation56_spill] sm:$0xff] %v5298_v2  ;;  %v5316_v24 = vadd.f32 %v834_v42, %v9354_v40  ;;  %v9356_v25 = vld [vmem:[#allocation71_spill] sm:$0xff]  ;;  %v5322_v45 = vadd.f32 %v836_v1, %v9358_v29  ;;  %v9360_v60 = vld [vmem:[#allocation74_spill] sm:$0xff] }
  0xaf   : > { %9345 = vst [vmem:[#allocation59_spill] sm:$0xff] %v5301_v38  ;;  %9347 = vst [vmem:[#allocation64_spill] sm:$0xff] %v5304_v23  ;;  %v5319_v11 = vadd.f32 %v835_v34, %v9356_v25  ;;  %v5325_v4 = vadd.f32 %v837_v36, %v9360_v60  ;;  %v9362_v51 = vld [vmem:[#allocation105_spill] sm:$0xff]  ;;  %v9364_v35 = vld [vmem:[#allocation75_spill] sm:$0xff] }
  0xb0   : > { %9349 = vst [vmem:[#allocation72_spill] sm:$0xff] %v5307_v8  ;;  %9351 = vst [vmem:[#allocation77_spill] sm:$0xff] %v5310_v62  ;;  %v5328_v39 = vadd.f32 %v838_v49, %v9362_v51  ;;  %v5331_v32 = vadd.f32 %v839_v43, %v9364_v35  ;;  %v9366_v47 = vld [vmem:[#allocation111_spill] sm:$0xff]  ;;  %v9368_v42 = vld [vmem:[#allocation78_spill] sm:$0xff] }
  0xb1   : > { %9353 = vst [vmem:[#allocation83_spill] sm:$0xff] %v5313_v57  ;;  %9355 = vst [vmem:[#allocation94_spill] sm:$0xff] %v5316_v24  ;;  %v5334_v44 = vadd.f32 %v840_v37, %v9366_v47  ;;  %v5337_v40 = vadd.f32 %v841_v12, %v9368_v42  ;;  %v9370_v34 = vld [vmem:[#allocation112_spill] sm:$0xff]  ;;  %v9372_v1 = vld [vmem:[#allocation79_spill] sm:$0xff] }
  0xb2   : > { %9357 = vst [vmem:[#allocation101_spill] sm:$0xff] %v5319_v11  ;;  %9359 = vst [vmem:[#allocation108_spill] sm:$0xff] %v5322_v45  ;;  %v5340_v25 = vadd.f32 %v842_v22, %v9370_v34  ;;  %v5343_v29 = vadd.f32 %v843_v28, %v9372_v1  ;;  %v9374_v36 = vld [vmem:[#allocation84_spill] sm:$0xff]  ;;  %v9376_v49 = vld [vmem:[#allocation85_spill] sm:$0xff] }
  0xb3   : > { %9361 = vst [vmem:[#allocation118_spill] sm:$0xff] %v5325_v4  ;;  %9363 = vst [vmem:[#allocation126_spill] sm:$0xff] %v5328_v39  ;;  %v5346_v60 = vadd.f32 %v844_v59, %v9374_v36  ;;  %v5349_v51 = vadd.f32 %v845_v26, %v9376_v49  ;;  %v9378_v43 = vld [vmem:[#allocation90_spill] sm:$0xff]  ;;  %v9380_v37 = vld [vmem:[#allocation91_spill] sm:$0xff] }
  0xb4   : > { %9365 = vst [vmem:[#allocation129_spill] sm:$0xff] %v5331_v32  ;;  %9367 = vst [vmem:[#allocation130_spill] sm:$0xff] %v5334_v44  ;;  %v5352_v35 = vadd.f32 %v846_v13, %v9378_v43  ;;  %v5355_v47 = vadd.f32 %v847_v21, %v9380_v37  ;;  %v9382_v12 = vld [vmem:[#allocation92_spill] sm:$0xff]  ;;  %v9386_v28 = vld [vmem:[#allocation97_spill] sm:$0xff] }
  0xb5   : > { %9369 = vst [vmem:[#allocation131_spill] sm:$0xff] %v5337_v40  ;;  %9371 = vst [vmem:[#allocation132_spill] sm:$0xff] %v5340_v25  ;;  %v5358_v42 = vadd.f32 %v848_v14, %v9382_v12  ;;  %v9384_v22 = vld [vmem:[#allocation96_spill] sm:$0xff]  ;;  %v5364_v1 = vadd.f32 %v850_v9, %v9386_v28  ;;  %v9388_v59 = vld [vmem:[#allocation102_spill] sm:$0xff] }
  0xb6   : > { %9373 = vst [vmem:[#allocation133_spill] sm:$0xff] %v5343_v29  ;;  %9375 = vst [vmem:[#allocation134_spill] sm:$0xff] %v5346_v60  ;;  %v5361_v34 = vadd.f32 %v849_v3, %v9384_v22  ;;  %v5367_v36 = vadd.f32 %v851_v27, %v9388_v59  ;;  %v9390_v26 = vld [vmem:[#allocation103_spill] sm:$0xff]  ;;  %v9392_v13 = vld [vmem:[#allocation38_spill] sm:$0xff] }
  0xb7   : > { %9377 = vst [vmem:[#allocation135_spill] sm:$0xff] %v5349_v51  ;;  %9379 = vst [vmem:[#allocation136_spill] sm:$0xff] %v5352_v35  ;;  %v5370_v49 = vadd.f32 %v852_v30, %v9390_v26  ;;  %v9393_v43 = vld [vmem:[#allocation36_spill] sm:$0xff]  ;;  %v9394_v37 = vld [vmem:[#allocation39_spill] sm:$0xff] }
  0xb8   : > { %9381 = vst [vmem:[#allocation137_spill] sm:$0xff] %v5355_v47  ;;  %9383 = vst [vmem:[#allocation138_spill] sm:$0xff] %v5358_v42  ;;  %v5374_v21 = vmul.f32 %v9393_v43, %v9392_v13  ;;  %v5378_v14 = vmul.f32 %v9393_v43, %v9394_v37  ;;  %v9395_v12 = vld [vmem:[#allocation43_spill] sm:$0xff]  ;;  %v9396_v9 = vld [vmem:[#allocation46_spill] sm:$0xff] }
  0xb9   : > { %9385 = vst [vmem:[#allocation139_spill] sm:$0xff] %v5361_v34  ;;  %9387 = vst [vmem:[#allocation60_spill] sm:$0xff] %v5364_v1  ;;  %v5382_v3 = vmul.f32 %v9393_v43, %v9395_v12  ;;  %v5386_v22 = vmul.f32 %v9393_v43, %v9396_v9  ;;  %v9397_v27 = vld [vmem:[#allocation48_spill] sm:$0xff]  ;;  %v9398_v28 = vld [vmem:[#allocation49_spill] sm:$0xff]  ;;  %v5402_v12 = vmul.f32 %v9393_v43, %v9400_v52 }
  0xba   : > { %9389 = vst [vmem:[#allocation80_spill] sm:$0xff] %v5367_v36  ;;  %9391 = vst [vmem:[#allocation61_spill] sm:$0xff] %v5370_v49  ;;  %v5390_v30 = vmul.f32 %v9393_v43, %v9397_v27  ;;  %v5394_v59 = vmul.f32 %v9393_v43, %v9398_v28  ;;  %v9399_v26 = vld [vmem:[#allocation51_spill] sm:$0xff]  ;;  %v9401_v37 = vld [vmem:[#allocation54_spill] sm:$0xff]  ;;  %v973_v11 = vrot.slane %v5374_v21, 1 }
  0xbb   : > { %v5398_v10 = vmul.f32 %v9393_v43, %v9399_v26  ;;  %v5406_v9 = vmul.f32 %v9393_v43, %v9401_v37  ;;  %v9402_v13 = vld [vmem:[#allocation55_spill] sm:$0xff]  ;;  %v9403_v49 = vld [vmem:[#allocation57_spill] sm:$0xff]  ;;  %v9404_v36 = vld [vmem:[#allocation58_spill] sm:$0xff]  ;;  %v976_v23 = vrot.slane %v5382_v3, 1 }
  0xbc   : > { %v5410_v27 = vmul.f32 %v9393_v43, %v9402_v13  ;;  %v5414_v28 = vmul.f32 %v9393_v43, %v9403_v49  ;;  %v5418_v26 = vmul.f32 %v9393_v43, %v9404_v36  ;;  %v9405_v1 = vld [vmem:[#allocation62_spill] sm:$0xff]  ;;  %v9406_v34 = vld [vmem:[#allocation63_spill] sm:$0xff]  ;;  %v9408_v47 = vld [vmem:[#allocation68_spill] sm:$0xff]  ;;  %v980_v2 = vrot.slane %v5394_v59, 1 }
  0xbd   : > { %v5422_v52 = vmul.f32 %v9393_v43, %v9405_v1  ;;  %v5426_v37 = vmul.f32 %v9393_v43, %v9406_v34  ;;  %v9407_v42 = vld [vmem:[#allocation67_spill] sm:$0xff]  ;;  %v5434_v49 = vmul.f32 %v9393_v43, %v9408_v47  ;;  %v9409_v35 = vld [vmem:[#allocation73_spill] sm:$0xff]  ;;  %v9410_v51 = vld [vmem:[#allocation76_spill] sm:$0xff]  ;;  %v985_v18 = vrot.slane %v5406_v9, 1 }
  0xbe   : > { %v5430_v13 = vmul.f32 %v9393_v43, %v9407_v42  ;;  %v5438_v36 = vmul.f32 %v9393_v43, %v9409_v35  ;;  %v5442_v1 = vmul.f32 %v9393_v43, %v9410_v51  ;;  %v9411_v60 = vld [vmem:[#allocation81_spill] sm:$0xff]  ;;  %v9412_v29 = vld [vmem:[#allocation82_spill] sm:$0xff]  ;;  %v9413_v25 = vld [vmem:[#allocation88_spill] sm:$0xff]  ;;  %v988_v3 = vrot.slane %v5414_v28, 1 }
  0xbf   : > { %v5446_v34 = vmul.f32 %v9393_v43, %v9411_v60  ;;  %v5450_v42 = vmul.f32 %v9393_v43, %v9412_v29  ;;  %v5454_v47 = vmul.f32 %v9393_v43, %v9413_v25  ;;  %v9414_v40 = vld [vmem:[#allocation89_spill] sm:$0xff]  ;;  %v9415_v44 = vld [vmem:[#allocation44_spill] sm:$0xff]  ;;  %v9417_v4 = vld [vmem:[#allocation95_spill] sm:$0xff]  ;;  %v974_v25 = vrot.slane %v5378_v14, 1 }
  0xc0   : > { %v5458_v35 = vmul.f32 %v9393_v43, %v9414_v40  ;;  %v970_v32 = vrot.slane %v9415_v44, 1  ;;  %v9416_v51 = vld [vmem:[#allocation45_spill] sm:$0xff]  ;;  %v5464_v60 = vmul.f32 %v9393_v43, %v9417_v4  ;;  %v9418_v45 = vld [vmem:[#allocation100_spill] sm:$0xff]  ;;  %v9419_v24 = vld [vmem:[#allocation106_spill] sm:$0xff]  ;;  %v994_v59 = vrot.slane %v5430_v13, 1 }
  0xc1   : > { %v971_v39 = vrot.slane %v9416_v51, 1  ;;  %v5468_v29 = vmul.f32 %v9393_v43, %v9418_v45  ;;  %v5474_v40 = vmul.f32 %v9393_v43, %v9419_v24  ;;  %v9420_v57 = vld [vmem:[#allocation107_spill] sm:$0xff]  ;;  %v9421_v51 = vld [vmem:[#allocation113_spill] sm:$0xff]  ;;  %v9422_v62 = vld [vmem:[#allocation114_spill] sm:$0xff]  ;;  %v975_v46 = vsel %vm969_vm3, %v973_v11, %v974_v25 }
  0xc2   : > { %v5478_v44 = vmul.f32 %v9393_v43, %v9420_v57  ;;  %v5482_v4 = vmul.f32 %v9393_v43, %v9421_v51  ;;  %v5486_v45 = vmul.f32 %v9393_v43, %v9422_v62  ;;  %v9423_v8 = vld [vmem:[#allocation119_spill] sm:$0xff]  ;;  %v9424_v14 = vld [vmem:[#allocation122_spill] sm:$0xff]  ;;  %v977_v57 = vrot.slane %v5386_v22, 1 }
  0xc3   : > { %v5490_v21 = vmul.f32 %v9393_v43, %v9423_v8  ;;  %v5494_v24 = vmul.f32 %v9393_v43, %v9424_v14  ;;  %v972_v38 = vsel %vm969_vm3, %v970_v32, %v971_v39  ;;  %v979_v51 = vrot.slane %v5390_v30, 1 }
  0xc4   : > { %v982_v62 = vrot.slane %v5398_v10, 1  ;;  %v983_v8 = vrot.slane %v5402_v12, 1  ;;  %v986_v43 = vrot.slane %v5410_v27, 1  ;;  %v989_v22 = vrot.slane %v5418_v26, 1 }
  0xc5   : > { %v991_v14 = vrot.slane %v5422_v52, 1  ;;  %v992_v30 = vrot.slane %v5426_v37, 1  ;;  %v995_v10 = vrot.slane %v5434_v49, 1  ;;  %v997_v53 = vrot.slane %v5438_v36, 1 }
  0xc6   : > { %v998_v12 = vrot.slane %v5442_v1, 1  ;;  %v1000_v9 = vrot.slane %v5446_v34, 1  ;;  %v1001_v27 = vrot.slane %v5450_v42, 1  ;;  %v1003_v28 = vrot.slane %v5454_v47, 1 }
  0xc7   : > { %v1004_v26 = vrot.slane %v5458_v35, 1  ;;  %v1006_v52 = vrot.slane %v5464_v60, 1  ;;  %v1007_v37 = vrot.slane %v5468_v29, 1  ;;  %v1009_v13 = vrot.slane %v5474_v40, 1 }
  0xc8   : > { %v1010_v49 = vrot.slane %v5478_v44, 1  ;;  %v978_v36 = vsel %vm969_vm3, %v976_v23, %v977_v57  ;;  %v981_v1 = vsel %vm969_vm3, %v979_v51, %v980_v2  ;;  %v1012_v34 = vrot.slane %v5482_v4, 1 }
  0xc9   : > { %v1013_v42 = vrot.slane %v5486_v45, 1  ;;  %v984_v47 = vsel %vm969_vm3, %v982_v62, %v983_v8  ;;  %v987_v35 = vsel %vm969_vm3, %v985_v18, %v986_v43  ;;  %v1015_v60 = vrot.slane %v5490_v21, 1 }
  0xca   : > { %v1016_v29 = vrot.slane %v5494_v24, 1  ;;  %v990_v40 = vsel %vm969_vm3, %v988_v3, %v989_v22  ;;  %v993_v44 = vsel %vm969_vm3, %v991_v14, %v992_v30  ;;  %v996_v48 = vsel %vm969_vm3, %v994_v59, %v995_v10 }
  0xcb   : > { %v999_v63 = vsel %vm969_vm3, %v997_v53, %v998_v12  ;;  %v1002_v4 = vsel %vm969_vm3, %v1000_v9, %v1001_v27  ;;  %v1005_v45 = vsel %vm969_vm3, %v1003_v28, %v1004_v26  ;;  %v1008_v50 = vsel %vm969_vm3, %v1006_v52, %v1007_v37 }
  0xcc   : > { %v1011_v20 = vsel %vm969_vm3, %v1009_v13, %v1010_v49  ;;  %v1014_v21 = vsel %vm969_vm3, %v1012_v34, %v1013_v42  ;;  %v5540_v24 = vadd.f32 %v970_v32, %v5229_v54  ;;  %v5543_v61 = vadd.f32 %v972_v38, %v5232_v16 }
  0xcd   : > { %v5546_v55 = vadd.f32 %v971_v39, %v5235_v15  ;;  %v1017_v5 = vsel %vm969_vm3, %v1015_v60, %v1016_v29  ;;  %v5550_v41 = vadd.f32 %v973_v11, %v5238_v31  ;;  %v5553_v17 = vadd.f32 %v975_v46, %v5241_v7  ;;  %v9425_v31 = vld [vmem:[#allocation115_spill] sm:$0xff]  ;;  %v9427_v7 = vld [vmem:[#allocation116_spill] sm:$0xff] }
  0xce   : > { %v5556_v33 = vadd.f32 %v974_v25, %v5244_v0  ;;  %v5559_v54 = vadd.f32 %v976_v23, %v5247_v58  ;;  %v5562_v16 = vadd.f32 %v978_v36, %v5250_v56  ;;  %v5565_v15 = vadd.f32 %v977_v57, %v5253_v19  ;;  %v9429_v0 = vld [vmem:[#allocation117_spill] sm:$0xff]  ;;  %v9431_v58 = vld [vmem:[#allocation120_spill] sm:$0xff]  ;;  %v9435_v19 = vld [vmem:[#allocation123_spill] sm:$0xff] }
  0xcf   : > { %v5568_v38 = vadd.f32 %v979_v51, %v5256_v6  ;;  %v5571_v11 = vadd.f32 %v981_v1, %v9425_v31  ;;  %v5574_v46 = vadd.f32 %v980_v2, %v9427_v7  ;;  %v5577_v39 = vadd.f32 %v982_v62, %v9429_v0  ;;  %v9433_v56 = vld [vmem:[#allocation121_spill] sm:$0xff]  ;;  %v9437_v6 = vld [vmem:[#allocation124_spill] sm:$0xff]  ;;  %v9441_v2 = vld [vmem:[#allocation42_spill] sm:$0xff] }
  0xd0   : > { %v5580_v23 = vadd.f32 %v984_v47, %v9431_v58  ;;  %v5583_v32 = vadd.f32 %v983_v8, %v9433_v56  ;;  %v5586_v57 = vadd.f32 %v985_v18, %v9435_v19  ;;  %v5589_v25 = vadd.f32 %v987_v35, %v9437_v6  ;;  %v9439_v51 = vld [vmem:[#allocation125_spill] sm:$0xff]  ;;  %v9445_v47 = vld [vmem:[#allocation47_spill] sm:$0xff]  ;;  %v9447_v8 = vld [vmem:[#allocation50_spill] sm:$0xff] }
  0xd1   : > { %9426 = vst [vmem:[#allocation86_spill] sm:$0xff] %v5571_v11  ;;  %9428 = vst [vmem:[#allocation65_spill] sm:$0xff] %v5574_v46  ;;  %v5592_v36 = vadd.f32 %v986_v43, %v9439_v51  ;;  %v5595_v1 = vadd.f32 %v988_v3, %v9441_v2  ;;  %v9443_v62 = vld [vmem:[#allocation37_spill] sm:$0xff]  ;;  %v5601_v7 = vadd.f32 %v989_v22, %v9445_v47  ;;  %v9451_v35 = vld [vmem:[#allocation56_spill] sm:$0xff] }
  0xd2   : > { %9430 = vst [vmem:[#allocation87_spill] sm:$0xff] %v5577_v39  ;;  %9432 = vst [vmem:[#allocation66_spill] sm:$0xff] %v5580_v23  ;;  %v5598_v31 = vadd.f32 %v990_v40, %v9443_v62  ;;  %v5604_v0 = vadd.f32 %v991_v14, %v9447_v8  ;;  %v9449_v18 = vld [vmem:[#allocation53_spill] sm:$0xff]  ;;  %v5610_v56 = vadd.f32 %v992_v30, %v9451_v35  ;;  %v9453_v43 = vld [vmem:[#allocation59_spill] sm:$0xff] }
  0xd3   : > { %9434 = vst [vmem:[#allocation93_spill] sm:$0xff] %v5583_v32  ;;  %9436 = vst [vmem:[#allocation69_spill] sm:$0xff] %v5586_v57  ;;  %v5607_v58 = vadd.f32 %v993_v44, %v9449_v18  ;;  %v5613_v19 = vadd.f32 %v994_v59, %v9453_v43  ;;  %v9455_v3 = vld [vmem:[#allocation64_spill] sm:$0xff]  ;;  %v9459_v22 = vld [vmem:[#allocation77_spill] sm:$0xff] }
  0xd4   : > { %9438 = vst [vmem:[#allocation98_spill] sm:$0xff] %v5589_v25  ;;  %9440 = vst [vmem:[#allocation70_spill] sm:$0xff] %v5592_v36  ;;  %v5616_v6 = vadd.f32 %v996_v48, %v9455_v3  ;;  %v9457_v40 = vld [vmem:[#allocation72_spill] sm:$0xff]  ;;  %v5622_v2 = vadd.f32 %v997_v53, %v9459_v22  ;;  %v9461_v14 = vld [vmem:[#allocation83_spill] sm:$0xff] }
  0xd5   : > { %9442 = vst [vmem:[#allocation99_spill] sm:$0xff] %v5595_v1  ;;  %9444 = vst [vmem:[#allocation71_spill] sm:$0xff] %v5598_v31  ;;  %v5619_v51 = vadd.f32 %v995_v10, %v9457_v40  ;;  %v5625_v62 = vadd.f32 %v999_v63, %v9461_v14  ;;  %v9463_v44 = vld [vmem:[#allocation94_spill] sm:$0xff]  ;;  %v9465_v30 = vld [vmem:[#allocation101_spill] sm:$0xff] }
  0xd6   : > { %9446 = vst [vmem:[#allocation104_spill] sm:$0xff] %v5601_v7  ;;  %9448 = vst [vmem:[#allocation74_spill] sm:$0xff] %v5604_v0  ;;  %v5628_v47 = vadd.f32 %v998_v12, %v9463_v44  ;;  %v5631_v8 = vadd.f32 %v1000_v9, %v9465_v30  ;;  %v9467_v59 = vld [vmem:[#allocation108_spill] sm:$0xff]  ;;  %v9469_v48 = vld [vmem:[#allocation118_spill] sm:$0xff] }
  0xd7   : > { %9450 = vst [vmem:[#allocation105_spill] sm:$0xff] %v5607_v58  ;;  %9452 = vst [vmem:[#allocation75_spill] sm:$0xff] %v5610_v56  ;;  %v5634_v18 = vadd.f32 %v1002_v4, %v9467_v59  ;;  %v5637_v35 = vadd.f32 %v1001_v27, %v9469_v48  ;;  %v9471_v10 = vld [vmem:[#allocation126_spill] sm:$0xff]  ;;  %v9473_v53 = vld [vmem:[#allocation129_spill] sm:$0xff] }
  0xd8   : > { %9454 = vst [vmem:[#allocation111_spill] sm:$0xff] %v5613_v19  ;;  %9456 = vst [vmem:[#allocation78_spill] sm:$0xff] %v5616_v6  ;;  %v5640_v43 = vadd.f32 %v1003_v28, %v9471_v10  ;;  %v5643_v3 = vadd.f32 %v1005_v45, %v9473_v53  ;;  %v9475_v63 = vld [vmem:[#allocation130_spill] sm:$0xff]  ;;  %v9477_v12 = vld [vmem:[#allocation131_spill] sm:$0xff] }
  0xd9   : > { %9458 = vst [vmem:[#allocation112_spill] sm:$0xff] %v5619_v51  ;;  %9460 = vst [vmem:[#allocation79_spill] sm:$0xff] %v5622_v2  ;;  %v5646_v40 = vadd.f32 %v1004_v26, %v9475_v63  ;;  %v5649_v22 = vadd.f32 %v1006_v52, %v9477_v12  ;;  %v9479_v9 = vld [vmem:[#allocation132_spill] sm:$0xff]  ;;  %v9481_v4 = vld [vmem:[#allocation133_spill] sm:$0xff] }
  0xda   : > { %9462 = vst [vmem:[#allocation84_spill] sm:$0xff] %v5625_v62  ;;  %9464 = vst [vmem:[#allocation85_spill] sm:$0xff] %v5628_v47  ;;  %v5652_v14 = vadd.f32 %v1008_v50, %v9479_v9  ;;  %v5655_v44 = vadd.f32 %v1007_v37, %v9481_v4  ;;  %v9483_v27 = vld [vmem:[#allocation134_spill] sm:$0xff]  ;;  %v9485_v28 = vld [vmem:[#allocation135_spill] sm:$0xff] }
  0xdb   : > { %9466 = vst [vmem:[#allocation90_spill] sm:$0xff] %v5631_v8  ;;  %9468 = vst [vmem:[#allocation91_spill] sm:$0xff] %v5634_v18  ;;  %v5658_v30 = vadd.f32 %v1009_v13, %v9483_v27  ;;  %v5661_v59 = vadd.f32 %v1011_v20, %v9485_v28  ;;  %v9487_v45 = vld [vmem:[#allocation136_spill] sm:$0xff]  ;;  %v9489_v26 = vld [vmem:[#allocation137_spill] sm:$0xff] }
  0xdc   : > { %9470 = vst [vmem:[#allocation92_spill] sm:$0xff] %v5637_v35  ;;  %9472 = vst [vmem:[#allocation96_spill] sm:$0xff] %v5640_v43  ;;  %v5664_v48 = vadd.f32 %v1010_v49, %v9487_v45  ;;  %v5667_v10 = vadd.f32 %v1012_v34, %v9489_v26  ;;  %v9491_v52 = vld [vmem:[#allocation138_spill] sm:$0xff]  ;;  %v9493_v50 = vld [vmem:[#allocation139_spill] sm:$0xff] }
  0xdd   : > { %9474 = vst [vmem:[#allocation97_spill] sm:$0xff] %v5643_v3  ;;  %9476 = vst [vmem:[#allocation102_spill] sm:$0xff] %v5646_v40  ;;  %v5670_v53 = vadd.f32 %v1014_v21, %v9491_v52  ;;  %v5673_v63 = vadd.f32 %v1013_v42, %v9493_v50  ;;  %v9495_v37 = vld [vmem:[#allocation60_spill] sm:$0xff]  ;;  %v9499_v20 = vld [vmem:[#allocation61_spill] sm:$0xff] }
  0xde   : > { %9478 = vst [vmem:[#allocation103_spill] sm:$0xff] %v5649_v22  ;;  %9480 = vst [vmem:[#allocation36_spill] sm:$0xff] %v5652_v14  ;;  %v5676_v12 = vadd.f32 %v1015_v60, %v9495_v37  ;;  %v9497_v13 = vld [vmem:[#allocation80_spill] sm:$0xff]  ;;  %v5682_v4 = vadd.f32 %v1016_v29, %v9499_v20  ;;  %v9501_v49 = vld [vmem:[#allocation38_spill] sm:$0xff] }
  0xdf   : > { %9482 = vst [vmem:[#allocation44_spill] sm:$0xff] %v5655_v44  ;;  %9484 = vst [vmem:[#allocation45_spill] sm:$0xff] %v5658_v30  ;;  %v5679_v9 = vadd.f32 %v1017_v5, %v9497_v13  ;;  %v9502_v27 = vld [vmem:[#allocation40_spill] sm:$0xff]  ;;  %v9503_v34 = vld [vmem:[#allocation39_spill] sm:$0xff] }
  0xe0   : > { %9486 = vst [vmem:[#allocation115_spill] sm:$0xff] %v5661_v59  ;;  %9488 = vst [vmem:[#allocation116_spill] sm:$0xff] %v5664_v48  ;;  %v5686_v28 = vmul.f32 %v9502_v27, %v9501_v49  ;;  %v5690_v21 = vmul.f32 %v9502_v27, %v9503_v34  ;;  %v9504_v45 = vld [vmem:[#allocation43_spill] sm:$0xff]  ;;  %v9505_v60 = vld [vmem:[#allocation46_spill] sm:$0xff] }
  0xe1   : > { %9490 = vst [vmem:[#allocation117_spill] sm:$0xff] %v5667_v10  ;;  %9492 = vst [vmem:[#allocation120_spill] sm:$0xff] %v5670_v53  ;;  %v5694_v42 = vmul.f32 %v9502_v27, %v9504_v45  ;;  %v5698_v26 = vmul.f32 %v9502_v27, %v9505_v60  ;;  %v9506_v5 = vld [vmem:[#allocation48_spill] sm:$0xff]  ;;  %v9507_v52 = vld [vmem:[#allocation49_spill] sm:$0xff] }
  0xe2   : > { %9494 = vst [vmem:[#allocation121_spill] sm:$0xff] %v5673_v63  ;;  %9496 = vst [vmem:[#allocation123_spill] sm:$0xff] %v5676_v12  ;;  %v5702_v29 = vmul.f32 %v9502_v27, %v9506_v5  ;;  %v5706_v50 = vmul.f32 %v9502_v27, %v9507_v52  ;;  %v9508_v37 = vld [vmem:[#allocation51_spill] sm:$0xff]  ;;  %v9509_v20 = vld [vmem:[#allocation52_spill] sm:$0xff]  ;;  %v1182_v43 = vrot.slane %v5686_v28, 1 }
  0xe3   : > { %9498 = vst [vmem:[#allocation124_spill] sm:$0xff] %v5679_v9  ;;  %9500 = vst [vmem:[#allocation125_spill] sm:$0xff] %v5682_v4  ;;  %v5710_v13 = vmul.f32 %v9502_v27, %v9508_v37  ;;  %v5714_v49 = vmul.f32 %v9502_v27, %v9509_v20  ;;  %v9510_v34 = vld [vmem:[#allocation54_spill] sm:$0xff]  ;;  %v9511_v60 = vld [vmem:[#allocation55_spill] sm:$0xff]  ;;  %v1185_v8 = vrot.slane %v5694_v42, 1 }
  0xe4   : > { %v5718_v45 = vmul.f32 %v9502_v27, %v9510_v34  ;;  %v5722_v5 = vmul.f32 %v9502_v27, %v9511_v60  ;;  %v9512_v4 = vld [vmem:[#allocation57_spill] sm:$0xff]  ;;  %v9513_v9 = vld [vmem:[#allocation58_spill] sm:$0xff]  ;;  %v9515_v63 = vld [vmem:[#allocation63_spill] sm:$0xff]  ;;  %v1188_v6 = vrot.slane %v5702_v29, 1 }
  0xe5   : > { %v5726_v52 = vmul.f32 %v9502_v27, %v9512_v4  ;;  %v5730_v37 = vmul.f32 %v9502_v27, %v9513_v9  ;;  %v9514_v12 = vld [vmem:[#allocation62_spill] sm:$0xff]  ;;  %v5738_v34 = vmul.f32 %v9502_v27, %v9515_v63  ;;  %v9516_v53 = vld [vmem:[#allocation67_spill] sm:$0xff]  ;;  %v9517_v10 = vld [vmem:[#allocation68_spill] sm:$0xff]  ;;  %v1192_v56 = vrot.slane %v5714_v49, 1 }
  0xe6   : > { %v5734_v20 = vmul.f32 %v9502_v27, %v9514_v12  ;;  %v5742_v60 = vmul.f32 %v9502_v27, %v9516_v53  ;;  %v5746_v4 = vmul.f32 %v9502_v27, %v9517_v10  ;;  %v9518_v48 = vld [vmem:[#allocation73_spill] sm:$0xff]  ;;  %v9519_v59 = vld [vmem:[#allocation76_spill] sm:$0xff]  ;;  %v9521_v44 = vld [vmem:[#allocation82_spill] sm:$0xff]  ;;  %v5870_v39 = vadd.f32 %v1185_v8, %v5550_v41 }
  0xe7   : > { %v5750_v9 = vmul.f32 %v9502_v27, %v9518_v48  ;;  %v5754_v12 = vmul.f32 %v9502_v27, %v9519_v59  ;;  %v9520_v30 = vld [vmem:[#allocation81_spill] sm:$0xff]  ;;  %v5762_v53 = vmul.f32 %v9502_v27, %v9521_v44  ;;  %v9522_v14 = vld [vmem:[#allocation88_spill] sm:$0xff]  ;;  %v9524_v40 = vld [vmem:[#allocation95_spill] sm:$0xff]  ;;  %v1183_v44 = vrot.slane %v5690_v21, 1 }
  0xe8   : > { %v5758_v63 = vmul.f32 %v9502_v27, %v9520_v30  ;;  %v5766_v10 = vmul.f32 %v9502_v27, %v9522_v14  ;;  %v9523_v22 = vld [vmem:[#allocation89_spill] sm:$0xff]  ;;  %v5774_v59 = vmul.f32 %v9502_v27, %v9524_v40  ;;  %v9525_v3 = vld [vmem:[#allocation100_spill] sm:$0xff]  ;;  %v9526_v35 = vld [vmem:[#allocation106_spill] sm:$0xff]  ;;  %v1186_v40 = vrot.slane %v5698_v26, 1 }
  0xe9   : > { %v5770_v48 = vmul.f32 %v9502_v27, %v9523_v22  ;;  %v5778_v30 = vmul.f32 %v9502_v27, %v9525_v3  ;;  %v5784_v14 = vmul.f32 %v9502_v27, %v9526_v35  ;;  %v9527_v18 = vld [vmem:[#allocation107_spill] sm:$0xff]  ;;  %v9528_v47 = vld [vmem:[#allocation113_spill] sm:$0xff]  ;;  %v9529_v62 = vld [vmem:[#allocation114_spill] sm:$0xff]  ;;  %v1184_v19 = vsel %vm969_vm3, %v1182_v43, %v1183_v44 }
  0xea   : > { %v5788_v22 = vmul.f32 %v9502_v27, %v9527_v18  ;;  %v5794_v3 = vmul.f32 %v9502_v27, %v9528_v47  ;;  %v5798_v28 = vmul.f32 %v9502_v27, %v9529_v62  ;;  %v9530_v21 = vld [vmem:[#allocation119_spill] sm:$0xff]  ;;  %v9531_v2 = vld [vmem:[#allocation122_spill] sm:$0xff]  ;;  %v9533_v26 = vld [vmem:[#allocation128_spill] sm:$0xff]  ;;  %v1189_v62 = vrot.slane %v5706_v50, 1 }
  0xeb   : > { %v5802_v35 = vmul.f32 %v9502_v27, %v9530_v21  ;;  %v5806_v18 = vmul.f32 %v9502_v27, %v9531_v2  ;;  %v9532_v51 = vld [vmem:[#allocation127_spill] sm:$0xff]  ;;  %v5814_v47 = vmul.f32 %v9502_v27, %v9533_v26  ;;  %v1191_v21 = vrot.slane %v5710_v13, 1  ;;  %v9534_v41 = vld [vmem:[#allocation86_spill] sm:$0xff] }
  0xec   : > { %v5810_v42 = vmul.f32 %v9502_v27, %v9532_v51  ;;  %v1194_v2 = vrot.slane %v5718_v45, 1  ;;  %v1187_v58 = vsel %vm969_vm3, %v1185_v8, %v1186_v40  ;;  %v1195_v51 = vrot.slane %v5722_v5, 1 }
  0xed   : > { %v1197_v0 = vrot.slane %v5726_v52, 1  ;;  %v1198_v27 = vrot.slane %v5730_v37, 1  ;;  %v1200_v29 = vrot.slane %v5734_v20, 1  ;;  %v1201_v50 = vrot.slane %v5738_v34, 1 }
  0xee   : > { %v1203_v26 = vrot.slane %v5742_v60, 1  ;;  %v1204_v13 = vrot.slane %v5746_v4, 1  ;;  %v1206_v49 = vrot.slane %v5750_v9, 1  ;;  %v1207_v45 = vrot.slane %v5754_v12, 1 }
  0xef   : > { %v1209_v7 = vrot.slane %v5758_v63, 1  ;;  %v1210_v5 = vrot.slane %v5762_v53, 1  ;;  %v1212_v52 = vrot.slane %v5766_v10, 1  ;;  %v1213_v37 = vrot.slane %v5770_v48, 1 }
  0xf0   : > { %v1215_v20 = vrot.slane %v5774_v59, 1  ;;  %v1216_v34 = vrot.slane %v5778_v30, 1  ;;  %v1218_v60 = vrot.slane %v5784_v14, 1  ;;  %v1219_v4 = vrot.slane %v5788_v22, 1 }
  0xf1   : > { %v1221_v9 = vrot.slane %v5794_v3, 1  ;;  %v1222_v12 = vrot.slane %v5798_v28, 1  ;;  %v1190_v63 = vsel %vm969_vm3, %v1188_v6, %v1189_v62  ;;  %v1193_v53 = vsel %vm969_vm3, %v1191_v21, %v1192_v56 }
  0xf2   : > { %v1224_v10 = vrot.slane %v5802_v35, 1  ;;  %v1225_v48 = vrot.slane %v5806_v18, 1  ;;  %v1196_v59 = vsel %vm969_vm3, %v1194_v2, %v1195_v51  ;;  %v1199_v30 = vsel %vm969_vm3, %v1197_v0, %v1198_v27 }
  0xf3   : > { %v1227_v14 = vrot.slane %v5810_v42, 1  ;;  %v1228_v22 = vrot.slane %v5814_v47, 1  ;;  %v1202_v3 = vsel %vm969_vm3, %v1200_v29, %v1201_v50  ;;  %v1205_v28 = vsel %vm969_vm3, %v1203_v26, %v1204_v13 }
  0xf4   : > { %v1208_v31 = vsel %vm969_vm3, %v1206_v49, %v1207_v45  ;;  %v1211_v1 = vsel %vm969_vm3, %v1209_v7, %v1210_v5  ;;  %v1214_v35 = vsel %vm969_vm3, %v1212_v52, %v1213_v37  ;;  %v1217_v18 = vsel %vm969_vm3, %v1215_v20, %v1216_v34 }
  0xf5   : > { %v1220_v36 = vsel %vm969_vm3, %v1218_v60, %v1219_v4  ;;  %v1223_v25 = vsel %vm969_vm3, %v1221_v9, %v1222_v12  ;;  %v1226_v42 = vsel %vm969_vm3, %v1224_v10, %v1225_v48  ;;  %v5860_v47 = vadd.f32 %v1182_v43, %v5540_v24 }
  0xf6   : > { %v5863_v57 = vadd.f32 %v1184_v19, %v5543_v61  ;;  %v5866_v32 = vadd.f32 %v1183_v44, %v5546_v55  ;;  %v1229_v23 = vsel %vm969_vm3, %v1227_v14, %v1228_v22  ;;  %v5873_v46 = vadd.f32 %v1187_v58, %v5553_v17  ;;  %v9536_v17 = vld [vmem:[#allocation65_spill] sm:$0xff] }
  0xf7   : > { %v5876_v11 = vadd.f32 %v1186_v40, %v5556_v33  ;;  %v5879_v24 = vadd.f32 %v1188_v6, %v5559_v54  ;;  %v5882_v61 = vadd.f32 %v1190_v63, %v5562_v16  ;;  %v5885_v55 = vadd.f32 %v1189_v62, %v5565_v15  ;;  %v9538_v33 = vld [vmem:[#allocation87_spill] sm:$0xff]  ;;  %v9540_v54 = vld [vmem:[#allocation66_spill] sm:$0xff]  ;;  %v9542_v16 = vld [vmem:[#allocation93_spill] sm:$0xff] }
  0xf8   : > { %v5888_v19 = vadd.f32 %v1191_v21, %v5568_v38  ;;  %v5891_v8 = vadd.f32 %v1193_v53, %v9534_v41  ;;  %v5894_v58 = vadd.f32 %v1192_v56, %v9536_v17  ;;  %v5897_v43 = vadd.f32 %v1194_v2, %v9538_v33  ;;  %v9544_v15 = vld [vmem:[#allocation69_spill] sm:$0xff]  ;;  %v9546_v38 = vld [vmem:[#allocation98_spill] sm:$0xff]  ;;  %v9550_v56 = vld [vmem:[#allocation99_spill] sm:$0xff] }
  0xf9   : > { %v5900_v6 = vadd.f32 %v1196_v59, %v9540_v54  ;;  %v5903_v40 = vadd.f32 %v1195_v51, %v9542_v16  ;;  %v5906_v62 = vadd.f32 %v1197_v0, %v9544_v15  ;;  %v5909_v44 = vadd.f32 %v1199_v30, %v9546_v38  ;;  %v9548_v21 = vld [vmem:[#allocation70_spill] sm:$0xff]  ;;  %v9552_v2 = vld [vmem:[#allocation71_spill] sm:$0xff]  ;;  %v9554_v59 = vld [vmem:[#allocation104_spill] sm:$0xff] }
  0xfa   : > { %9535 = vst [vmem:[#allocation42_spill] sm:$0xff] %v5891_v8  ;;  %9537 = vst [vmem:[#allocation37_spill] sm:$0xff] %v5894_v58  ;;  %v5912_v63 = vadd.f32 %v1198_v27, %v9548_v21  ;;  %v5915_v53 = vadd.f32 %v1200_v29, %v9550_v56  ;;  %v5918_v41 = vadd.f32 %v1202_v3, %v9552_v2  ;;  %v9556_v51 = vld [vmem:[#allocation74_spill] sm:$0xff]  ;;  %v9558_v0 = vld [vmem:[#allocation105_spill] sm:$0xff] }
  0xfb   : > { %9539 = vst [vmem:[#allocation47_spill] sm:$0xff] %v5897_v43  ;;  %9541 = vst [vmem:[#allocation50_spill] sm:$0xff] %v5900_v6  ;;  %v5921_v17 = vadd.f32 %v1201_v50, %v9554_v59  ;;  %v5924_v33 = vadd.f32 %v1203_v26, %v9556_v51  ;;  %v5927_v54 = vadd.f32 %v1205_v28, %v9558_v0  ;;  %v9560_v30 = vld [vmem:[#allocation75_spill] sm:$0xff]  ;;  %v9564_v29 = vld [vmem:[#allocation78_spill] sm:$0xff] }
  0xfc   : > { %9543 = vst [vmem:[#allocation53_spill] sm:$0xff] %v5903_v40  ;;  %9545 = vst [vmem:[#allocation56_spill] sm:$0xff] %v5906_v62  ;;  %v5930_v16 = vadd.f32 %v1204_v13, %v9560_v30  ;;  %v9562_v27 = vld [vmem:[#allocation111_spill] sm:$0xff]  ;;  %v5936_v38 = vadd.f32 %v1208_v31, %v9564_v29  ;;  %v9566_v3 = vld [vmem:[#allocation112_spill] sm:$0xff] }
  0xfd   : > { %9547 = vst [vmem:[#allocation59_spill] sm:$0xff] %v5909_v44  ;;  %9549 = vst [vmem:[#allocation64_spill] sm:$0xff] %v5912_v63  ;;  %v5933_v15 = vadd.f32 %v1206_v49, %v9562_v27  ;;  %v5939_v21 = vadd.f32 %v1207_v45, %v9566_v3  ;;  %v9568_v50 = vld [vmem:[#allocation79_spill] sm:$0xff]  ;;  %v9570_v26 = vld [vmem:[#allocation84_spill] sm:$0xff] }
  0xfe   : > { %9551 = vst [vmem:[#allocation72_spill] sm:$0xff] %v5915_v53  ;;  %9553 = vst [vmem:[#allocation77_spill] sm:$0xff] %v5918_v41  ;;  %v5942_v56 = vadd.f32 %v1209_v7, %v9568_v50  ;;  %v5945_v2 = vadd.f32 %v1211_v1, %v9570_v26  ;;  %v9572_v28 = vld [vmem:[#allocation85_spill] sm:$0xff]  ;;  %v9574_v13 = vld [vmem:[#allocation90_spill] sm:$0xff] }
  0xff   : > { %9555 = vst [vmem:[#allocation83_spill] sm:$0xff] %v5921_v17  ;;  %9557 = vst [vmem:[#allocation94_spill] sm:$0xff] %v5924_v33  ;;  %v5948_v59 = vadd.f32 %v1210_v5, %v9572_v28  ;;  %v5951_v51 = vadd.f32 %v1212_v52, %v9574_v13  ;;  %v9576_v49 = vld [vmem:[#allocation91_spill] sm:$0xff]  ;;  %v9578_v31 = vld [vmem:[#allocation92_spill] sm:$0xff] }
 0x100   : > { %9559 = vst [vmem:[#allocation101_spill] sm:$0xff] %v5927_v54  ;;  %9561 = vst [vmem:[#allocation108_spill] sm:$0xff] %v5930_v16  ;;  %v5954_v0 = vadd.f32 %v1214_v35, %v9576_v49  ;;  %v5957_v30 = vadd.f32 %v1213_v37, %v9578_v31  ;;  %v9580_v45 = vld [vmem:[#allocation96_spill] sm:$0xff]  ;;  %v9582_v7 = vld [vmem:[#allocation97_spill] sm:$0xff] }
 0x101   : > { %9563 = vst [vmem:[#allocation118_spill] sm:$0xff] %v5933_v15  ;;  %9565 = vst [vmem:[#allocation126_spill] sm:$0xff] %v5936_v38  ;;  %v5960_v27 = vadd.f32 %v1215_v20, %v9580_v45  ;;  %v5963_v29 = vadd.f32 %v1217_v18, %v9582_v7  ;;  %v9584_v1 = vld [vmem:[#allocation102_spill] sm:$0xff]  ;;  %v9586_v5 = vld [vmem:[#allocation103_spill] sm:$0xff] }
 0x102   : > { %9567 = vst [vmem:[#allocation129_spill] sm:$0xff] %v5939_v21  ;;  %9569 = vst [vmem:[#allocation130_spill] sm:$0xff] %v5942_v56  ;;  %v5966_v3 = vadd.f32 %v1216_v34, %v9584_v1  ;;  %v5969_v50 = vadd.f32 %v1218_v60, %v9586_v5  ;;  %v9588_v52 = vld [vmem:[#allocation36_spill] sm:$0xff]  ;;  %v9592_v37 = vld [vmem:[#allocation45_spill] sm:$0xff] }
 0x103   : > { %9571 = vst [vmem:[#allocation131_spill] sm:$0xff] %v5945_v2  ;;  %9573 = vst [vmem:[#allocation132_spill] sm:$0xff] %v5948_v59  ;;  %v5972_v26 = vadd.f32 %v1220_v36, %v9588_v52  ;;  %v9590_v35 = vld [vmem:[#allocation44_spill] sm:$0xff]  ;;  %v5978_v13 = vadd.f32 %v1221_v9, %v9592_v37  ;;  %v9594_v20 = vld [vmem:[#allocation115_spill] sm:$0xff] }
 0x104   : > { %9575 = vst [vmem:[#allocation133_spill] sm:$0xff] %v5951_v51  ;;  %9577 = vst [vmem:[#allocation134_spill] sm:$0xff] %v5954_v0  ;;  %v5975_v28 = vadd.f32 %v1219_v4, %v9590_v35  ;;  %v5981_v49 = vadd.f32 %v1223_v25, %v9594_v20  ;;  %v9596_v18 = vld [vmem:[#allocation116_spill] sm:$0xff]  ;;  %v9598_v34 = vld [vmem:[#allocation117_spill] sm:$0xff] }
 0x105   : > { %9579 = vst [vmem:[#allocation135_spill] sm:$0xff] %v5957_v30  ;;  %9581 = vst [vmem:[#allocation136_spill] sm:$0xff] %v5960_v27  ;;  %v5984_v31 = vadd.f32 %v1222_v12, %v9596_v18  ;;  %v5987_v45 = vadd.f32 %v1224_v10, %v9598_v34  ;;  %v9600_v60 = vld [vmem:[#allocation120_spill] sm:$0xff]  ;;  %v9602_v36 = vld [vmem:[#allocation121_spill] sm:$0xff] }
 0x106   : > { %9583 = vst [vmem:[#allocation137_spill] sm:$0xff] %v5963_v29  ;;  %9585 = vst [vmem:[#allocation138_spill] sm:$0xff] %v5966_v3  ;;  %v5990_v7 = vadd.f32 %v1226_v42, %v9600_v60  ;;  %v5993_v1 = vadd.f32 %v1225_v48, %v9602_v36  ;;  %v9604_v4 = vld [vmem:[#allocation123_spill] sm:$0xff]  ;;  %v9606_v9 = vld [vmem:[#allocation124_spill] sm:$0xff] }
 0x107   : > { %9587 = vst [vmem:[#allocation139_spill] sm:$0xff] %v5969_v50  ;;  %9589 = vst [vmem:[#allocation60_spill] sm:$0xff] %v5972_v26  ;;  %v5996_v5 = vadd.f32 %v1227_v14, %v9604_v4  ;;  %v5999_v52 = vadd.f32 %v1229_v23, %v9606_v9  ;;  %v9608_v25 = vld [vmem:[#allocation125_spill] sm:$0xff]  ;;  %v6004_v12 = vld [vmem:[#allocation2 + $0x48] sm:$0xff] }
 0x108   : > { %9591 = vst [vmem:[#allocation80_spill] sm:$0xff] %v5975_v28  ;;  %9593 = vst [vmem:[#allocation61_spill] sm:$0xff] %v5978_v13  ;;  %v6002_v35 = vadd.f32 %v1228_v22, %v9608_v25  ;;  %v9611_v37 = vld [vmem:[#allocation41_spill] sm:$0xff]  ;;  %v6016_v14 = vld [vmem:[#allocation2 + $0x68] sm:$0xff] }
 0x109   : > { %9595 = vst [vmem:[#allocation38_spill] sm:$0xff] %v5981_v49  ;;  %9597 = vst [vmem:[#allocation40_spill] sm:$0xff] %v5984_v31  ;;  %v6008_v10 = vmul.f32 %v6004_v12, %v9611_v37  ;;  %v6010_v42 = vld [vmem:[#allocation2 + $0x50] sm:$0xff]  ;;  %v6020_v23 = vmul.f32 %v6016_v14, %v9611_v37  ;;  %v6028_v18 = vld [vmem:[#allocation2 + $0x88] sm:$0xff] }
 0x10a   : > { %9599 = vst [vmem:[#allocation39_spill] sm:$0xff] %v5987_v45  ;;  %9601 = vst [vmem:[#allocation43_spill] sm:$0xff] %v5990_v7  ;;  %v6014_v48 = vmul.f32 %v6010_v42, %v9611_v37  ;;  %v6022_v22 = vld [vmem:[#allocation2 + $0x70] sm:$0xff]  ;;  %v6032_v34 = vmul.f32 %v6028_v18, %v9611_v37  ;;  %v6040_v4 = vld [vmem:[#allocation2 + $0xa8] sm:$0xff] }
 0x10b   : > { %9603 = vst [vmem:[#allocation46_spill] sm:$0xff] %v5993_v1  ;;  %9605 = vst [vmem:[#allocation48_spill] sm:$0xff] %v5996_v5  ;;  %v6026_v20 = vmul.f32 %v6022_v22, %v9611_v37  ;;  %v6034_v60 = vld [vmem:[#allocation2 + $0x90] sm:$0xff]  ;;  %v6044_v9 = vmul.f32 %v6040_v4, %v9611_v37  ;;  %v9624_v1 = vld [vmem:[#allocation68_spill] sm:$0xff]  ;;  %v1394_v27 = vrot.slane %v6008_v10, 1  ;;  %v1397_v51 = vrot.slane %v6020_v23, 1 }
 0x10c   : > { %9607 = vst [vmem:[#allocation49_spill] sm:$0xff] %v5999_v52  ;;  %9609 = vst [vmem:[#allocation51_spill] sm:$0xff] %v6002_v35  ;;  %v6038_v36 = vmul.f32 %v6034_v60, %v9611_v37  ;;  %v6046_v25 = vld [vmem:[#allocation2 + $0xb0] sm:$0xff]  ;;  %v9622_v35 = vld [vmem:[#allocation63_spill] sm:$0xff]  ;;  %v1400_v38 = vrot.slane %v6032_v34, 1 }
 0x10d   : > { %9610 = vst [vmem:[#allocation52_spill] sm:$0xff] %v6004_v12  ;;  %9612 = vst [vmem:[#allocation54_spill] sm:$0xff] %v6010_v42  ;;  %v9621_v12 = vld [vmem:[#allocation62_spill] sm:$0xff]  ;;  %v6068_v52 = vmul.f32 %v9611_v37, %v9622_v35  ;;  %v9625_v7 = vld [vmem:[#allocation73_spill] sm:$0xff]  ;;  %v6204_v6 = vadd.f32 %v1394_v27, %v5860_v47 }
 0x10e   : > { %9613 = vst [vmem:[#allocation55_spill] sm:$0xff] %v6016_v14  ;;  %9614 = vst [vmem:[#allocation57_spill] sm:$0xff] %v6022_v22  ;;  %v6050_v22 = vmul.f32 %v6046_v25, %v9611_v37  ;;  %v9626_v45 = vld [vmem:[#allocation76_spill] sm:$0xff]  ;;  %v9627_v31 = vld [vmem:[#allocation81_spill] sm:$0xff] }
 0x10f   : > { %9615 = vst [vmem:[#allocation86_spill] sm:$0xff] %v6028_v18  ;;  %9616 = vst [vmem:[#allocation65_spill] sm:$0xff] %v6034_v60  ;;  %v6052_v18 = vld [vmem:[#allocation2 + $0xc8] sm:$0xff]  ;;  %v9620_v60 = vld [vmem:[#allocation58_spill] sm:$0xff]  ;;  %v6088_v35 = vmul.f32 %v9611_v37, %v9627_v31 }
 0x110   : > { %9617 = vst [vmem:[#allocation87_spill] sm:$0xff] %v6040_v4  ;;  %9618 = vst [vmem:[#allocation66_spill] sm:$0xff] %v6046_v25  ;;  %v6056_v14 = vmul.f32 %v6052_v18, %v9611_v37  ;;  %v6060_v42 = vmul.f32 %v9611_v37, %v9620_v60  ;;  %v6064_v4 = vmul.f32 %v9611_v37, %v9621_v12  ;;  %v9623_v25 = vld [vmem:[#allocation67_spill] sm:$0xff]  ;;  %v9628_v49 = vld [vmem:[#allocation82_spill] sm:$0xff]  ;;  %v1404_v16 = vrot.slane %v6050_v22, 1 }
 0x111   : > { %9619 = vst [vmem:[#allocation93_spill] sm:$0xff] %v6052_v18  ;;  %v6072_v5 = vmul.f32 %v9611_v37, %v9623_v25  ;;  %v6076_v18 = vmul.f32 %v9611_v37, %v9624_v1  ;;  %v6080_v60 = vmul.f32 %v9611_v37, %v9625_v7  ;;  %v6084_v12 = vmul.f32 %v9611_v37, %v9626_v45  ;;  %v9629_v13 = vld [vmem:[#allocation88_spill] sm:$0xff]  ;;  %v9630_v28 = vld [vmem:[#allocation89_spill] sm:$0xff]  ;;  %v9631_v26 = vld [vmem:[#allocation95_spill] sm:$0xff] }
 0x112   : > { %v6092_v25 = vmul.f32 %v9611_v37, %v9628_v49  ;;  %v6096_v1 = vmul.f32 %v9611_v37, %v9629_v13  ;;  %v6100_v7 = vmul.f32 %v9611_v37, %v9630_v28  ;;  %v6104_v45 = vmul.f32 %v9611_v37, %v9631_v26  ;;  %v9632_v50 = vld [vmem:[#allocation100_spill] sm:$0xff]  ;;  %v9633_v3 = vld [vmem:[#allocation106_spill] sm:$0xff]  ;;  %v9634_v29 = vld [vmem:[#allocation107_spill] sm:$0xff] }
 0x113   : > { %v6108_v31 = vmul.f32 %v9611_v37, %v9632_v50  ;;  %v6112_v49 = vmul.f32 %v9611_v37, %v9633_v3  ;;  %v6116_v13 = vmul.f32 %v9611_v37, %v9634_v29  ;;  %v1395_v28 = vrot.slane %v6014_v48, 1  ;;  %v9635_v30 = vld [vmem:[#allocation113_spill] sm:$0xff]  ;;  %v9636_v0 = vld [vmem:[#allocation114_spill] sm:$0xff]  ;;  %v9637_v59 = vld [vmem:[#allocation119_spill] sm:$0xff] }
 0x114   : > { %v6122_v26 = vmul.f32 %v9611_v37, %v9635_v30  ;;  %v6126_v50 = vmul.f32 %v9611_v37, %v9636_v0  ;;  %v1398_v3 = vrot.slane %v6026_v20, 1  ;;  %v6132_v29 = vmul.f32 %v9611_v37, %v9637_v59  ;;  %v9638_v2 = vld [vmem:[#allocation122_spill] sm:$0xff]  ;;  %v9640_v48 = vld [vmem:[#allocation127_spill] sm:$0xff]  ;;  %v9641_v56 = vld [vmem:[#allocation128_spill] sm:$0xff] }
 0x115   : > { %v6136_v10 = vmul.f32 %v9611_v37, %v9638_v2  ;;  %v6140_v30 = vmul.f32 %v9611_v37, %v9640_v48  ;;  %v6144_v0 = vmul.f32 %v9611_v37, %v9641_v56  ;;  %v9643_v21 = vld [vmem:[#allocation109_spill] sm:$0xff]  ;;  %v9644_v20 = vld [vmem:[#allocation110_spill] sm:$0xff]  ;;  %v1401_v2 = vrot.slane %v6038_v36, 1 }
 0x116   : > { %v6148_v23 = vmul.f32 %v9611_v37, %v9643_v21  ;;  %v6152_v59 = vmul.f32 %v9611_v37, %v9644_v20  ;;  %v1396_v15 = vsel %vm969_vm3, %v1394_v27, %v1395_v28  ;;  %v1403_v48 = vrot.slane %v6044_v9, 1 }
 0x117   : > { %9639 = vst [vmem:[#allocation69_spill] sm:$0xff] %v6136_v10  ;;  %9642 = vst [vmem:[#allocation98_spill] sm:$0xff] %v6144_v0  ;;  %v1406_v56 = vrot.slane %v6056_v14, 1  ;;  %v1399_v54 = vsel %vm969_vm3, %v1397_v51, %v1398_v3  ;;  %v1407_v21 = vrot.slane %v6060_v42, 1  ;;  %v1409_v33 = vrot.slane %v6064_v4, 1 }
 0x118   : > { %v1410_v37 = vrot.slane %v6068_v52, 1  ;;  %v1412_v34 = vrot.slane %v6072_v5, 1  ;;  %v1413_v36 = vrot.slane %v6076_v18, 1  ;;  %v1415_v20 = vrot.slane %v6080_v60, 1 }
 0x119   : > { %v1416_v9 = vrot.slane %v6084_v12, 1  ;;  %v1418_v22 = vrot.slane %v6088_v35, 1  ;;  %v1419_v14 = vrot.slane %v6092_v25, 1  ;;  %v1421_v17 = vrot.slane %v6096_v1, 1 }
 0x11a   : > { %v1422_v42 = vrot.slane %v6100_v7, 1  ;;  %v1424_v4 = vrot.slane %v6104_v45, 1  ;;  %v1425_v52 = vrot.slane %v6108_v31, 1  ;;  %v1427_v5 = vrot.slane %v6112_v49, 1 }
 0x11b   : > { %v1428_v18 = vrot.slane %v6116_v13, 1  ;;  %v1430_v60 = vrot.slane %v6122_v26, 1  ;;  %v1431_v12 = vrot.slane %v6126_v50, 1  ;;  %v1433_v35 = vrot.slane %v6132_v29, 1 }
 0x11c   : > { %v1402_v1 = vsel %vm969_vm3, %v1400_v38, %v1401_v2  ;;  %v1405_v7 = vsel %vm969_vm3, %v1403_v48, %v1404_v16  ;;  %v1408_v49 = vsel %vm969_vm3, %v1406_v56, %v1407_v21  ;;  %v1411_v13 = vsel %vm969_vm3, %v1409_v33, %v1410_v37 }
 0x11d   : > { %v1414_v29 = vsel %vm969_vm3, %v1412_v34, %v1413_v36  ;;  %v1417_v25 = vsel %vm969_vm3, %v1415_v20, %v1416_v9  ;;  %v1420_v41 = vsel %vm969_vm3, %v1418_v22, %v1419_v14  ;;  %v1423_v53 = vsel %vm969_vm3, %v1421_v17, %v1422_v42 }
 0x11e   : > { %v1426_v45 = vsel %vm969_vm3, %v1424_v4, %v1425_v52  ;;  %v1429_v31 = vsel %vm969_vm3, %v1427_v5, %v1428_v18  ;;  %v1432_v63 = vsel %vm969_vm3, %v1430_v60, %v1431_v12  ;;  %v9645_v44 = vrot.slane %v6136_v10, 1 }
 0x11f   : > { %v9646_v50 = vrot.slane %v6144_v0, 1  ;;  %v9647_v62 = vrot.slane %v6140_v30, 1  ;;  %v6207_v43 = vadd.f32 %v1396_v15, %v5863_v57  ;;  %v6210_v58 = vadd.f32 %v1395_v28, %v5866_v32 }
 0x120   : > { %v1435_v26 = vsel %vm969_vm3, %v1433_v35, %v9645_v44  ;;  %v9648_v8 = vrot.slane %v6152_v59, 1  ;;  %v9649_v10 = vrot.slane %v6148_v23, 1  ;;  %v6218_v0 = vadd.f32 %v1397_v51, %v5870_v39  ;;  %v9655_v39 = vld [vmem:[#allocation42_spill] sm:$0xff] }
 0x121   : > { %v1438_v40 = vsel %vm969_vm3, %v9647_v62, %v9646_v50  ;;  %v6221_v62 = vadd.f32 %v1399_v54, %v5873_v46  ;;  %v6224_v47 = vadd.f32 %v1398_v3, %v5876_v11  ;;  %v6227_v57 = vadd.f32 %v1400_v38, %v5879_v24  ;;  %v9657_v46 = vld [vmem:[#allocation37_spill] sm:$0xff]  ;;  %v9659_v11 = vld [vmem:[#allocation47_spill] sm:$0xff]  ;;  %v9661_v24 = vld [vmem:[#allocation50_spill] sm:$0xff] }
 0x122   : > { %v1441_v44 = vsel %vm969_vm3, %v9649_v10, %v9648_v8  ;;  %v6230_v32 = vadd.f32 %v1402_v1, %v5882_v61  ;;  %v6233_v15 = vadd.f32 %v1401_v2, %v5885_v55  ;;  %v6236_v8 = vadd.f32 %v1403_v48, %v5888_v19  ;;  %v9663_v61 = vld [vmem:[#allocation53_spill] sm:$0xff]  ;;  %v9665_v55 = vld [vmem:[#allocation56_spill] sm:$0xff]  ;;  %v9667_v19 = vld [vmem:[#allocation59_spill] sm:$0xff] }
 0x123   : > { %9650 = vst [vmem:[#allocation70_spill] sm:$0xff] %v6224_v47  ;;  %9651 = vst [vmem:[#allocation99_spill] sm:$0xff] %v6227_v57  ;;  %v6239_v51 = vadd.f32 %v1405_v7, %v9655_v39  ;;  %v6242_v54 = vadd.f32 %v1404_v16, %v9657_v46  ;;  %v6245_v27 = vadd.f32 %v1406_v56, %v9659_v11  ;;  %v9669_v2 = vld [vmem:[#allocation64_spill] sm:$0xff]  ;;  %v9673_v56 = vld [vmem:[#allocation77_spill] sm:$0xff] }
 0x124   : > { %9652 = vst [vmem:[#allocation71_spill] sm:$0xff] %v6230_v32  ;;  %9653 = vst [vmem:[#allocation104_spill] sm:$0xff] %v6233_v15  ;;  %v6248_v38 = vadd.f32 %v1408_v49, %v9661_v24  ;;  %v6251_v28 = vadd.f32 %v1407_v21, %v9663_v61  ;;  %v6254_v3 = vadd.f32 %v1409_v33, %v9665_v55  ;;  %v9671_v16 = vld [vmem:[#allocation72_spill] sm:$0xff]  ;;  %v9675_v49 = vld [vmem:[#allocation83_spill] sm:$0xff] }
 0x125   : > { %9654 = vst [vmem:[#allocation74_spill] sm:$0xff] %v6236_v8  ;;  %9656 = vst [vmem:[#allocation105_spill] sm:$0xff] %v6239_v51  ;;  %v6257_v10 = vadd.f32 %v1411_v13, %v9667_v19  ;;  %v6260_v48 = vadd.f32 %v1410_v37, %v9669_v2  ;;  %v6263_v1 = vadd.f32 %v1412_v34, %v9671_v16  ;;  %v9677_v21 = vld [vmem:[#allocation94_spill] sm:$0xff]  ;;  %v9679_v33 = vld [vmem:[#allocation101_spill] sm:$0xff] }
 0x126   : > { %9658 = vst [vmem:[#allocation75_spill] sm:$0xff] %v6242_v54  ;;  %9660 = vst [vmem:[#allocation111_spill] sm:$0xff] %v6245_v27  ;;  %v6266_v7 = vadd.f32 %v1414_v29, %v9673_v56  ;;  %v6269_v50 = vadd.f32 %v1413_v36, %v9675_v49  ;;  %v6272_v39 = vadd.f32 %v1415_v20, %v9677_v21  ;;  %v9681_v13 = vld [vmem:[#allocation108_spill] sm:$0xff]  ;;  %v9683_v37 = vld [vmem:[#allocation118_spill] sm:$0xff] }
 0x127   : > { %9662 = vst [vmem:[#allocation78_spill] sm:$0xff] %v6248_v38  ;;  %9664 = vst [vmem:[#allocation112_spill] sm:$0xff] %v6251_v28  ;;  %v6275_v46 = vadd.f32 %v1417_v25, %v9679_v33  ;;  %v6278_v11 = vadd.f32 %v1416_v9, %v9681_v13  ;;  %v6281_v24 = vadd.f32 %v1418_v22, %v9683_v37  ;;  %v9685_v34 = vld [vmem:[#allocation126_spill] sm:$0xff]  ;;  %v9687_v29 = vld [vmem:[#allocation129_spill] sm:$0xff] }
 0x128   : > { %9666 = vst [vmem:[#allocation79_spill] sm:$0xff] %v6254_v3  ;;  %9668 = vst [vmem:[#allocation84_spill] sm:$0xff] %v6257_v10  ;;  %v6284_v61 = vadd.f32 %v1420_v41, %v9685_v34  ;;  %v6287_v55 = vadd.f32 %v1419_v14, %v9687_v29  ;;  %v9689_v36 = vld [vmem:[#allocation130_spill] sm:$0xff]  ;;  %v9691_v20 = vld [vmem:[#allocation131_spill] sm:$0xff] }
 0x129   : > { %9670 = vst [vmem:[#allocation85_spill] sm:$0xff] %v6260_v48  ;;  %9672 = vst [vmem:[#allocation90_spill] sm:$0xff] %v6263_v1  ;;  %v6290_v19 = vadd.f32 %v1421_v17, %v9689_v36  ;;  %v6293_v2 = vadd.f32 %v1423_v53, %v9691_v20  ;;  %v9693_v25 = vld [vmem:[#allocation35_spill] sm:$0xff]  ;;  %v9694_v56 = vld [vmem:[#allocation132_spill] sm:$0xff] }
 0x12a   : > { %9674 = vst [vmem:[#allocation91_spill] sm:$0xff] %v6266_v7  ;;  %9676 = vst [vmem:[#allocation92_spill] sm:$0xff] %v6269_v50  ;;  %v1540_v16 = vsub.s32 2, %v9693_v25  ;;  %v6297_v9 = vadd.f32 %v1422_v42, %v9694_v56  ;;  %v9696_v49 = vld [vmem:[#allocation133_spill] sm:$0xff]  ;;  %v9698_v21 = vld [vmem:[#allocation134_spill] sm:$0xff] }
 0x12b   : > { %9678 = vst [vmem:[#allocation96_spill] sm:$0xff] %v6272_v39  ;;  %9680 = vst [vmem:[#allocation97_spill] sm:$0xff] %v6275_v46  ;;  %v6300_v22 = vadd.f32 %v1424_v4, %v9696_v49  ;;  %v6303_v41 = vadd.f32 %v1426_v45, %v9698_v21  ;;  %v9700_v33 = vld [vmem:[#allocation135_spill] sm:$0xff]  ;;  %v9702_v13 = vld [vmem:[#allocation136_spill] sm:$0xff] }
 0x12c   : > { %9682 = vst [vmem:[#allocation102_spill] sm:$0xff] %v6278_v11  ;;  %9684 = vst [vmem:[#allocation103_spill] sm:$0xff] %v6281_v24  ;;  %v6306_v14 = vadd.f32 %v1425_v52, %v9700_v33  ;;  %v6309_v17 = vadd.f32 %v1427_v5, %v9702_v13  ;;  %v9704_v37 = vld [vmem:[#allocation137_spill] sm:$0xff]  ;;  %v9706_v34 = vld [vmem:[#allocation138_spill] sm:$0xff] }
 0x12d   : > { %9686 = vst [vmem:[#allocation36_spill] sm:$0xff] %v6284_v61  ;;  %9688 = vst [vmem:[#allocation44_spill] sm:$0xff] %v6287_v55  ;;  %v6312_v53 = vadd.f32 %v1429_v31, %v9704_v37  ;;  %v6315_v29 = vadd.f32 %v1428_v18, %v9706_v34  ;;  %v9708_v42 = vld [vmem:[#allocation139_spill] sm:$0xff]  ;;  %v6320_v4 = vld [vmem:[#allocation2 + $0x58] sm:$0x1]  ;;  %v1817_v18 = vsub.s32 5, %v9693_v25 }
 0x12e   : > { %9690 = vst [vmem:[#allocation45_spill] sm:$0xff] %v6290_v19  ;;  %9692 = vst [vmem:[#allocation115_spill] sm:$0xff] %v6293_v2  ;;  %v6318_v36 = vadd.f32 %v1430_v60, %v9708_v42  ;;  %v6325_v45 = vld [vmem:[%s8789_s1 + $0x8] ss:$0 sm:$0xff]  ;;  %v9716_v31 = vld [vmem:[#allocation61_spill] sm:$0xff] }
 0x12f   : > { %9695 = vst [vmem:[#allocation116_spill] sm:$0xff] %v6297_v9  ;;  %9697 = vst [vmem:[#allocation117_spill] sm:$0xff] %v6300_v22  ;;  %v9712_v52 = vld [vmem:[#allocation60_spill] sm:$0xff]  ;;  %v6334_v49 = vadd.f32 %v1433_v35, %v9716_v31  ;;  %v6337_v60 = vld [vmem:[#allocation2 + $0x78] sm:$0x1] }
 0x130   : > { %9699 = vst [vmem:[#allocation120_spill] sm:$0xff] %v6303_v41  ;;  %9701 = vst [vmem:[#allocation121_spill] sm:$0xff] %v6306_v14  ;;  %v6328_v20 = vadd.f32 %v1432_v63, %v9712_v52  ;;  %v9714_v5 = vld [vmem:[#allocation80_spill] sm:$0xff]  ;;  %v9719_v21 = vld [vmem:[#allocation38_spill] sm:$0xff]  ;;  %v9726_v52 = vrot.slane %v6140_v30, 1 }
 0x131   : > { %9703 = vst [vmem:[#allocation123_spill] sm:$0xff] %v6309_v17  ;;  %9705 = vst [vmem:[#allocation124_spill] sm:$0xff] %v6312_v53  ;;  %v6331_v56 = vadd.f32 %v1431_v12, %v9714_v5  ;;  %v6340_v33 = vadd.f32 %v1435_v26, %v9719_v21  ;;  %v9721_v13 = vld [vmem:[#allocation40_spill] sm:$0xff]  ;;  %v9722_v37 = vld [vmem:[#allocation69_spill] sm:$0xff] }
 0x132   : > { %9707 = vst [vmem:[#allocation125_spill] sm:$0xff] %v6315_v29  ;;  %9709 = vst [vmem:[#allocation41_spill] sm:$0xff] %v6318_v36  ;;  %v9723_v34 = vrot.slane %v9722_v37, 1  ;;  %v9725_v63 = vld [vmem:[#allocation39_spill] sm:$0xff]  ;;  %v9730_v26 = vld [vmem:[#allocation46_spill] sm:$0xff] }
 0x133   : > { %9710 = vst [vmem:[#allocation58_spill] sm:$0xff] %v6320_v4  ;;  %9711 = vst [vmem:[#allocation62_spill] sm:$0xff] %v6325_v45  ;;  %v6350_v12 = vadd.f32 %v9726_v52, %v9725_v63  ;;  %v4051_v35 = vld [vmem:[%s8789_s1] sm:$0xff]  ;;  %v9731_v21 = vld [vmem:[#allocation98_spill] sm:$0xff] }
 0x134   : > { %9713 = vst [vmem:[#allocation63_spill] sm:$0xff] %v6328_v20  ;;  %9715 = vst [vmem:[#allocation67_spill] sm:$0xff] %v6331_v56  ;;  %v6345_v42 = vadd.f32 %v9723_v34, %v9721_v13  ;;  %v6355_v5 = vrot.slane %v4051_v35, %v1540_v16  ;;  %v9728_v31 = vld [vmem:[#allocation43_spill] sm:$0xff]  ;;  %v9734_v13 = vld [vmem:[#allocation48_spill] sm:$0xff]  ;;  %v9735_v34 = vrot.slane %v6148_v23, 1  ;;  %v9740_v16 = vrot.slane %v6152_v59, 1 }
 0x135   : > { %9717 = vst [vmem:[#allocation68_spill] sm:$0xff] %v6334_v49  ;;  %9718 = vst [vmem:[#allocation73_spill] sm:$0xff] %v6337_v60  ;;  %v6358_v25 = vadd.f32 %v1438_v40, %v9728_v31  ;;  %v9737_v63 = vld [vmem:[#allocation49_spill] sm:$0xff]  ;;  %v9742_v40 = vld [vmem:[#allocation52_spill] sm:$0xff]  ;;  %v6388_v23 = vmul.f32 %v6325_v45, %v6320_v4 }
 0x136   : > { %9720 = vst [vmem:[#allocation76_spill] sm:$0xff] %v6340_v33  ;;  %9724 = vst [vmem:[#allocation81_spill] sm:$0xff] %v6345_v42  ;;  %v9732_v33 = vrot.slane %v9731_v21, 1  ;;  %v6368_v30 = vadd.f32 %v9735_v34, %v9734_v13  ;;  %v6371_v52 = vadd.f32 %v1441_v44, %v9737_v63  ;;  %v9739_v42 = vld [vmem:[#allocation51_spill] sm:$0xff]  ;;  %v6380_v31 = vmul.f32 %v9742_v40, %v6325_v45  ;;  %v9750_v59 = vld [vmem:[#allocation57_spill] sm:$0xff] }
 0x137   : > { %9727 = vst [vmem:[#allocation82_spill] sm:$0xff] %v6350_v12  ;;  %9729 = vst [vmem:[#allocation88_spill] sm:$0xff] %v6358_v25  ;;  %v530_v12 = vld [vmem:[#allocation2 + $0x18] sm:$0x1]  ;;  %v6376_v49 = vadd.f32 %v9740_v16, %v9739_v42  ;;  %v6390_v44 = vrot.slane %v4051_v35, %v1817_v18  ;;  %v9748_v21 = vld [vmem:[#allocation55_spill] sm:$0xff]  ;;  %v6398_v42 = vmul.f32 %v9750_v59, %v6325_v45 }
 0x138   : > { %v6363_v37 = vadd.f32 %v9732_v33, %v9730_v26  ;;  %9736 = vst [vmem:[#allocation95_spill] sm:$0xff] %v6368_v30  ;;  %9738 = vst [vmem:[#allocation100_spill] sm:$0xff] %v6371_v52  ;;  %v9744_v33 = vld [vmem:[#allocation54_spill] sm:$0xff]  ;;  %v6394_v13 = vmul.f32 %v9748_v21, %v6325_v45  ;;  %v6402_v34 = vmul.f32 %v6325_v45, %v6337_v60  ;;  %v4052_v16 = vld [vmem:[#allocation2 + $0x8] sm:$0xff] }
 0x139   : > { %9741 = vst [vmem:[#allocation106_spill] sm:$0xff] %v6376_v49  ;;  %9743 = vst [vmem:[#allocation107_spill] sm:$0xff] %v6380_v31  ;;  %v6384_v26 = vmul.f32 %v9744_v33, %v6325_v45  ;;  %v6404_v63 = vld [vmem:[#allocation2 + $0x38] sm:$0x1]  ;;  %v4053_v18 = vld [vmem:[#allocation2 + $0x10] sm:$0xff] }
 0x13a   : > { %9733 = vst [vmem:[#allocation89_spill] sm:$0xff] %v6363_v37  ;;  %9746 = vst [vmem:[#allocation114_spill] sm:$0xff] %v6388_v23  ;;  %v6410_v35 = vmul.f32 %v4053_v18, %v6355_v5  ;;  %v6429_v49 = vld [vmem:[#allocation2 + $0x30] sm:$0xff]  ;;  %v6475_v52 = vld [vmem:[#allocation2 + $0xd8] sm:$0x1] }
 0x13b   : > { %9745 = vst [vmem:[#allocation113_spill] sm:$0xff] %v6384_v26  ;;  %9747 = vst [vmem:[#allocation119_spill] sm:$0xff] %v6390_v44  ;;  %v6407_v26 = vmul.f32 %v4052_v16, %v6355_v5  ;;  %v6423_v44 = vld [vmem:[#allocation2 + $0x28] sm:$0xff]  ;;  %v6433_v18 = vmul.f32 %v6429_v49, %v6355_v5  ;;  %v9766_v56 = vld [vmem:[#allocation93_spill] sm:$0xff] }
 0x13c   : > { %9749 = vst [vmem:[#allocation122_spill] sm:$0xff] %v6394_v13  ;;  %9751 = vst [vmem:[#allocation127_spill] sm:$0xff] %v6398_v42  ;;  %v9754_v13 = vld [vmem:[#allocation86_spill] sm:$0xff]  ;;  %v9756_v42 = vld [vmem:[#allocation65_spill] sm:$0xff]  ;;  %v6427_v16 = vmul.f32 %v6423_v44, %v6355_v5  ;;  %v6497_v20 = vmul.f32 %v9766_v56, %v6355_v5  ;;  %v1640_v1 = vrot.slane %v6410_v35, 2 }
 0x13d   : > { %9752 = vst [vmem:[#allocation128_spill] sm:$0xff] %v6402_v34  ;;  %9753 = vst [vmem:[#allocation109_spill] sm:$0xff] %v6404_v63  ;;  %v6414_v23 = vmul.f32 %v9754_v13, %v6325_v45  ;;  %v6418_v31 = vmul.f32 %v9756_v42, %v6325_v45  ;;  %v6421_v34 = vmul.f32 %v6355_v5, %v530_v12  ;;  %v6509_v36 = vld [vmem:[#allocation2 + $0xe8] sm:$0xff]  ;;  %v6515_v29 = vld [vmem:[#allocation2 + $0x118] sm:$0x1]  ;;  %v9794_v15 = vrot.slane %v6407_v26, 2 }
 0x13e   : > { %9758 = vst [vmem:[#allocation37_spill] sm:$0xff] %v6423_v44  ;;  %9759 = vst [vmem:[#allocation47_spill] sm:$0xff] %v6429_v49  ;;  %v6441_v12 = vmul.f32 %v9742_v40, %v6355_v5  ;;  %v6449_v45 = vmul.f32 %v6355_v5, %v6320_v4  ;;  %v6453_v49 = vmul.f32 %v9748_v21, %v6355_v5  ;;  %v6455_v44 = vld [vmem:[#allocation2 + $0x98] sm:$0x1]  ;;  %v6519_v53 = vld [vmem:[#allocation2 + $0xf0] sm:$0xff] }
 0x13f   : > { %9755 = vst [vmem:[#allocation110_spill] sm:$0xff] %v6414_v23  ;;  %9757 = vst [vmem:[#allocation42_spill] sm:$0xff] %v6418_v31  ;;  %v6437_v23 = vmul.f32 %v6355_v5, %v6404_v63  ;;  %v6445_v31 = vmul.f32 %v9744_v33, %v6355_v5  ;;  %v6457_v63 = vld [vmem:[#allocation2 + $0xb8] sm:$0x1]  ;;  %v6461_v40 = vmul.f32 %v9750_v59, %v6355_v5  ;;  %v9763_v59 = vld [vmem:[#allocation87_spill] sm:$0xff]  ;;  %v1642_v48 = vrot.slane %v6421_v34, 2 }
 0x140   : > { %9760 = vst [vmem:[#allocation50_spill] sm:$0xff] %v6455_v44  ;;  %9761 = vst [vmem:[#allocation53_spill] sm:$0xff] %v6457_v63  ;;  %v6465_v33 = vmul.f32 %v6355_v5, %v6337_v60  ;;  %v6469_v4 = vmul.f32 %v9754_v13, %v6355_v5  ;;  %v6473_v21 = vmul.f32 %v9756_v42, %v6355_v5  ;;  %v9764_v60 = vld [vmem:[#allocation66_spill] sm:$0xff]  ;;  %v6529_v17 = vld [vmem:[#allocation2 + $0x108] sm:$0xff] }
 0x141   : > { %9762 = vst [vmem:[#allocation56_spill] sm:$0xff] %v6475_v52  ;;  %v6479_v30 = vmul.f32 %v6355_v5, %v6455_v44  ;;  %v6483_v37 = vmul.f32 %v9763_v59, %v6355_v5  ;;  %v6487_v25 = vmul.f32 %v9764_v60, %v6355_v5  ;;  %v6491_v13 = vmul.f32 %v6355_v5, %v6457_v63  ;;  %v6493_v42 = vld [vmem:[#allocation2 + $0xf8] sm:$0x1]  ;;  %v6499_v44 = vld [vmem:[#allocation2 + $0xd0] sm:$0xff]  ;;  %v6622_v10 = vld [vmem:[#allocation2 + $0x1a8] sm:$0xff] }
 0x142   : > { %9765 = vst [vmem:[#allocation59_spill] sm:$0xff] %v6493_v42  ;;  %9767 = vst [vmem:[#allocation64_spill] sm:$0xff] %v6499_v44  ;;  %v6503_v59 = vmul.f32 %v6499_v44, %v6355_v5  ;;  %v6507_v60 = vmul.f32 %v6355_v5, %v6475_v52  ;;  %v6513_v63 = vmul.f32 %v6509_v36, %v6355_v5  ;;  %v6517_v56 = vld [vmem:[#allocation2 + $0x138] sm:$0x1]  ;;  %v6535_v14 = vld [vmem:[#allocation2 + $0x110] sm:$0xff]  ;;  %v1647_v8 = vrot.slane %v6437_v23, 2 }
 0x143   : > { %9768 = vst [vmem:[#allocation72_spill] sm:$0xff] %v6509_v36  ;;  %9769 = vst [vmem:[#allocation77_spill] sm:$0xff] %v6515_v29  ;;  %v6523_v44 = vmul.f32 %v6519_v53, %v6355_v5  ;;  %v6527_v52 = vmul.f32 %v6355_v5, %v6493_v42  ;;  %v6533_v36 = vmul.f32 %v6529_v17, %v6355_v5  ;;  %v6541_v22 = vld [vmem:[#allocation2 + $0x158] sm:$0x1]  ;;  %v6547_v42 = vld [vmem:[#allocation2 + $0x128] sm:$0xff]  ;;  %v1650_v57 = vrot.slane %v6445_v31, 2 }
 0x144   : > { %9770 = vst [vmem:[#allocation83_spill] sm:$0xff] %v6517_v56  ;;  %9771 = vst [vmem:[#allocation94_spill] sm:$0xff] %v6519_v53  ;;  %v6539_v41 = vmul.f32 %v6535_v14, %v6355_v5  ;;  %v6545_v53 = vmul.f32 %v6355_v5, %v6515_v29  ;;  %v6551_v9 = vmul.f32 %v6547_v42, %v6355_v5  ;;  %v6563_v19 = vld [vmem:[#allocation2 + $0x178] sm:$0x1]  ;;  %v6565_v29 = vld [vmem:[#allocation2 + $0x148] sm:$0xff]  ;;  %v1657_v23 = vrot.slane %v6465_v33, 2 }
 0x145   : > { %9772 = vst [vmem:[#allocation101_spill] sm:$0xff] %v6529_v17  ;;  %9773 = vst [vmem:[#allocation108_spill] sm:$0xff] %v6535_v14  ;;  %v6553_v17 = vld [vmem:[#allocation2 + $0x130] sm:$0xff]  ;;  %v6561_v14 = vmul.f32 %v6355_v5, %v6517_v56  ;;  %v6569_v55 = vmul.f32 %v6565_v29, %v6355_v5  ;;  %v6581_v56 = vld [vmem:[#allocation2 + $0x168] sm:$0xff]  ;;  %v6681_v32 = vsel %vm1638_vm4, %v1640_v1, %v1642_v48  ;;  %v1662_v47 = vrot.slane %v6479_v30, 2 }
 0x146   : > { %9774 = vst [vmem:[#allocation118_spill] sm:$0xff] %v6541_v22  ;;  %9775 = vst [vmem:[#allocation126_spill] sm:$0xff] %v6547_v42  ;;  %v6557_v2 = vmul.f32 %v6553_v17, %v6355_v5  ;;  %v6571_v42 = vld [vmem:[#allocation2 + $0x150] sm:$0xff]  ;;  %v6585_v24 = vmul.f32 %v6581_v56, %v6355_v5  ;;  %v6587_v11 = vld [vmem:[#allocation2 + $0x198] sm:$0x1]  ;;  %v1667_v31 = vrot.slane %v6491_v13, 2 }
 0x147   : > { %9776 = vst [vmem:[#allocation129_spill] sm:$0xff] %v6553_v17  ;;  %9777 = vst [vmem:[#allocation130_spill] sm:$0xff] %v6563_v19  ;;  %v6575_v61 = vmul.f32 %v6571_v42, %v6355_v5  ;;  %v6579_v17 = vmul.f32 %v6355_v5, %v6541_v22  ;;  %v6599_v22 = vld [vmem:[#allocation2 + $0x188] sm:$0xff]  ;;  %v6611_v7 = vld [vmem:[#allocation2 + $0x1b8] sm:$0x1]  ;;  %v1670_v51 = vrot.slane %v6503_v59, 2 }
 0x148   : > { %9778 = vst [vmem:[#allocation131_spill] sm:$0xff] %v6565_v29  ;;  %9779 = vst [vmem:[#allocation132_spill] sm:$0xff] %v6571_v42  ;;  %v6589_v29 = vld [vmem:[#allocation2 + $0x170] sm:$0xff]  ;;  %v6597_v42 = vmul.f32 %v6355_v5, %v6563_v19  ;;  %v6603_v39 = vmul.f32 %v6599_v22, %v6355_v5  ;;  %v6636_v19 = vmul.f32 %v6355_v5, %v6611_v7  ;;  %v6638_v35 = vld [vmem:[#allocation2 + $0x1c8] sm:$0xff]  ;;  %v9795_v30 = vrot.slane %v6427_v16, 2 }
 0x149   : > { %9780 = vst [vmem:[#allocation133_spill] sm:$0xff] %v6581_v56  ;;  %9781 = vst [vmem:[#allocation134_spill] sm:$0xff] %v6587_v11  ;;  %v6593_v46 = vmul.f32 %v6589_v29, %v6355_v5  ;;  %v6605_v56 = vld [vmem:[#allocation2 + $0x190] sm:$0xff]  ;;  %v6642_v34 = vmul.f32 %v6638_v35, %v6355_v5  ;;  %v6644_v28 = vld [vmem:[#allocation2 + $0x1f8] sm:$0x1] }
 0x14a   : > { %9782 = vst [vmem:[#allocation135_spill] sm:$0xff] %v6589_v29  ;;  %9783 = vst [vmem:[#allocation136_spill] sm:$0xff] %v6599_v22  ;;  %v6609_v50 = vmul.f32 %v6605_v56, %v6355_v5  ;;  %v6615_v29 = vmul.f32 %v6355_v5, %v6587_v11  ;;  %v6620_v22 = vld [vmem:[#allocation2 + $0x1d8] sm:$0x1]  ;;  %v6628_v3 = vld [vmem:[#allocation2 + $0x1b0] sm:$0xff] }
 0x14b   : > { %9784 = vst [vmem:[#allocation137_spill] sm:$0xff] %v6605_v56  ;;  %9785 = vst [vmem:[#allocation138_spill] sm:$0xff] %v6611_v7  ;;  %v6626_v56 = vmul.f32 %v6622_v10, %v6355_v5  ;;  %v6632_v11 = vmul.f32 %v6628_v3, %v6355_v5  ;;  %v6656_v7 = vld [vmem:[#allocation2 + $0x1e8] sm:$0xff] }
 0x14c   : > { %9786 = vst [vmem:[#allocation139_spill] sm:$0xff] %v6620_v22  ;;  %9787 = vst [vmem:[#allocation60_spill] sm:$0xff] %v6622_v10  ;;  %v6646_v10 = vld [vmem:[#allocation2 + $0x1d0] sm:$0xff]  ;;  %v6660_v27 = vmul.f32 %v6656_v7, %v6355_v5 }
 0x14d   : > { %9788 = vst [vmem:[#allocation80_spill] sm:$0xff] %v6628_v3  ;;  %9789 = vst [vmem:[#allocation61_spill] sm:$0xff] %v6638_v35  ;;  %v6650_v38 = vmul.f32 %v6646_v10, %v6355_v5  ;;  %v6654_v3 = vmul.f32 %v6355_v5, %v6620_v22  ;;  %v6662_v35 = vld [vmem:[#allocation2 + $0x1f0] sm:$0xff]  ;;  %v1645_v22 = vrot.slane %v6433_v18, 2  ;;  %v1655_v18 = vrot.slane %v6461_v40, 2 }
 0x14e   : > { %9790 = vst [vmem:[#allocation38_spill] sm:$0xff] %v6644_v28  ;;  %9791 = vst [vmem:[#allocation40_spill] sm:$0xff] %v6646_v10  ;;  %v6666_v54 = vmul.f32 %v6662_v35, %v6355_v5  ;;  %v6670_v10 = vmul.f32 %v6355_v5, %v6644_v28  ;;  %v1652_v5 = vrot.slane %v6449_v45, 2  ;;  %v1672_v40 = vrot.slane %v6507_v60, 2 }
 0x14f   : > { %9792 = vst [vmem:[#allocation69_spill] sm:$0xff] %v6656_v7  ;;  %9793 = vst [vmem:[#allocation39_spill] sm:$0xff] %v6662_v35  ;;  %v6678_v7 = vsel %vm1638_vm4, %v9794_v15, %v1640_v1  ;;  %v9021_v35 = vrot.slane %v6441_v12, 2  ;;  %v1660_v15 = vrot.slane %v6473_v21, 2  ;;  %v1665_v1 = vrot.slane %v6487_v25, 2 }
 0x150   : > { %v1675_v28 = vrot.slane %v6523_v44, 2  ;;  %v1677_v21 = vrot.slane %v6527_v52, 2  ;;  %v1646_v48 = vsel %vm1638_vm4, %v9795_v30, %v1645_v22  ;;  %v1648_v25 = vsel %vm1638_vm4, %v1645_v22, %v1647_v8 }
 0x151   : > { %v1680_v45 = vrot.slane %v6539_v41, 2  ;;  %v1651_v60 = vsel %vm1638_vm4, %v9021_v35, %v1650_v57  ;;  %v1653_v59 = vsel %vm1638_vm4, %v1650_v57, %v1652_v5  ;;  %v9796_v44 = vrot.slane %v6453_v49, 2 }
 0x152   : > { %v1658_v33 = vsel %vm1638_vm4, %v1655_v18, %v1657_v23  ;;  %v9797_v30 = vrot.slane %v6469_v4, 2  ;;  %v1663_v22 = vsel %vm1638_vm4, %v1660_v15, %v1662_v47  ;;  %v9798_v41 = vrot.slane %v6483_v37, 2 }
 0x153   : > { %v1656_v52 = vsel %vm1638_vm4, %v9796_v44, %v1655_v18  ;;  %v1668_v35 = vsel %vm1638_vm4, %v1665_v1, %v1667_v31  ;;  %v9799_v57 = vrot.slane %v6497_v20, 2  ;;  %v1673_v44 = vsel %vm1638_vm4, %v1670_v51, %v1672_v40 }
 0x154   : > { %v1661_v8 = vsel %vm1638_vm4, %v9797_v30, %v1660_v15  ;;  %v1666_v13 = vsel %vm1638_vm4, %v9798_v41, %v1665_v1  ;;  %v9800_v18 = vrot.slane %v6513_v63, 2  ;;  %v1678_v30 = vsel %vm1638_vm4, %v1675_v28, %v1677_v21 }
 0x155   : > { %v1671_v5 = vsel %vm1638_vm4, %v9799_v57, %v1670_v51  ;;  %v9801_v47 = vrot.slane %v6533_v36, 2  ;;  %v1682_v41 = vrot.slane %v6545_v53, 2  ;;  %v1685_v31 = vrot.slane %v6557_v2, 2 }
 0x156   : > { %v1676_v23 = vsel %vm1638_vm4, %v9800_v18, %v1675_v28  ;;  %v1687_v57 = vrot.slane %v6561_v14, 2  ;;  %v1690_v40 = vrot.slane %v6575_v61, 2  ;;  %v1692_v18 = vrot.slane %v6579_v17, 2 }
 0x157   : > { %v6734_v15 = vsel %vm1638_vm4, %v9801_v47, %v1680_v45  ;;  %v1695_v21 = vrot.slane %v6593_v46, 2  ;;  %v1697_v47 = vrot.slane %v6597_v42, 2  ;;  %v1700_v1 = vrot.slane %v6609_v50, 2 }
 0x158   : > { %v1702_v2 = vrot.slane %v6615_v29, 2  ;;  %v1705_v51 = vrot.slane %v6632_v11, 2  ;;  %v1707_v61 = vrot.slane %v6636_v19, 2  ;;  %v1710_v28 = vrot.slane %v6650_v38, 2 }
 0x159   : > { %v1712_v46 = vrot.slane %v6654_v3, 2  ;;  %v1683_v42 = vsel %vm1638_vm4, %v1680_v45, %v1682_v41  ;;  %v1714_v53 = vrot.slane %v6660_v27, 2  ;;  %v1715_v50 = vrot.slane %v6666_v54, 2 }
 0x15a   : > { %v1717_v29 = vrot.slane %v6670_v10, 2  ;;  %v9802_v14 = vrot.slane %v6551_v9, 2  ;;  %v1688_v19 = vsel %vm1638_vm4, %v1685_v31, %v1687_v57  ;;  %v9803_v17 = vrot.slane %v6569_v55, 2 }
 0x15b   : > { %v1693_v3 = vsel %vm1638_vm4, %v1690_v40, %v1692_v18  ;;  %v9804_v45 = vrot.slane %v6585_v24, 2  ;;  %v1698_v54 = vsel %vm1638_vm4, %v1695_v21, %v1697_v47  ;;  %v9805_v10 = vrot.slane %v6603_v39, 2 }
 0x15c   : > { %v1686_v11 = vsel %vm1638_vm4, %v9802_v14, %v1685_v31  ;;  %v1691_v38 = vsel %vm1638_vm4, %v9803_v17, %v1690_v40  ;;  %v1703_v14 = vsel %vm1638_vm4, %v1700_v1, %v1702_v2  ;;  %v9806_v31 = vrot.slane %v6626_v56, 2 }
 0x15d   : > { %v1696_v27 = vsel %vm1638_vm4, %v9804_v45, %v1695_v21  ;;  %v1701_v41 = vsel %vm1638_vm4, %v9805_v10, %v1700_v1  ;;  %v1708_v17 = vsel %vm1638_vm4, %v1705_v51, %v1707_v61  ;;  %v9807_v40 = vrot.slane %v6642_v34, 2 }
 0x15e   : > { %v1706_v57 = vsel %vm1638_vm4, %v9806_v31, %v1705_v51  ;;  %v1713_v45 = vsel %vm1638_vm4, %v1710_v28, %v1712_v46  ;;  %v1716_v21 = vsel %vm1638_vm4, %v1714_v53, %v1715_v50  ;;  %v1718_v47 = vsel %vm1638_vm4, %v1715_v50, %v1717_v29  ;;  %v9810_v50 = vld [vmem:[#allocation70_spill] sm:$0xff] }
 0x15f   : > { %v1711_v18 = vsel %vm1638_vm4, %v9807_v40, %v1710_v28  ;;  %v9808_v10 = vrot.slane %v6407_v26, 2  ;;  %v6792_v2 = vadd.f32 %v6678_v7, %v6207_v43  ;;  %v6796_v51 = vadd.f32 %v6681_v32, %v6210_v58  ;;  %v9815_v7 = vld [vmem:[#allocation71_spill] sm:$0xff]  ;;  %v9817_v58 = vld [vmem:[#allocation104_spill] sm:$0xff] }
 0x160   : > { %v9809_v28 = vrot.slane %v6427_v16, 2  ;;  %v6804_v46 = vadd.f32 %v1646_v48, %v6221_v62  ;;  %v6807_v26 = vadd.f32 %v1648_v25, %v9810_v50  ;;  %v9813_v29 = vrot.slane %v6441_v12, 2  ;;  %v9819_v16 = vld [vmem:[#allocation74_spill] sm:$0xff]  ;;  %v9822_v62 = vld [vmem:[#allocation105_spill] sm:$0xff]  ;;  %v9824_v25 = vld [vmem:[#allocation75_spill] sm:$0xff] }
 0x161   : > { %v6788_v1 = vadd.f32 %v9808_v10, %v6204_v6  ;;  %v9812_v6 = vld [vmem:[#allocation99_spill] sm:$0xff]  ;;  %v6815_v31 = vadd.f32 %v1651_v60, %v9815_v7  ;;  %v6818_v32 = vadd.f32 %v1653_v59, %v9817_v58  ;;  %v6826_v48 = vadd.f32 %v1656_v52, %v9822_v62  ;;  %v9829_v60 = vld [vmem:[#allocation78_spill] sm:$0xff]  ;;  %v9831_v59 = vld [vmem:[#allocation112_spill] sm:$0xff] }
 0x162   : > { %v6801_v61 = vadd.f32 %v9809_v28, %v6218_v0  ;;  %9811 = vst [vmem:[#allocation43_spill] sm:$0xff] %v6807_v26  ;;  %v6812_v43 = vadd.f32 %v9813_v29, %v9812_v6  ;;  %v9820_v0 = vrot.slane %v6453_v49, 2  ;;  %v6829_v10 = vadd.f32 %v1658_v33, %v9824_v25  ;;  %v9826_v12 = vld [vmem:[#allocation111_spill] sm:$0xff]  ;;  %v9836_v52 = vld [vmem:[#allocation84_spill] sm:$0xff]  ;;  %v9838_v33 = vld [vmem:[#allocation85_spill] sm:$0xff] }
 0x163   : > { %9816 = vst [vmem:[#allocation98_spill] sm:$0xff] %v6815_v31  ;;  %9818 = vst [vmem:[#allocation48_spill] sm:$0xff] %v6818_v32  ;;  %v9827_v28 = vrot.slane %v6469_v4, 2  ;;  %v6837_v6 = vadd.f32 %v1661_v8, %v9829_v60  ;;  %v6840_v29 = vadd.f32 %v1663_v22, %v9831_v59  ;;  %v9833_v49 = vld [vmem:[#allocation79_spill] sm:$0xff]  ;;  %v9834_v7 = vrot.slane %v6483_v37, 2  ;;  %v9840_v4 = vld [vmem:[#allocation90_spill] sm:$0xff] }
 0x164   : > { %9814 = vst [vmem:[#allocation46_spill] sm:$0xff] %v6812_v43  ;;  %v6823_v40 = vadd.f32 %v9820_v0, %v9819_v16  ;;  %9823 = vst [vmem:[#allocation51_spill] sm:$0xff] %v6826_v48  ;;  %v6848_v16 = vadd.f32 %v1666_v13, %v9836_v52  ;;  %v6851_v0 = vadd.f32 %v1668_v35, %v9838_v33  ;;  %v9841_v62 = vrot.slane %v6497_v20, 2  ;;  %v9843_v8 = vld [vmem:[#allocation91_spill] sm:$0xff]  ;;  %v9845_v22 = vld [vmem:[#allocation92_spill] sm:$0xff] }
 0x165   : > { %9825 = vst [vmem:[#allocation70_spill] sm:$0xff] %v6829_v10  ;;  %v6834_v50 = vadd.f32 %v9827_v28, %v9826_v12  ;;  %9830 = vst [vmem:[#allocation71_spill] sm:$0xff] %v6837_v6  ;;  %v6845_v58 = vadd.f32 %v9834_v7, %v9833_v49  ;;  %v6859_v12 = vadd.f32 %v1671_v5, %v9843_v8  ;;  %v9847_v37 = vld [vmem:[#allocation96_spill] sm:$0xff]  ;;  %v9848_v60 = vrot.slane %v6513_v63, 2  ;;  %v9850_v13 = vld [vmem:[#allocation97_spill] sm:$0xff] }
 0x166   : > { %9821 = vst [vmem:[#allocation49_spill] sm:$0xff] %v6823_v40  ;;  %9832 = vst [vmem:[#allocation104_spill] sm:$0xff] %v6840_v29  ;;  %v6856_v25 = vadd.f32 %v9841_v62, %v9840_v4  ;;  %v6862_v28 = vadd.f32 %v1673_v44, %v9845_v22  ;;  %v6870_v49 = vadd.f32 %v1676_v23, %v9850_v13  ;;  %v9852_v35 = vld [vmem:[#allocation102_spill] sm:$0xff]  ;;  %v9854_v20 = vld [vmem:[#allocation103_spill] sm:$0xff]  ;;  %v9855_v52 = vrot.slane %v6533_v36, 2 }
 0x167   : > { %9828 = vst [vmem:[#allocation99_spill] sm:$0xff] %v6834_v50  ;;  %9835 = vst [vmem:[#allocation74_spill] sm:$0xff] %v6845_v58  ;;  %v6867_v59 = vadd.f32 %v9848_v60, %v9847_v37  ;;  %v6873_v7 = vadd.f32 %v1678_v30, %v9852_v35  ;;  %v9857_v5 = vld [vmem:[#allocation36_spill] sm:$0xff]  ;;  %v9861_v63 = vld [vmem:[#allocation45_spill] sm:$0xff]  ;;  %v9862_v8 = vrot.slane %v6551_v9, 2  ;;  %v9869_v13 = vrot.slane %v6569_v55, 2 }
 0x168   : > { %9837 = vst [vmem:[#allocation105_spill] sm:$0xff] %v6848_v16  ;;  %9839 = vst [vmem:[#allocation75_spill] sm:$0xff] %v6851_v0  ;;  %v6878_v33 = vadd.f32 %v9855_v52, %v9854_v20  ;;  %v6882_v44 = vadd.f32 %v6734_v15, %v9857_v5  ;;  %v9859_v4 = vld [vmem:[#allocation44_spill] sm:$0xff]  ;;  %v9864_v22 = vld [vmem:[#allocation115_spill] sm:$0xff]  ;;  %v9876_v5 = vrot.slane %v6585_v24, 2 }
 0x169   : > { %9842 = vst [vmem:[#allocation111_spill] sm:$0xff] %v6856_v25  ;;  %9844 = vst [vmem:[#allocation78_spill] sm:$0xff] %v6859_v12  ;;  %v6885_v62 = vadd.f32 %v1683_v42, %v9859_v4  ;;  %v6890_v23 = vadd.f32 %v9862_v8, %v9861_v63  ;;  %v6893_v30 = vadd.f32 %v1686_v11, %v9864_v22  ;;  %v9866_v37 = vld [vmem:[#allocation116_spill] sm:$0xff]  ;;  %v9868_v36 = vld [vmem:[#allocation117_spill] sm:$0xff]  ;;  %v9883_v22 = vrot.slane %v6603_v39, 2 }
 0x16a   : > { %9846 = vst [vmem:[#allocation112_spill] sm:$0xff] %v6862_v28  ;;  %9849 = vst [vmem:[#allocation79_spill] sm:$0xff] %v6867_v59  ;;  %v6896_v60 = vadd.f32 %v1688_v19, %v9866_v37  ;;  %v6901_v35 = vadd.f32 %v9869_v13, %v9868_v36  ;;  %v9871_v15 = vld [vmem:[#allocation120_spill] sm:$0xff]  ;;  %v9873_v42 = vld [vmem:[#allocation121_spill] sm:$0xff] }
 0x16b   : > { %9851 = vst [vmem:[#allocation84_spill] sm:$0xff] %v6870_v49  ;;  %9853 = vst [vmem:[#allocation85_spill] sm:$0xff] %v6873_v7  ;;  %v6904_v20 = vadd.f32 %v1691_v38, %v9871_v15  ;;  %v6907_v52 = vadd.f32 %v1693_v3, %v9873_v42  ;;  %v9875_v9 = vld [vmem:[#allocation123_spill] sm:$0xff]  ;;  %v9878_v11 = vld [vmem:[#allocation124_spill] sm:$0xff]  ;;  %v9890_v15 = vrot.slane %v6626_v56, 2 }
 0x16c   : > { %9856 = vst [vmem:[#allocation90_spill] sm:$0xff] %v6878_v33  ;;  %9858 = vst [vmem:[#allocation91_spill] sm:$0xff] %v6882_v44  ;;  %v6912_v4 = vadd.f32 %v9876_v5, %v9875_v9  ;;  %v6915_v63 = vadd.f32 %v1696_v27, %v9878_v11  ;;  %v9880_v19 = vld [vmem:[#allocation125_spill] sm:$0xff]  ;;  %v9885_v38 = vld [vmem:[#allocation63_spill] sm:$0xff]  ;;  %v9897_v11 = vrot.slane %v6642_v34, 2 }
 0x16d   : > { %9860 = vst [vmem:[#allocation92_spill] sm:$0xff] %v6885_v62  ;;  %9863 = vst [vmem:[#allocation96_spill] sm:$0xff] %v6890_v23  ;;  %v6918_v8 = vadd.f32 %v1698_v54, %v9880_v19  ;;  %v9882_v55 = vld [vmem:[#allocation41_spill] sm:$0xff]  ;;  %v6926_v36 = vadd.f32 %v1701_v41, %v9885_v38  ;;  %v9887_v3 = vld [vmem:[#allocation67_spill] sm:$0xff] }
 0x16e   : > { %9865 = vst [vmem:[#allocation97_spill] sm:$0xff] %v6893_v30  ;;  %9867 = vst [vmem:[#allocation102_spill] sm:$0xff] %v6896_v60  ;;  %v6923_v37 = vadd.f32 %v9883_v22, %v9882_v55  ;;  %v6929_v13 = vadd.f32 %v1703_v14, %v9887_v3  ;;  %v9889_v24 = vld [vmem:[#allocation68_spill] sm:$0xff]  ;;  %v9894_v54 = vld [vmem:[#allocation81_spill] sm:$0xff] }
 0x16f   : > { %9870 = vst [vmem:[#allocation103_spill] sm:$0xff] %v6901_v35  ;;  %9872 = vst [vmem:[#allocation36_spill] sm:$0xff] %v6904_v20  ;;  %v6934_v42 = vadd.f32 %v9890_v15, %v9889_v24  ;;  %v9892_v27 = vld [vmem:[#allocation76_spill] sm:$0xff]  ;;  %v6940_v5 = vadd.f32 %v1708_v17, %v9894_v54  ;;  %v9896_v39 = vld [vmem:[#allocation82_spill] sm:$0xff] }
 0x170   : > { %9874 = vst [vmem:[#allocation44_spill] sm:$0xff] %v6907_v52  ;;  %9877 = vst [vmem:[#allocation45_spill] sm:$0xff] %v6912_v4  ;;  %v6937_v9 = vadd.f32 %v1706_v57, %v9892_v27  ;;  %v6945_v19 = vadd.f32 %v9897_v11, %v9896_v39  ;;  %v9899_v41 = vld [vmem:[#allocation88_spill] sm:$0xff]  ;;  %v9901_v14 = vld [vmem:[#allocation89_spill] sm:$0xff] }
 0x171   : > { %9879 = vst [vmem:[#allocation115_spill] sm:$0xff] %v6915_v63  ;;  %9881 = vst [vmem:[#allocation116_spill] sm:$0xff] %v6918_v8  ;;  %v6948_v55 = vadd.f32 %v1711_v18, %v9899_v41  ;;  %v6951_v22 = vadd.f32 %v1713_v45, %v9901_v14  ;;  %v9903_v56 = vld [vmem:[#allocation95_spill] sm:$0xff]  ;;  %v9905_v3 = vld [vmem:[#allocation100_spill] sm:$0xff] }
 0x172   : > { %9884 = vst [vmem:[#allocation117_spill] sm:$0xff] %v6923_v37  ;;  %9886 = vst [vmem:[#allocation120_spill] sm:$0xff] %v6926_v36  ;;  %v6954_v38 = vadd.f32 %v1714_v53, %v9903_v56  ;;  %v6957_v57 = vadd.f32 %v1716_v21, %v9905_v3  ;;  %v9907_v24 = vld [vmem:[#allocation106_spill] sm:$0xff]  ;;  %v9909_v15 = vld [vmem:[#allocation119_spill] sm:$0xff] }
 0x173   : > { %9888 = vst [vmem:[#allocation121_spill] sm:$0xff] %v6929_v13  ;;  %9891 = vst [vmem:[#allocation123_spill] sm:$0xff] %v6934_v42  ;;  %v6960_v17 = vadd.f32 %v1718_v47, %v9907_v24  ;;  %v9910_v27 = vld [vmem:[#allocation37_spill] sm:$0xff]  ;;  %v9911_v54 = vld [vmem:[#allocation47_spill] sm:$0xff] }
 0x174   : > { %9893 = vst [vmem:[#allocation124_spill] sm:$0xff] %v6937_v9  ;;  %9895 = vst [vmem:[#allocation125_spill] sm:$0xff] %v6940_v5  ;;  %v6964_v34 = vmul.f32 %v9910_v27, %v9909_v15  ;;  %v1820_v18 = vmul.f32 %v9911_v54, %v9909_v15  ;;  %v9912_v39 = vld [vmem:[#allocation109_spill] sm:$0xff]  ;;  %v9913_v11 = vld [vmem:[#allocation52_spill] sm:$0xff] }
 0x175   : > { %9898 = vst [vmem:[#allocation41_spill] sm:$0xff] %v6945_v19  ;;  %9900 = vst [vmem:[#allocation63_spill] sm:$0xff] %v6948_v55  ;;  %v1821_v45 = vmul.f32 %v9909_v15, %v9912_v39  ;;  %v6972_v53 = vmul.f32 %v9913_v11, %v9909_v15  ;;  %v9914_v21 = vld [vmem:[#allocation54_spill] sm:$0xff]  ;;  %v9916_v56 = vld [vmem:[#allocation55_spill] sm:$0xff] }
 0x176   : > { %9902 = vst [vmem:[#allocation67_spill] sm:$0xff] %v6951_v22  ;;  %9904 = vst [vmem:[#allocation68_spill] sm:$0xff] %v6954_v38  ;;  %v6976_v41 = vmul.f32 %v9914_v21, %v9909_v15  ;;  %v9915_v47 = vld [vmem:[#allocation58_spill] sm:$0xff]  ;;  %v6984_v3 = vmul.f32 %v9916_v56, %v9909_v15  ;;  %v9917_v24 = vld [vmem:[#allocation57_spill] sm:$0xff]  ;;  %v9958_v32 = vrot.slane %v6964_v34, 2 }
 0x177   : > { %9906 = vst [vmem:[#allocation76_spill] sm:$0xff] %v6957_v57  ;;  %9908 = vst [vmem:[#allocation81_spill] sm:$0xff] %v6960_v17  ;;  %v6980_v14 = vmul.f32 %v9909_v15, %v9915_v47  ;;  %v6988_v27 = vmul.f32 %v9917_v24, %v9909_v15  ;;  %v9918_v54 = vld [vmem:[#allocation73_spill] sm:$0xff]  ;;  %v9919_v11 = vld [vmem:[#allocation86_spill] sm:$0xff]  ;;  %v1918_v0 = vrot.slane %v1821_v45, 2 }
 0x178   : > { %v6992_v39 = vmul.f32 %v9909_v15, %v9918_v54  ;;  %v6996_v21 = vmul.f32 %v9919_v11, %v9909_v15  ;;  %v9920_v17 = vld [vmem:[#allocation65_spill] sm:$0xff]  ;;  %v9921_v57 = vld [vmem:[#allocation50_spill] sm:$0xff]  ;;  %v9922_v38 = vld [vmem:[#allocation87_spill] sm:$0xff] }
 0x179   : > { %v7000_v47 = vmul.f32 %v9920_v17, %v9909_v15  ;;  %v7004_v56 = vmul.f32 %v9909_v15, %v9921_v57  ;;  %v7008_v24 = vmul.f32 %v9922_v38, %v9909_v15  ;;  %v9923_v22 = vld [vmem:[#allocation66_spill] sm:$0xff]  ;;  %v9924_v55 = vld [vmem:[#allocation53_spill] sm:$0xff]  ;;  %v9926_v5 = vld [vmem:[#allocation64_spill] sm:$0xff]  ;;  %v1923_v40 = vrot.slane %v6980_v14, 2 }
 0x17a   : > { %v7012_v54 = vmul.f32 %v9923_v22, %v9909_v15  ;;  %v7016_v11 = vmul.f32 %v9909_v15, %v9924_v55  ;;  %v9925_v19 = vld [vmem:[#allocation93_spill] sm:$0xff]  ;;  %v7024_v57 = vmul.f32 %v9926_v5, %v9909_v15  ;;  %v9927_v9 = vld [vmem:[#allocation56_spill] sm:$0xff]  ;;  %v9929_v13 = vld [vmem:[#allocation94_spill] sm:$0xff]  ;;  %v1926_v43 = vrot.slane %v6988_v27, 2 }
 0x17b   : > { %v7020_v17 = vmul.f32 %v9925_v19, %v9909_v15  ;;  %v7028_v38 = vmul.f32 %v9909_v15, %v9927_v9  ;;  %v9928_v42 = vld [vmem:[#allocation72_spill] sm:$0xff]  ;;  %v7036_v55 = vmul.f32 %v9929_v13, %v9909_v15  ;;  %v9930_v36 = vld [vmem:[#allocation59_spill] sm:$0xff]  ;;  %v9931_v37 = vld [vmem:[#allocation101_spill] sm:$0xff]  ;;  %v1933_v14 = vrot.slane %v7004_v56, 2 }
 0x17c   : > { %v7032_v22 = vmul.f32 %v9928_v42, %v9909_v15  ;;  %v7040_v19 = vmul.f32 %v9909_v15, %v9930_v36  ;;  %v7044_v5 = vmul.f32 %v9931_v37, %v9909_v15  ;;  %v9932_v8 = vld [vmem:[#allocation108_spill] sm:$0xff]  ;;  %v9933_v63 = vld [vmem:[#allocation77_spill] sm:$0xff]  ;;  %v9934_v4 = vld [vmem:[#allocation126_spill] sm:$0xff]  ;;  %v1938_v26 = vrot.slane %v7016_v11, 2 }
 0x17d   : > { %v7048_v9 = vmul.f32 %v9932_v8, %v9909_v15  ;;  %v7052_v42 = vmul.f32 %v9909_v15, %v9933_v63  ;;  %v7056_v13 = vmul.f32 %v9934_v4, %v9909_v15  ;;  %v9935_v52 = vld [vmem:[#allocation129_spill] sm:$0xff]  ;;  %v9936_v20 = vld [vmem:[#allocation83_spill] sm:$0xff]  ;;  %v9938_v60 = vld [vmem:[#allocation132_spill] sm:$0xff]  ;;  %v1943_v27 = vrot.slane %v7028_v38, 2 }
 0x17e   : > { %v7060_v36 = vmul.f32 %v9935_v52, %v9909_v15  ;;  %v7064_v37 = vmul.f32 %v9909_v15, %v9936_v20  ;;  %v9937_v35 = vld [vmem:[#allocation131_spill] sm:$0xff]  ;;  %v7072_v63 = vmul.f32 %v9938_v60, %v9909_v15  ;;  %v9939_v30 = vld [vmem:[#allocation118_spill] sm:$0xff]  ;;  %v9940_v23 = vld [vmem:[#allocation133_spill] sm:$0xff]  ;;  %v1946_v48 = vrot.slane %v7036_v55, 2 }
 0x17f   : > { %v7068_v8 = vmul.f32 %v9937_v35, %v9909_v15  ;;  %v7076_v4 = vmul.f32 %v9909_v15, %v9939_v30  ;;  %v7080_v52 = vmul.f32 %v9940_v23, %v9909_v15  ;;  %v9941_v62 = vld [vmem:[#allocation135_spill] sm:$0xff]  ;;  %v9942_v44 = vld [vmem:[#allocation130_spill] sm:$0xff]  ;;  %v9943_v33 = vld [vmem:[#allocation136_spill] sm:$0xff]  ;;  %v9959_v11 = vrot.slane %v6972_v53, 2 }
 0x180   : > { %v7084_v20 = vmul.f32 %v9941_v62, %v9909_v15  ;;  %v7088_v35 = vmul.f32 %v9909_v15, %v9942_v44  ;;  %v7092_v60 = vmul.f32 %v9943_v33, %v9909_v15  ;;  %v9944_v7 = vld [vmem:[#allocation137_spill] sm:$0xff]  ;;  %v9945_v49 = vld [vmem:[#allocation134_spill] sm:$0xff]  ;;  %v9946_v59 = vld [vmem:[#allocation60_spill] sm:$0xff] }
 0x181   : > { %v7096_v30 = vmul.f32 %v9944_v7, %v9909_v15  ;;  %v7100_v23 = vmul.f32 %v9909_v15, %v9945_v49  ;;  %v7104_v62 = vmul.f32 %v9946_v59, %v9909_v15  ;;  %v9947_v28 = vld [vmem:[#allocation80_spill] sm:$0xff]  ;;  %v9948_v12 = vld [vmem:[#allocation138_spill] sm:$0xff]  ;;  %v1916_v7 = vrot.slane %v1820_v18, 2  ;;  %v9949_v16 = vld [vmem:[#allocation61_spill] sm:$0xff] }
 0x182   : > { %v7108_v44 = vmul.f32 %v9947_v28, %v9909_v15  ;;  %v7112_v33 = vmul.f32 %v9909_v15, %v9948_v12  ;;  %v7117_v49 = vmul.f32 %v9949_v16, %v9909_v15  ;;  %v9950_v58 = vld [vmem:[#allocation40_spill] sm:$0xff]  ;;  %v9951_v29 = vld [vmem:[#allocation139_spill] sm:$0xff]  ;;  %v9952_v6 = vld [vmem:[#allocation69_spill] sm:$0xff] }
 0x183   : > { %v7121_v59 = vmul.f32 %v9950_v58, %v9909_v15  ;;  %v7125_v28 = vmul.f32 %v9909_v15, %v9951_v29  ;;  %v7129_v12 = vmul.f32 %v9952_v6, %v9909_v15  ;;  %v7131_v50 = vld [vmem:[#allocation2 + $0x218] sm:$0x1]  ;;  %v9954_v18 = vld [vmem:[#allocation39_spill] sm:$0xff]  ;;  %v7141_v58 = vld [vmem:[#allocation2 + $0x208] sm:$0xff]  ;;  %v7166_v31 = vsel %vm1638_vm4, %v1916_v7, %v1918_v0 }
 0x184   : > { %9953 = vst [vmem:[#allocation82_spill] sm:$0xff] %v7131_v50  ;;  %v7135_v45 = vmul.f32 %v9954_v18, %v9909_v15  ;;  %v9955_v25 = vld [vmem:[#allocation38_spill] sm:$0xff]  ;;  %9956 = vst [vmem:[#allocation88_spill] sm:$0xff] %v7141_v58  ;;  %v7145_v29 = vmul.f32 %v7141_v58, %v9909_v15  ;;  %v7147_v10 = vld [vmem:[#allocation2 + $0x210] sm:$0xff]  ;;  %v7155_v18 = vmul.f32 %v9909_v15, %v7131_v50  ;;  %v1951_v50 = vrot.slane %v7048_v9, 2 }
 0x185   : > { %v7139_v16 = vmul.f32 %v9909_v15, %v9955_v25  ;;  %9957 = vst [vmem:[#allocation89_spill] sm:$0xff] %v7147_v10  ;;  %v7151_v6 = vmul.f32 %v7147_v10, %v9909_v15  ;;  %v1921_v25 = vrot.slane %v6976_v41, 2  ;;  %v7163_v58 = vsel %vm1638_vm4, %v9958_v32, %v1916_v7 }
 0x186   : > { %v9025_v10 = vrot.slane %v6984_v3, 2  ;;  %v1928_v15 = vrot.slane %v6992_v39, 2  ;;  %v1931_v41 = vrot.slane %v7000_v47, 2  ;;  %v1936_v32 = vrot.slane %v7012_v54, 2 }
 0x187   : > { %v1941_v7 = vrot.slane %v7024_v57, 2  ;;  %v1948_v47 = vrot.slane %v7040_v19, 2  ;;  %v1953_v54 = vrot.slane %v7052_v42, 2  ;;  %v1922_v0 = vsel %vm1638_vm4, %v9959_v11, %v1921_v25 }
 0x188   : > { %v1924_v57 = vsel %vm1638_vm4, %v1921_v25, %v1923_v40  ;;  %v1956_v39 = vrot.slane %v7060_v36, 2  ;;  %v1927_v19 = vsel %vm1638_vm4, %v9025_v10, %v1926_v43  ;;  %v1929_v55 = vsel %vm1638_vm4, %v1926_v43, %v1928_v15 }
 0x189   : > { %v9960_v9 = vrot.slane %v6996_v21, 2  ;;  %v1934_v56 = vsel %vm1638_vm4, %v1931_v41, %v1933_v14  ;;  %v9961_v11 = vrot.slane %v7008_v24, 2  ;;  %v1939_v25 = vsel %vm1638_vm4, %v1936_v32, %v1938_v26 }
 0x18a   : > { %v9962_v36 = vrot.slane %v7020_v17, 2  ;;  %v1944_v10 = vsel %vm1638_vm4, %v1941_v7, %v1943_v27  ;;  %v9963_v43 = vrot.slane %v7032_v22, 2  ;;  %v9965_v26 = vrot.slane %v7056_v13, 2 }
 0x18b   : > { %v1932_v42 = vsel %vm1638_vm4, %v9960_v9, %v1931_v41  ;;  %v1937_v40 = vsel %vm1638_vm4, %v9961_v11, %v1936_v32  ;;  %v1949_v9 = vsel %vm1638_vm4, %v1946_v48, %v1948_v47  ;;  %v9964_v41 = vrot.slane %v7044_v5, 2 }
 0x18c   : > { %v1942_v38 = vsel %vm1638_vm4, %v9962_v36, %v1941_v7  ;;  %v1947_v15 = vsel %vm1638_vm4, %v9963_v43, %v1946_v48  ;;  %v1954_v11 = vsel %vm1638_vm4, %v1951_v50, %v1953_v54  ;;  %v7219_v32 = vsel %vm1638_vm4, %v9965_v26, %v1956_v39 }
 0x18d   : > { %v1952_v14 = vsel %vm1638_vm4, %v9964_v41, %v1951_v50  ;;  %v1958_v36 = vrot.slane %v7064_v37, 2  ;;  %v1961_v27 = vrot.slane %v7072_v63, 2  ;;  %v1963_v43 = vrot.slane %v7076_v4, 2 }
 0x18e   : > { %v1966_v47 = vrot.slane %v7084_v20, 2  ;;  %v1968_v41 = vrot.slane %v7088_v35, 2  ;;  %v1971_v54 = vrot.slane %v7096_v30, 2  ;;  %v1973_v26 = vrot.slane %v7100_v23, 2 }
 0x18f   : > { %v1976_v7 = vrot.slane %v7108_v44, 2  ;;  %v1978_v63 = vrot.slane %v7112_v33, 2  ;;  %v1981_v48 = vrot.slane %v7121_v59, 2  ;;  %v1983_v20 = vrot.slane %v7125_v28, 2 }
 0x190   : > { %v1986_v50 = vrot.slane %v7135_v45, 2  ;;  %v1988_v30 = vrot.slane %v7139_v16, 2  ;;  %v1959_v23 = vsel %vm1638_vm4, %v1956_v39, %v1958_v36  ;;  %v1990_v37 = vrot.slane %v7145_v29, 2 }
 0x191   : > { %v1991_v44 = vrot.slane %v7151_v6, 2  ;;  %v1993_v33 = vrot.slane %v7155_v18, 2  ;;  %v9966_v4 = vrot.slane %v7068_v8, 2  ;;  %v1964_v28 = vsel %vm1638_vm4, %v1961_v27, %v1963_v43 }
 0x192   : > { %v9967_v35 = vrot.slane %v7080_v52, 2  ;;  %v1969_v16 = vsel %vm1638_vm4, %v1966_v47, %v1968_v41  ;;  %v9968_v39 = vrot.slane %v7092_v60, 2  ;;  %v1974_v6 = vsel %vm1638_vm4, %v1971_v54, %v1973_v26 }
 0x193   : > { %v1962_v59 = vsel %vm1638_vm4, %v9966_v4, %v1961_v27  ;;  %v9969_v18 = vrot.slane %v7104_v62, 2  ;;  %v1979_v4 = vsel %vm1638_vm4, %v1976_v7, %v1978_v63  ;;  %v9970_v27 = vrot.slane %v7117_v49, 2 }
 0x194   : > { %v1967_v45 = vsel %vm1638_vm4, %v9967_v35, %v1966_v47  ;;  %v1972_v29 = vsel %vm1638_vm4, %v9968_v39, %v1971_v54  ;;  %v1984_v35 = vsel %vm1638_vm4, %v1981_v48, %v1983_v20  ;;  %v9971_v47 = vrot.slane %v7129_v12, 2 }
 0x195   : > { %v1977_v36 = vsel %vm1638_vm4, %v9969_v18, %v1976_v7  ;;  %v1982_v43 = vsel %vm1638_vm4, %v9970_v27, %v1981_v48  ;;  %v1989_v39 = vsel %vm1638_vm4, %v1986_v50, %v1988_v30  ;;  %v1992_v54 = vsel %vm1638_vm4, %v1990_v37, %v1991_v44 }
 0x196   : > { %v1987_v41 = vsel %vm1638_vm4, %v9971_v47, %v1986_v50  ;;  %v1994_v26 = vsel %vm1638_vm4, %v1991_v44, %v1993_v33  ;;  %v9972_v18 = vrot.slane %v6964_v34, 2  ;;  %v7277_v63 = vadd.f32 %v7163_v58, %v6792_v2  ;;  %v9974_v44 = vld [vmem:[#allocation43_spill] sm:$0xff]  ;;  %v9979_v58 = vld [vmem:[#allocation98_spill] sm:$0xff] }
 0x197   : > { %v7281_v48 = vadd.f32 %v7166_v31, %v6796_v51  ;;  %v9973_v50 = vrot.slane %v6972_v53, 2  ;;  %v7289_v30 = vadd.f32 %v1922_v0, %v6804_v46  ;;  %v7292_v34 = vadd.f32 %v1924_v57, %v9974_v44  ;;  %v9981_v51 = vld [vmem:[#allocation48_spill] sm:$0xff]  ;;  %v9983_v53 = vld [vmem:[#allocation49_spill] sm:$0xff]  ;;  %v9986_v46 = vld [vmem:[#allocation51_spill] sm:$0xff] }
 0x198   : > { %v7273_v7 = vadd.f32 %v9972_v18, %v6788_v1  ;;  %v9976_v1 = vld [vmem:[#allocation46_spill] sm:$0xff]  ;;  %v9977_v33 = vrot.slane %v6984_v3, 2  ;;  %v7300_v27 = vadd.f32 %v1927_v19, %v9979_v58  ;;  %v7303_v31 = vadd.f32 %v1929_v55, %v9981_v51  ;;  %v9990_v3 = vld [vmem:[#allocation99_spill] sm:$0xff]  ;;  %v9995_v55 = vld [vmem:[#allocation104_spill] sm:$0xff] }
 0x199   : > { %v7286_v20 = vadd.f32 %v9973_v50, %v6801_v61  ;;  %9975 = vst [vmem:[#allocation95_spill] sm:$0xff] %v7292_v34  ;;  %v9984_v61 = vrot.slane %v6996_v21, 2  ;;  %v7311_v0 = vadd.f32 %v1932_v42, %v9986_v46  ;;  %v9988_v57 = vld [vmem:[#allocation70_spill] sm:$0xff]  ;;  %v9991_v50 = vrot.slane %v7008_v24, 2  ;;  %v9993_v19 = vld [vmem:[#allocation71_spill] sm:$0xff]  ;;  %v10000_v42 = vld [vmem:[#allocation105_spill] sm:$0xff] }
 0x19a   : > { %v7297_v2 = vadd.f32 %v9977_v33, %v9976_v1  ;;  %9980 = vst [vmem:[#allocation106_spill] sm:$0xff] %v7300_v27  ;;  %9982 = vst [vmem:[#allocation119_spill] sm:$0xff] %v7303_v31  ;;  %v7314_v18 = vadd.f32 %v1934_v56, %v9988_v57  ;;  %v7322_v1 = vadd.f32 %v1937_v40, %v9993_v19  ;;  %v9997_v21 = vld [vmem:[#allocation74_spill] sm:$0xff]  ;;  %v9998_v58 = vrot.slane %v7020_v17, 2  ;;  %v10002_v56 = vld [vmem:[#allocation75_spill] sm:$0xff] }
 0x19b   : > { %v7308_v47 = vadd.f32 %v9984_v61, %v9983_v53  ;;  %9987 = vst [vmem:[#allocation47_spill] sm:$0xff] %v7311_v0  ;;  %v7319_v44 = vadd.f32 %v9991_v50, %v9990_v3  ;;  %v7325_v33 = vadd.f32 %v1939_v25, %v9995_v55  ;;  %v7333_v53 = vadd.f32 %v1942_v38, %v10000_v42  ;;  %v10004_v24 = vld [vmem:[#allocation111_spill] sm:$0xff]  ;;  %v10007_v40 = vld [vmem:[#allocation78_spill] sm:$0xff]  ;;  %v10009_v25 = vld [vmem:[#allocation112_spill] sm:$0xff] }
 0x19c   : > { %9978 = vst [vmem:[#allocation100_spill] sm:$0xff] %v7297_v2  ;;  %9989 = vst [vmem:[#allocation109_spill] sm:$0xff] %v7314_v18  ;;  %v7330_v51 = vadd.f32 %v9998_v58, %v9997_v21  ;;  %v7336_v61 = vadd.f32 %v1944_v10, %v10002_v56  ;;  %v10005_v46 = vrot.slane %v7032_v22, 2  ;;  %v7344_v3 = vadd.f32 %v1947_v15, %v10007_v40  ;;  %v10011_v17 = vld [vmem:[#allocation79_spill] sm:$0xff]  ;;  %v10014_v38 = vld [vmem:[#allocation84_spill] sm:$0xff] }
 0x19d   : > { %9985 = vst [vmem:[#allocation37_spill] sm:$0xff] %v7308_v47  ;;  %9992 = vst [vmem:[#allocation52_spill] sm:$0xff] %v7319_v44  ;;  %v7347_v50 = vadd.f32 %v1949_v9, %v10009_v25  ;;  %v10012_v19 = vrot.slane %v7044_v5, 2  ;;  %v7355_v21 = vadd.f32 %v1952_v14, %v10014_v38  ;;  %v10016_v10 = vld [vmem:[#allocation85_spill] sm:$0xff]  ;;  %v10018_v22 = vld [vmem:[#allocation90_spill] sm:$0xff]  ;;  %v10019_v42 = vrot.slane %v7056_v13, 2 }
 0x19e   : > { %9994 = vst [vmem:[#allocation54_spill] sm:$0xff] %v7322_v1  ;;  %9996 = vst [vmem:[#allocation58_spill] sm:$0xff] %v7325_v33  ;;  %v7341_v57 = vadd.f32 %v10005_v46, %v10004_v24  ;;  %v7358_v58 = vadd.f32 %v1954_v11, %v10016_v10  ;;  %v10021_v15 = vld [vmem:[#allocation91_spill] sm:$0xff]  ;;  %v10023_v24 = vld [vmem:[#allocation92_spill] sm:$0xff]  ;;  %v10026_v40 = vrot.slane %v7068_v8, 2  ;;  %v10033_v38 = vrot.slane %v7080_v52, 2 }
 0x19f   : > { %9999 = vst [vmem:[#allocation55_spill] sm:$0xff] %v7330_v51  ;;  %10001 = vst [vmem:[#allocation57_spill] sm:$0xff] %v7333_v53  ;;  %v7352_v55 = vadd.f32 %v10012_v19, %v10011_v17  ;;  %v7363_v56 = vadd.f32 %v10019_v42, %v10018_v22  ;;  %v7367_v9 = vadd.f32 %v7219_v32, %v10021_v15  ;;  %v10025_v5 = vld [vmem:[#allocation96_spill] sm:$0xff]  ;;  %v10028_v25 = vld [vmem:[#allocation97_spill] sm:$0xff]  ;;  %v10040_v15 = vrot.slane %v7092_v60, 2 }
 0x1a0   : > { %10003 = vst [vmem:[#allocation73_spill] sm:$0xff] %v7336_v61  ;;  %10006 = vst [vmem:[#allocation86_spill] sm:$0xff] %v7341_v57  ;;  %v7370_v46 = vadd.f32 %v1959_v23, %v10023_v24  ;;  %v7375_v14 = vadd.f32 %v10026_v40, %v10025_v5  ;;  %v7378_v11 = vadd.f32 %v1962_v59, %v10028_v25  ;;  %v10030_v17 = vld [vmem:[#allocation102_spill] sm:$0xff]  ;;  %v10032_v13 = vld [vmem:[#allocation103_spill] sm:$0xff]  ;;  %v10047_v25 = vrot.slane %v7104_v62, 2 }
 0x1a1   : > { %10008 = vst [vmem:[#allocation65_spill] sm:$0xff] %v7344_v3  ;;  %10010 = vst [vmem:[#allocation43_spill] sm:$0xff] %v7347_v50  ;;  %v7381_v19 = vadd.f32 %v1964_v28, %v10030_v17  ;;  %v7386_v10 = vadd.f32 %v10033_v38, %v10032_v13  ;;  %v10035_v32 = vld [vmem:[#allocation36_spill] sm:$0xff]  ;;  %v10039_v8 = vld [vmem:[#allocation45_spill] sm:$0xff] }
 0x1a2   : > { %10013 = vst [vmem:[#allocation46_spill] sm:$0xff] %v7352_v55  ;;  %10015 = vst [vmem:[#allocation98_spill] sm:$0xff] %v7355_v21  ;;  %v7389_v22 = vadd.f32 %v1967_v45, %v10035_v32  ;;  %v10037_v23 = vld [vmem:[#allocation44_spill] sm:$0xff]  ;;  %v7397_v24 = vadd.f32 %v10040_v15, %v10039_v8  ;;  %v10042_v59 = vld [vmem:[#allocation115_spill] sm:$0xff]  ;;  %v10054_v32 = vrot.slane %v7117_v49, 2 }
 0x1a3   : > { %10017 = vst [vmem:[#allocation48_spill] sm:$0xff] %v7358_v58  ;;  %10020 = vst [vmem:[#allocation49_spill] sm:$0xff] %v7363_v56  ;;  %v7392_v42 = vadd.f32 %v1969_v16, %v10037_v23  ;;  %v7400_v5 = vadd.f32 %v1972_v29, %v10042_v59  ;;  %v10044_v28 = vld [vmem:[#allocation116_spill] sm:$0xff]  ;;  %v10046_v52 = vld [vmem:[#allocation117_spill] sm:$0xff]  ;;  %v10061_v59 = vrot.slane %v7129_v12, 2 }
 0x1a4   : > { %10022 = vst [vmem:[#allocation51_spill] sm:$0xff] %v7367_v9  ;;  %10024 = vst [vmem:[#allocation70_spill] sm:$0xff] %v7370_v46  ;;  %v7403_v40 = vadd.f32 %v1974_v6, %v10044_v28  ;;  %v7408_v17 = vadd.f32 %v10047_v25, %v10046_v52  ;;  %v10049_v45 = vld [vmem:[#allocation120_spill] sm:$0xff]  ;;  %v10051_v16 = vld [vmem:[#allocation121_spill] sm:$0xff] }
 0x1a5   : > { %10027 = vst [vmem:[#allocation99_spill] sm:$0xff] %v7375_v14  ;;  %10029 = vst [vmem:[#allocation71_spill] sm:$0xff] %v7378_v11  ;;  %v7411_v13 = vadd.f32 %v1977_v36, %v10049_v45  ;;  %v7414_v38 = vadd.f32 %v1979_v4, %v10051_v16  ;;  %v10053_v60 = vld [vmem:[#allocation123_spill] sm:$0xff]  ;;  %v10056_v29 = vld [vmem:[#allocation124_spill] sm:$0xff] }
 0x1a6   : > { %10031 = vst [vmem:[#allocation104_spill] sm:$0xff] %v7381_v19  ;;  %10034 = vst [vmem:[#allocation74_spill] sm:$0xff] %v7386_v10  ;;  %v7419_v23 = vadd.f32 %v10054_v32, %v10053_v60  ;;  %v7422_v8 = vadd.f32 %v1982_v43, %v10056_v29  ;;  %v10058_v6 = vld [vmem:[#allocation125_spill] sm:$0xff]  ;;  %v10063_v36 = vld [vmem:[#allocation63_spill] sm:$0xff] }
 0x1a7   : > { %10036 = vst [vmem:[#allocation105_spill] sm:$0xff] %v7389_v22  ;;  %10038 = vst [vmem:[#allocation75_spill] sm:$0xff] %v7392_v42  ;;  %v7425_v15 = vadd.f32 %v1984_v35, %v10058_v6  ;;  %v10060_v62 = vld [vmem:[#allocation41_spill] sm:$0xff]  ;;  %v7433_v52 = vadd.f32 %v1987_v41, %v10063_v36  ;;  %v10065_v4 = vld [vmem:[#allocation67_spill] sm:$0xff] }
 0x1a8   : > { %10041 = vst [vmem:[#allocation111_spill] sm:$0xff] %v7397_v24  ;;  %10043 = vst [vmem:[#allocation78_spill] sm:$0xff] %v7400_v5  ;;  %v7430_v28 = vadd.f32 %v10061_v59, %v10060_v62  ;;  %v7436_v25 = vadd.f32 %v1989_v39, %v10065_v4  ;;  %v10067_v49 = vld [vmem:[#allocation68_spill] sm:$0xff]  ;;  %v10071_v60 = vld [vmem:[#allocation81_spill] sm:$0xff] }
 0x1a9   : > { %10045 = vst [vmem:[#allocation112_spill] sm:$0xff] %v7403_v40  ;;  %10048 = vst [vmem:[#allocation79_spill] sm:$0xff] %v7408_v17  ;;  %v7439_v45 = vadd.f32 %v1990_v37, %v10067_v49  ;;  %v10069_v16 = vld [vmem:[#allocation76_spill] sm:$0xff]  ;;  %v7445_v35 = vadd.f32 %v1994_v26, %v10071_v60  ;;  %v10073_v32 = vld [vmem:[#allocation50_spill] sm:$0xff] }
 0x1aa   : > { %10050 = vst [vmem:[#allocation84_spill] sm:$0xff] %v7411_v13  ;;  %10052 = vst [vmem:[#allocation85_spill] sm:$0xff] %v7414_v38  ;;  %v7442_v43 = vadd.f32 %v1992_v54, %v10069_v16  ;;  %v10074_v29 = vld [vmem:[#allocation62_spill] sm:$0xff]  ;;  %v10075_v6 = vld [vmem:[#allocation87_spill] sm:$0xff] }
 0x1ab   : > { %10055 = vst [vmem:[#allocation90_spill] sm:$0xff] %v7419_v23  ;;  %10057 = vst [vmem:[#allocation91_spill] sm:$0xff] %v7422_v8  ;;  %v7449_v12 = vmul.f32 %v10074_v29, %v10073_v32  ;;  %v7453_v41 = vmul.f32 %v10075_v6, %v10074_v29  ;;  %v10076_v39 = vld [vmem:[#allocation66_spill] sm:$0xff]  ;;  %v10077_v37 = vld [vmem:[#allocation53_spill] sm:$0xff] }
 0x1ac   : > { %10059 = vst [vmem:[#allocation92_spill] sm:$0xff] %v7425_v15  ;;  %10062 = vst [vmem:[#allocation96_spill] sm:$0xff] %v7430_v28  ;;  %v7457_v62 = vmul.f32 %v10076_v39, %v10074_v29  ;;  %v7461_v59 = vmul.f32 %v10074_v29, %v10077_v37  ;;  %v10078_v54 = vld [vmem:[#allocation93_spill] sm:$0xff]  ;;  %v10079_v36 = vld [vmem:[#allocation64_spill] sm:$0xff] }
 0x1ad   : > { %10064 = vst [vmem:[#allocation97_spill] sm:$0xff] %v7433_v52  ;;  %10066 = vst [vmem:[#allocation102_spill] sm:$0xff] %v7436_v25  ;;  %v7465_v26 = vmul.f32 %v10078_v54, %v10074_v29  ;;  %v7469_v4 = vmul.f32 %v10079_v36, %v10074_v29  ;;  %v10080_v49 = vld [vmem:[#allocation56_spill] sm:$0xff]  ;;  %v10082_v6 = vld [vmem:[#allocation94_spill] sm:$0xff] }
 0x1ae   : > { %10068 = vst [vmem:[#allocation103_spill] sm:$0xff] %v7439_v45  ;;  %10070 = vst [vmem:[#allocation36_spill] sm:$0xff] %v7442_v43  ;;  %v7473_v16 = vmul.f32 %v10074_v29, %v10080_v49  ;;  %v10081_v60 = vld [vmem:[#allocation72_spill] sm:$0xff]  ;;  %v7481_v39 = vmul.f32 %v10082_v6, %v10074_v29  ;;  %v10083_v37 = vld [vmem:[#allocation59_spill] sm:$0xff] }
 0x1af   : > { %10072 = vst [vmem:[#allocation44_spill] sm:$0xff] %v7445_v35  ;;  %v7477_v32 = vmul.f32 %v10081_v60, %v10074_v29  ;;  %v7485_v54 = vmul.f32 %v10074_v29, %v10083_v37  ;;  %v10084_v35 = vld [vmem:[#allocation101_spill] sm:$0xff]  ;;  %v10085_v43 = vld [vmem:[#allocation108_spill] sm:$0xff]  ;;  %v10087_v25 = vld [vmem:[#allocation126_spill] sm:$0xff] }
 0x1b0   : > { %v7489_v36 = vmul.f32 %v10084_v35, %v10074_v29  ;;  %v7493_v49 = vmul.f32 %v10085_v43, %v10074_v29  ;;  %v10086_v45 = vld [vmem:[#allocation77_spill] sm:$0xff]  ;;  %v7501_v6 = vmul.f32 %v10087_v25, %v10074_v29  ;;  %v10089_v28 = vld [vmem:[#allocation83_spill] sm:$0xff]  ;;  %v10091_v8 = vld [vmem:[#allocation132_spill] sm:$0xff]  ;;  %v2214_v34 = vrot.slane %v7473_v16, 2 }
 0x1b1   : > { %v7497_v60 = vmul.f32 %v10074_v29, %v10086_v45  ;;  %v10088_v52 = vld [vmem:[#allocation129_spill] sm:$0xff]  ;;  %v7509_v35 = vmul.f32 %v10074_v29, %v10089_v28  ;;  %v10090_v15 = vld [vmem:[#allocation131_spill] sm:$0xff]  ;;  %v7517_v45 = vmul.f32 %v10091_v8, %v10074_v29  ;;  %v10092_v23 = vld [vmem:[#allocation118_spill] sm:$0xff]  ;;  %v2217_v27 = vrot.slane %v7481_v39, 2 }
 0x1b2   : > { %v7505_v37 = vmul.f32 %v10088_v52, %v10074_v29  ;;  %v7513_v43 = vmul.f32 %v10090_v15, %v10074_v29  ;;  %v7521_v25 = vmul.f32 %v10074_v29, %v10092_v23  ;;  %v10093_v38 = vld [vmem:[#allocation133_spill] sm:$0xff]  ;;  %v10094_v13 = vld [vmem:[#allocation135_spill] sm:$0xff]  ;;  %v10095_v17 = vld [vmem:[#allocation130_spill] sm:$0xff] }
 0x1b3   : > { %v7525_v52 = vmul.f32 %v10093_v38, %v10074_v29  ;;  %v7529_v28 = vmul.f32 %v10094_v13, %v10074_v29  ;;  %v7533_v15 = vmul.f32 %v10074_v29, %v10095_v17  ;;  %v10096_v40 = vld [vmem:[#allocation136_spill] sm:$0xff]  ;;  %v10097_v5 = vld [vmem:[#allocation137_spill] sm:$0xff]  ;;  %v10098_v24 = vld [vmem:[#allocation134_spill] sm:$0xff]  ;;  %v2229_v16 = vrot.slane %v7509_v35, 2 }
 0x1b4   : > { %v7537_v8 = vmul.f32 %v10096_v40, %v10074_v29  ;;  %v7541_v23 = vmul.f32 %v10097_v5, %v10074_v29  ;;  %v7545_v38 = vmul.f32 %v10074_v29, %v10098_v24  ;;  %v10099_v42 = vld [vmem:[#allocation60_spill] sm:$0xff]  ;;  %v598_v22 = vld [vmem:[#allocation2 + $0x238] sm:$0x1]  ;;  %v10102_v5 = vld [vmem:[#allocation61_spill] sm:$0xff]  ;;  %v10125_v35 = vrot.slane %v7465_v26, 2 }
 0x1b5   : > { %v7549_v13 = vmul.f32 %v10099_v42, %v10074_v29  ;;  %v10100_v17 = vld [vmem:[#allocation80_spill] sm:$0xff]  ;;  %v10101_v19 = vld [vmem:[#allocation138_spill] sm:$0xff]  ;;  %v7561_v11 = vmul.f32 %v10102_v5, %v10074_v29  ;;  %v10104_v46 = vld [vmem:[#allocation139_spill] sm:$0xff]  ;;  %v7604_v51 = vmul.f32 %v10074_v29, %v598_v22  ;;  %v2204_v22 = vrot.slane %v7449_v12, 2 }
 0x1b6   : > { %v7553_v10 = vmul.f32 %v10100_v17, %v10074_v29  ;;  %v7557_v40 = vmul.f32 %v10074_v29, %v10101_v19  ;;  %v10103_v24 = vld [vmem:[#allocation40_spill] sm:$0xff]  ;;  %v7569_v42 = vmul.f32 %v10074_v29, %v10104_v46  ;;  %v10105_v9 = vld [vmem:[#allocation69_spill] sm:$0xff]  ;;  %v10106_v56 = vld [vmem:[#allocation107_spill] sm:$0xff] }
 0x1b7   : > { %v7565_v14 = vmul.f32 %v10103_v24, %v10074_v29  ;;  %v7573_v17 = vmul.f32 %v10105_v9, %v10074_v29  ;;  %v10107_v19 = vld [vmem:[#allocation113_spill] sm:$0xff]  ;;  %v10108_v55 = vld [vmem:[#allocation39_spill] sm:$0xff]  ;;  %v10109_v50 = vld [vmem:[#allocation38_spill] sm:$0xff]  ;;  %10114 = vst [vmem:[#allocation115_spill] sm:$0xff] %v7604_v51  ;;  %v10119_v47 = vrot.slane %v10106_v56, 2  ;;  %v10153_v51 = vrot.slane %v7477_v32, 2 }
 0x1b8   : > { %v2192_v21 = vrot.slane %v10107_v19, 2  ;;  %v7579_v5 = vmul.f32 %v10108_v55, %v10074_v29  ;;  %v7583_v24 = vmul.f32 %v10074_v29, %v10109_v50  ;;  %v10110_v3 = vld [vmem:[#allocation88_spill] sm:$0xff]  ;;  %v10112_v57 = vld [vmem:[#allocation89_spill] sm:$0xff]  ;;  %v10113_v61 = vld [vmem:[#allocation82_spill] sm:$0xff] }
 0x1b9   : > { %v7587_v46 = vmul.f32 %v10110_v3, %v10074_v29  ;;  %v7591_v9 = vmul.f32 %v10112_v57, %v10074_v29  ;;  %v7595_v58 = vmul.f32 %v10074_v29, %v10113_v61  ;;  %v4077_v19 = vld [vmem:[#allocation2 + $0x228] sm:$0xff]  ;;  %v4078_v53 = vld [vmem:[#allocation2 + $0x230] sm:$0xff]  ;;  %v10115_v3 = vld [vmem:[#allocation114_spill] sm:$0xff]  ;;  %v2209_v57 = vrot.slane %v7461_v59, 2 }
 0x1ba   : > { %v7598_v55 = vmul.f32 %v4077_v19, %v10074_v29  ;;  %v7601_v50 = vmul.f32 %v4078_v53, %v10074_v29  ;;  %v2194_v33 = vrot.slane %v10115_v3, 2  ;;  %v10116_v1 = vld [vmem:[#allocation122_spill] sm:$0xff]  ;;  %v10117_v44 = vld [vmem:[#allocation127_spill] sm:$0xff]  ;;  %v10118_v0 = vld [vmem:[#allocation128_spill] sm:$0xff]  ;;  %v7613_v19 = vsel %vm1638_vm4, %v10119_v47, %v2192_v21 }
 0x1bb   : > { %10111 = vst [vmem:[#allocation45_spill] sm:$0xff] %v7587_v46  ;;  %v2197_v18 = vrot.slane %v10117_v44, 2  ;;  %v2199_v61 = vrot.slane %v10118_v0, 2  ;;  %v10120_v31 = vld [vmem:[#allocation110_spill] sm:$0xff]  ;;  %v2207_v3 = vrot.slane %v7457_v62, 2  ;;  %v2212_v0 = vrot.slane %v7469_v4, 2 }
 0x1bc   : > { %v10121_v53 = vld [vmem:[#allocation42_spill] sm:$0xff]  ;;  %v2222_v29 = vrot.slane %v7493_v49, 2  ;;  %v2224_v62 = vrot.slane %v7497_v60, 2  ;;  %v2195_v59 = vsel %vm1638_vm4, %v2192_v21, %v2194_v33  ;;  %v2227_v4 = vrot.slane %v7505_v37, 2 }
 0x1bd   : > { %v2202_v2 = vrot.slane %v10121_v53, 2  ;;  %v2219_v53 = vrot.slane %v7485_v54, 2  ;;  %v10122_v47 = vrot.slane %v10116_v1, 2  ;;  %v2200_v54 = vsel %vm1638_vm4, %v2197_v18, %v2199_v61 }
 0x1be   : > { %v10123_v12 = vrot.slane %v10120_v31, 2  ;;  %v10124_v33 = vrot.slane %v7453_v41, 2  ;;  %v2210_v37 = vsel %vm1638_vm4, %v2207_v3, %v2209_v57  ;;  %v2213_v44 = vsel %vm1638_vm4, %v10125_v35, %v2212_v0 }
 0x1bf   : > { %v2198_v39 = vsel %vm1638_vm4, %v10122_v47, %v2197_v18  ;;  %v2205_v60 = vsel %vm1638_vm4, %v2202_v2, %v2204_v22  ;;  %v2215_v47 = vsel %vm1638_vm4, %v2212_v0, %v2214_v34  ;;  %v10126_v18 = vrot.slane %v7477_v32, 2  ;;  %v10160_v32 = vld [vmem:[#allocation46_spill] sm:$0xff] }
 0x1c0   : > { %v2203_v49 = vsel %vm1638_vm4, %v10123_v12, %v2202_v2  ;;  %v2208_v21 = vsel %vm1638_vm4, %v10124_v33, %v2207_v3  ;;  %v2220_v12 = vsel %vm1638_vm4, %v2217_v27, %v2219_v53  ;;  %v10127_v2 = vrot.slane %v7489_v36, 2 }
 0x1c1   : > { %v2218_v61 = vsel %vm1638_vm4, %v10126_v18, %v2217_v27  ;;  %v7660_v33 = vsel %vm1638_vm4, %v2222_v29, %v2224_v62  ;;  %v10128_v57 = vrot.slane %v7501_v6, 2  ;;  %v7668_v34 = vsel %vm1638_vm4, %v2227_v4, %v2229_v16 }
 0x1c2   : > { %v7657_v22 = vsel %vm1638_vm4, %v10127_v2, %v2222_v29  ;;  %v9026_v0 = vrot.slane %v7513_v43, 2  ;;  %v2232_v27 = vrot.slane %v7517_v45, 2  ;;  %v2234_v53 = vrot.slane %v7521_v25, 2 }
 0x1c3   : > { %v7665_v3 = vsel %vm1638_vm4, %v10128_v57, %v2227_v4  ;;  %v2237_v18 = vrot.slane %v7529_v28, 2  ;;  %v2239_v29 = vrot.slane %v7533_v15, 2  ;;  %v2242_v2 = vrot.slane %v7541_v23, 2 }
 0x1c4   : > { %v2244_v57 = vrot.slane %v7545_v38, 2  ;;  %v2247_v16 = vrot.slane %v7553_v10, 2  ;;  %v2249_v45 = vrot.slane %v7557_v40, 2  ;;  %v2252_v35 = vrot.slane %v7565_v14, 2 }
 0x1c5   : > { %v2254_v28 = vrot.slane %v7569_v42, 2  ;;  %v2257_v62 = vrot.slane %v7579_v5, 2  ;;  %v2259_v23 = vrot.slane %v7583_v24, 2  ;;  %v2233_v38 = vsel %vm1638_vm4, %v9026_v0, %v2232_v27 }
 0x1c6   : > { %v2262_v40 = vrot.slane %v7591_v9, 2  ;;  %v2264_v25 = vrot.slane %v7595_v58, 2  ;;  %v2235_v14 = vsel %vm1638_vm4, %v2232_v27, %v2234_v53  ;;  %v10129_v42 = vrot.slane %v7525_v52, 2 }
 0x1c7   : > { %v2240_v5 = vsel %vm1638_vm4, %v2237_v18, %v2239_v29  ;;  %v10130_v24 = vrot.slane %v7537_v8, 2  ;;  %v2245_v0 = vsel %vm1638_vm4, %v2242_v2, %v2244_v57  ;;  %v10131_v10 = vrot.slane %v7549_v13, 2 }
 0x1c8   : > { %v2238_v15 = vsel %vm1638_vm4, %v10129_v42, %v2237_v18  ;;  %v2250_v58 = vsel %vm1638_vm4, %v2247_v16, %v2249_v45  ;;  %v10132_v27 = vrot.slane %v7561_v11, 2  ;;  %v7713_v42 = vsel %vm1638_vm4, %v2252_v35, %v2254_v28 }
 0x1c9   : > { %v2243_v4 = vsel %vm1638_vm4, %v10130_v24, %v2242_v2  ;;  %v2248_v9 = vsel %vm1638_vm4, %v10131_v10, %v2247_v16  ;;  %v10133_v18 = vrot.slane %v7573_v17, 2  ;;  %v7721_v2 = vsel %vm1638_vm4, %v2257_v62, %v2259_v23 }
 0x1ca   : > { %v7710_v53 = vsel %vm1638_vm4, %v10132_v27, %v2252_v35  ;;  %v10134_v16 = vrot.slane %v7587_v46, 2  ;;  %v7730_v10 = vsel %vm1638_vm4, %v2262_v40, %v2264_v25  ;;  %v10137_v24 = vrot.slane %v10106_v56, 2  ;;  %v10140_v35 = vld [vmem:[#allocation100_spill] sm:$0xff] }
 0x1cb   : > { %v7718_v29 = vsel %vm1638_vm4, %v10133_v18, %v2257_v62  ;;  %10136 = vst [vmem:[#allocation117_spill] sm:$0xff] %v7730_v10  ;;  %v2320_v62 = vadd.f32 %v7613_v19, %v7277_v63  ;;  %v2321_v23 = vadd.f32 %v2195_v59, %v7281_v48  ;;  %v10138_v18 = vrot.slane %v10116_v1, 2  ;;  %v10143_v63 = vld [vmem:[#allocation119_spill] sm:$0xff]  ;;  %v10144_v19 = vld [vmem:[#allocation37_spill] sm:$0xff] }
 0x1cc   : > { %v7727_v45 = vsel %vm1638_vm4, %v10134_v16, %v2262_v40  ;;  %v2319_v27 = vadd.f32 %v10137_v24, %v7273_v7  ;;  %v2323_v25 = vadd.f32 %v2198_v39, %v7289_v30  ;;  %v10139_v40 = vld [vmem:[#allocation95_spill] sm:$0xff]  ;;  %v10141_v28 = vrot.slane %v10120_v31, 2  ;;  %v10147_v39 = vld [vmem:[#allocation109_spill] sm:$0xff]  ;;  %v10148_v24 = vld [vmem:[#allocation52_spill] sm:$0xff] }
 0x1cd   : > { %10135 = vst [vmem:[#allocation116_spill] sm:$0xff] %v7727_v45  ;;  %v2322_v16 = vadd.f32 %v10138_v18, %v7286_v20  ;;  %v2324_v57 = vadd.f32 %v2200_v54, %v10139_v40  ;;  %v10142_v45 = vld [vmem:[#allocation106_spill] sm:$0xff]  ;;  %v7752_v7 = vld [vmem:[%s8790_s2] ss:$0 sm:$0xff]  ;;  %v2327_v48 = vadd.f32 %v2205_v60, %v10143_v63  ;;  %v10145_v20 = vrot.slane %v7453_v41, 2  ;;  %v10154_v63 = vld [vmem:[#allocation57_spill] sm:$0xff] }
 0x1ce   : > { %v2325_v10 = vadd.f32 %v10141_v28, %v10140_v35  ;;  %v2326_v56 = vadd.f32 %v2203_v49, %v10142_v45  ;;  %v10146_v30 = vld [vmem:[#allocation47_spill] sm:$0xff]  ;;  %v2330_v54 = vadd.f32 %v2210_v37, %v10147_v39  ;;  %v10149_v31 = vrot.slane %v7465_v26, 2  ;;  %v10150_v49 = vld [vmem:[#allocation54_spill] sm:$0xff]  ;;  %v10155_v41 = vld [vmem:[#allocation73_spill] sm:$0xff] }
 0x1cf   : > { %v2328_v1 = vadd.f32 %v10145_v20, %v10144_v19  ;;  %v2329_v59 = vadd.f32 %v2208_v21, %v10146_v30  ;;  %v2332_v45 = vadd.f32 %v2213_v44, %v10150_v49  ;;  %v10151_v28 = vld [vmem:[#allocation58_spill] sm:$0xff]  ;;  %v10152_v40 = vld [vmem:[#allocation55_spill] sm:$0xff]  ;;  %v7769_v46 = vadd.f32 %v2218_v61, %v10154_v63  ;;  %v10158_v44 = vld [vmem:[#allocation65_spill] sm:$0xff] }
 0x1d0   : > { %v2331_v35 = vadd.f32 %v10149_v31, %v10148_v24  ;;  %v2333_v18 = vadd.f32 %v2215_v47, %v10151_v28  ;;  %v2334_v60 = vadd.f32 %v10153_v51, %v10152_v40  ;;  %v7772_v19 = vadd.f32 %v2220_v12, %v10155_v41  ;;  %v10156_v21 = vld [vmem:[#allocation86_spill] sm:$0xff]  ;;  %v10159_v30 = vld [vmem:[#allocation43_spill] sm:$0xff]  ;;  %v10163_v24 = vld [vmem:[#allocation48_spill] sm:$0xff] }
 0x1d1   : > { %v10157_v37 = vrot.slane %v7489_v36, 2  ;;  %v2374_v26 = vmul.f32 %v7752_v7, %v2319_v27  ;;  %v7782_v47 = vadd.f32 %v7657_v22, %v10158_v44  ;;  %v7786_v51 = vadd.f32 %v7660_v33, %v10159_v30  ;;  %v7797_v36 = vld [vmem:[%s8791_s3] ss:$0 sm:$0xff]  ;;  %v10162_v27 = vld [vmem:[#allocation98_spill] sm:$0xff]  ;;  %v10164_v31 = vld [vmem:[#allocation49_spill] sm:$0xff] }
 0x1d2   : > { %v10161_v61 = vrot.slane %v7501_v6, 2  ;;  %v2375_v39 = vmul.f32 %v7752_v7, %v2320_v62  ;;  %v7801_v22 = vadd.f32 %v7665_v3, %v10162_v27  ;;  %v7805_v33 = vadd.f32 %v7668_v34, %v10163_v24  ;;  %v10166_v28 = vld [vmem:[#allocation51_spill] sm:$0xff]  ;;  %v10167_v63 = vld [vmem:[#allocation70_spill] sm:$0xff] }
 0x1d3   : > { %v7777_v20 = vadd.f32 %v10157_v37, %v10156_v21  ;;  %v10165_v6 = vrot.slane %v7513_v43, 2  ;;  %v2376_v62 = vmul.f32 %v7752_v7, %v2321_v23  ;;  %v7814_v40 = vadd.f32 %v2233_v38, %v10166_v28  ;;  %v10168_v21 = vld [vmem:[#allocation99_spill] sm:$0xff]  ;;  %v10171_v43 = vld [vmem:[#allocation104_spill] sm:$0xff] }
 0x1d4   : > { %v7791_v12 = vadd.f32 %v10161_v61, %v10160_v32  ;;  %v7817_v41 = vadd.f32 %v2235_v14, %v10167_v63  ;;  %v10169_v3 = vrot.slane %v7525_v52, 2  ;;  %v2377_v34 = vmul.f32 %v7752_v7, %v2322_v16  ;;  %v10170_v44 = vld [vmem:[#allocation71_spill] sm:$0xff]  ;;  %v10172_v14 = vld [vmem:[#allocation74_spill] sm:$0xff]  ;;  %v10174_v52 = vld [vmem:[#allocation105_spill] sm:$0xff] }
 0x1d5   : > { %v7810_v49 = vadd.f32 %v10165_v6, %v10164_v31  ;;  %v7826_v30 = vadd.f32 %v2238_v15, %v10170_v44  ;;  %v7829_v32 = vadd.f32 %v2240_v5, %v10171_v43  ;;  %v2378_v23 = vmul.f32 %v7752_v7, %v2323_v25  ;;  %v10175_v5 = vld [vmem:[#allocation75_spill] sm:$0xff]  ;;  %v10182_v43 = vld [vmem:[#allocation84_spill] sm:$0xff] }
 0x1d6   : > { %v7822_v37 = vadd.f32 %v10169_v3, %v10168_v21  ;;  %v7833_v38 = vadd.f32 %v7797_v36, %v2374_v26  ;;  %v10173_v61 = vrot.slane %v7537_v8, 2  ;;  %v7841_v24 = vadd.f32 %v2243_v4, %v10174_v52  ;;  %v10176_v25 = vld [vmem:[#allocation111_spill] sm:$0xff]  ;;  %v10178_v4 = vld [vmem:[#allocation78_spill] sm:$0xff] }
 0x1d7   : > { %v2379_v16 = vmul.f32 %v7752_v7, %v2324_v57  ;;  %v7845_v15 = vadd.f32 %v7797_v36, %v2375_v39  ;;  %v7848_v31 = vadd.f32 %v2245_v0, %v10175_v5  ;;  %v10177_v26 = vrot.slane %v7549_v13, 2  ;;  %v10179_v57 = vld [vmem:[#allocation112_spill] sm:$0xff]  ;;  %v10180_v3 = vld [vmem:[#allocation79_spill] sm:$0xff] }
 0x1d8   : > { %v7838_v27 = vadd.f32 %v10173_v61, %v10172_v14  ;;  %v2380_v8 = vmul.f32 %v7752_v7, %v2325_v10  ;;  %v7857_v28 = vadd.f32 %v7797_v36, %v2376_v62  ;;  %v7860_v63 = vadd.f32 %v2248_v9, %v10178_v4  ;;  %v10183_v14 = vld [vmem:[#allocation85_spill] sm:$0xff] }
 0x1d9   : > { %v7853_v6 = vadd.f32 %v10177_v26, %v10176_v25  ;;  %v7863_v21 = vadd.f32 %v2250_v58, %v10179_v57  ;;  %v2381_v39 = vmul.f32 %v7752_v7, %v2326_v56  ;;  %v7867_v0 = vadd.f32 %v7797_v36, %v2377_v34 }
 0x1da   : > { %v10181_v13 = vrot.slane %v7561_v11, 2  ;;  %v2382_v10 = vmul.f32 %v7752_v7, %v2327_v48  ;;  %v7876_v62 = vadd.f32 %v7797_v36, %v2378_v23  ;;  %v3688_v9 = vmul.f32 -1.442695, %v7833_v38 }
 0x1db   : > { %v7881_v58 = vadd.f32 %v7710_v53, %v10182_v43  ;;  %v2383_v56 = vmul.f32 %v7752_v7, %v2328_v1  ;;  %v7885_v34 = vadd.f32 %v7797_v36, %v2379_v16  ;;  %v3689_v11 = vmul.f32 -1.442695, %v7845_v15  ;;  %v10184_v53 = vld [vmem:[#allocation90_spill] sm:$0xff] }
 0x1dc   : > { %v7872_v44 = vadd.f32 %v10181_v13, %v10180_v3  ;;  %v7890_v61 = vadd.f32 %v7713_v42, %v10183_v14  ;;  %v2384_v48 = vmul.f32 %v7752_v7, %v2329_v59  ;;  %v7894_v23 = vadd.f32 %v7797_v36, %v2380_v8 }
 0x1dd   : > { %v3690_v52 = vmul.f32 -1.442695, %v7857_v28  ;;  %v10185_v5 = vrot.slane %v7573_v17, 2  ;;  %v2385_v16 = vmul.f32 %v7752_v7, %v2330_v54  ;;  %v7904_v25 = vadd.f32 %v7797_v36, %v2381_v39 }
 0x1de   : > { %v3691_v42 = vmul.f32 -1.442695, %v7867_v0  ;;  %v2386_v26 = vmul.f32 %v7752_v7, %v2331_v35  ;;  %v7909_v59 = vadd.f32 %v7797_v36, %v2382_v10  ;;  %3842 = vpow2.f32 %v3688_v9 }
 0x1df   : > { %v7900_v1 = vadd.f32 %v10185_v5, %v10184_v53  ;;  %v3692_v8 = vmul.f32 -1.442695, %v7876_v62  ;;  %v2387_v4 = vmul.f32 %v7752_v7, %v2332_v45  ;;  %v7914_v17 = vadd.f32 %v7797_v36, %v2383_v56 }
 0x1e0   : > { %3844 = vpow2.f32 %v3689_v11  ;;  %v3693_v54 = vmul.f32 -1.442695, %v7885_v34  ;;  %v2388_v57 = vmul.f32 %v7752_v7, %v2333_v18  ;;  %v7919_v39 = vadd.f32 %v7797_v36, %v2384_v48 }
 0x1e1   : > { %3846 = vpow2.f32 %v3690_v52  ;;  %v3694_v35 = vmul.f32 -1.442695, %v7894_v23  ;;  %v2389_v3 = vmul.f32 %v7752_v7, %v2334_v60  ;;  %v7924_v13 = vadd.f32 %v7797_v36, %v2385_v16 }
 0x1e2   : > { %3848 = vpow2.f32 %v3691_v42  ;;  %v3695_v45 = vmul.f32 -1.442695, %v7904_v25  ;;  %v2390_v10 = vmul.f32 %v7752_v7, %v7769_v46  ;;  %v7930_v9 = vadd.f32 %v7797_v36, %v2386_v26 }
 0x1e3   : > { %3850 = vpow2.f32 %v3692_v8  ;;  %v3696_v18 = vmul.f32 -1.442695, %v7909_v59  ;;  %v2391_v43 = vmul.f32 %v7752_v7, %v7772_v19  ;;  %v7936_v60 = vadd.f32 %v7797_v36, %v2387_v4 }
 0x1e4   : > { %3852 = vpow2.f32 %v3693_v54  ;;  %v3697_v56 = vmul.f32 -1.442695, %v7914_v17  ;;  %v2392_v11 = vmul.f32 %v7752_v7, %v7777_v20  ;;  %v7942_v46 = vadd.f32 %v7797_v36, %v2388_v57 }
 0x1e5   : > { %10186 = vst [vmem:[#allocation120_spill] sm:$0xff] %v7936_v60  ;;  %3854 = vpow2.f32 %v3694_v35  ;;  %v3698_v14 = vmul.f32 -1.442695, %v7919_v39  ;;  %v2393_v48 = vmul.f32 %v7752_v7, %v7782_v47  ;;  %v7948_v19 = vadd.f32 %v7797_v36, %v2389_v3 }
 0x1e6   : > { %10187 = vst [vmem:[#allocation121_spill] sm:$0xff] %v7942_v46  ;;  %3856 = vpow2.f32 %v3695_v45  ;;  %v3699_v52 = vmul.f32 -1.442695, %v7924_v13  ;;  %v2394_v53 = vmul.f32 %v7752_v7, %v7786_v51  ;;  %v7954_v20 = vadd.f32 %v7797_v36, %v2390_v10 }
 0x1e7   : > { %10188 = vst [vmem:[#allocation123_spill] sm:$0xff] %v7948_v19  ;;  %3858 = vpow2.f32 %v3696_v18  ;;  %v3700_v5 = vmul.f32 -1.442695, %v7930_v9  ;;  %v2395_v16 = vmul.f32 %v7752_v7, %v7791_v12  ;;  %v7960_v47 = vadd.f32 %v7797_v36, %v2391_v43 }
 0x1e8   : > { %10189 = vst [vmem:[#allocation124_spill] sm:$0xff] %v7954_v20  ;;  %3860 = vpow2.f32 %v3697_v56  ;;  %v3701_v42 = vmul.f32 -1.442695, %v7936_v60  ;;  %v2396_v26 = vmul.f32 %v7752_v7, %v7801_v22  ;;  %v7966_v51 = vadd.f32 %v7797_v36, %v2392_v11 }
 0x1e9   : > { %10190 = vst [vmem:[#allocation125_spill] sm:$0xff] %v7960_v47  ;;  %3862 = vpow2.f32 %v3698_v14  ;;  %v3702_v8 = vmul.f32 -1.442695, %v7942_v46  ;;  %v2397_v4 = vmul.f32 %v7752_v7, %v7805_v33  ;;  %v7972_v12 = vadd.f32 %v7797_v36, %v2393_v48 }
 0x1ea   : > { %10191 = vst [vmem:[#allocation41_spill] sm:$0xff] %v7966_v51  ;;  %3864 = vpow2.f32 %v3699_v52  ;;  %v3703_v54 = vmul.f32 -1.442695, %v7948_v19  ;;  %v2398_v57 = vmul.f32 %v7752_v7, %v7810_v49  ;;  %v7978_v22 = vadd.f32 %v7797_v36, %v2394_v53 }
 0x1eb   : > { %10192 = vst [vmem:[#allocation63_spill] sm:$0xff] %v7972_v12  ;;  %3866 = vpow2.f32 %v3700_v5  ;;  %v3704_v35 = vmul.f32 -1.442695, %v7954_v20  ;;  %v7981_v3 = vpop.eup %3842  ;;  %v2399_v33 = vmul.f32 %v7752_v7, %v7814_v40  ;;  %v7986_v45 = vadd.f32 %v7797_v36, %v2395_v16  ;;  %v10221_v20 = vld [vmem:[#allocation116_spill] sm:$0xff] }
 0x1ec   : > { %10193 = vst [vmem:[#allocation67_spill] sm:$0xff] %v7978_v22  ;;  %3868 = vpow2.f32 %v3701_v42  ;;  %v3705_v10 = vmul.f32 -1.442695, %v7960_v47  ;;  %v2400_v49 = vmul.f32 %v7752_v7, %v7817_v41  ;;  %v7994_v43 = vadd.f32 %v7797_v36, %v2396_v26 }
 0x1ed   : > { %10194 = vst [vmem:[#allocation68_spill] sm:$0xff] %v7986_v45  ;;  %v7989_v18 = vpop.eup %3844  ;;  %3870 = vpow2.f32 %v3702_v8  ;;  %v3706_v56 = vmul.f32 -1.442695, %v7966_v51  ;;  %v2401_v40 = vmul.f32 %v7752_v7, %v7822_v37  ;;  %v8002_v14 = vadd.f32 %v7797_v36, %v2397_v4 }
 0x1ee   : > { %10195 = vst [vmem:[#allocation76_spill] sm:$0xff] %v7994_v43  ;;  %v7997_v11 = vpop.eup %3846  ;;  %3872 = vpow2.f32 %v3703_v54  ;;  %v3707_v48 = vmul.f32 -1.442695, %v7972_v12  ;;  %v2402_v41 = vmul.f32 %v7752_v7, %v7826_v30  ;;  %v8010_v53 = vadd.f32 %v7797_v36, %v2398_v57 }
 0x1ef   : > { %10196 = vst [vmem:[#allocation81_spill] sm:$0xff] %v8002_v14  ;;  %v8005_v52 = vpop.eup %3848  ;;  %3874 = vpow2.f32 %v3704_v35  ;;  %v3708_v5 = vmul.f32 -1.442695, %v7978_v22  ;;  %v2403_v37 = vmul.f32 %v7752_v7, %v7829_v32  ;;  %v8018_v42 = vadd.f32 %v7797_v36, %v2399_v33 }
 0x1f0   : > { %10197 = vst [vmem:[#allocation50_spill] sm:$0xff] %v8010_v53  ;;  %v8013_v16 = vpop.eup %3850  ;;  %3876 = vpow2.f32 %v3705_v10  ;;  %v3709_v26 = vmul.f32 -1.442695, %v7986_v45  ;;  %v2404_v30 = vmul.f32 %v7752_v7, %v7838_v27  ;;  %v8026_v4 = vadd.f32 %v7797_v36, %v2400_v49 }
 0x1f1   : > { %10198 = vst [vmem:[#allocation62_spill] sm:$0xff] %v8018_v42  ;;  %v8021_v8 = vpop.eup %3852  ;;  %3878 = vpow2.f32 %v3706_v56  ;;  %v3710_v54 = vmul.f32 -1.442695, %v7994_v43  ;;  %v2405_v32 = vmul.f32 %v7752_v7, %v7841_v24  ;;  %v8034_v35 = vadd.f32 %v7797_v36, %v2401_v40 }
 0x1f2   : > { %10199 = vst [vmem:[#allocation87_spill] sm:$0xff] %v8026_v4  ;;  %v8029_v57 = vpop.eup %3854  ;;  %3880 = vpow2.f32 %v3707_v48  ;;  %v3711_v33 = vmul.f32 -1.442695, %v8002_v14  ;;  %v2406_v27 = vmul.f32 %v7752_v7, %v7848_v31  ;;  %v8042_v49 = vadd.f32 %v7797_v36, %v2402_v41 }
 0x1f3   : > { %10200 = vst [vmem:[#allocation66_spill] sm:$0xff] %v8034_v35  ;;  %v8037_v10 = vpop.eup %3856  ;;  %3882 = vpow2.f32 %v3708_v5  ;;  %v3712_v56 = vmul.f32 -1.442695, %v8010_v53  ;;  %v2407_v24 = vmul.f32 %v7752_v7, %v7853_v6  ;;  %v8050_v40 = vadd.f32 %v7797_v36, %v2403_v37 }
 0x1f4   : > { %10201 = vst [vmem:[#allocation53_spill] sm:$0xff] %v8042_v49  ;;  %v8045_v43 = vpop.eup %3858  ;;  %3884 = vpow2.f32 %v3709_v26  ;;  %v3713_v48 = vmul.f32 -1.442695, %v8018_v42  ;;  %v2408_v31 = vmul.f32 %v7752_v7, %v7860_v63  ;;  %v8058_v41 = vadd.f32 %v7797_v36, %v2404_v30 }
 0x1f5   : > { %10202 = vst [vmem:[#allocation93_spill] sm:$0xff] %v8050_v40  ;;  %v8053_v14 = vpop.eup %3860  ;;  %3886 = vpow2.f32 %v3710_v54  ;;  %v3714_v5 = vmul.f32 -1.442695, %v8026_v4  ;;  %v2409_v6 = vmul.f32 %v7752_v7, %v7863_v21  ;;  %v8066_v37 = vadd.f32 %v7797_v36, %v2405_v32 }
 0x1f6   : > { %10203 = vst [vmem:[#allocation64_spill] sm:$0xff] %v8058_v41  ;;  %v8061_v53 = vpop.eup %3862  ;;  %3888 = vpow2.f32 %v3711_v33  ;;  %v3715_v26 = vmul.f32 -1.442695, %v8034_v35  ;;  %v2410_v63 = vmul.f32 %v7752_v7, %v7872_v44  ;;  %v8074_v30 = vadd.f32 %v7797_v36, %v2406_v27 }
 0x1f7   : > { %10204 = vst [vmem:[#allocation56_spill] sm:$0xff] %v8066_v37  ;;  %v8069_v42 = vpop.eup %3864  ;;  %3890 = vpow2.f32 %v3712_v56  ;;  %v3716_v54 = vmul.f32 -1.442695, %v8042_v49  ;;  %v2411_v21 = vmul.f32 %v7752_v7, %v7881_v58  ;;  %v8082_v32 = vadd.f32 %v7797_v36, %v2407_v24  ;;  %v10208_v58 = vld [vmem:[#allocation91_spill] sm:$0xff] }
 0x1f8   : > { %10205 = vst [vmem:[#allocation72_spill] sm:$0xff] %v8074_v30  ;;  %v8077_v4 = vpop.eup %3866  ;;  %3892 = vpow2.f32 %v3713_v48  ;;  %v3717_v33 = vmul.f32 -1.442695, %v8050_v40  ;;  %v2412_v44 = vmul.f32 %v7752_v7, %v7890_v61  ;;  %v8090_v27 = vadd.f32 %v7797_v36, %v2408_v31 }
 0x1f9   : > { %10206 = vst [vmem:[#allocation94_spill] sm:$0xff] %v8082_v32  ;;  %v8085_v35 = vpop.eup %3868  ;;  %3894 = vpow2.f32 %v3714_v5  ;;  %v3718_v56 = vmul.f32 -1.442695, %v8058_v41  ;;  %v2359_v24 = vadd.f32 %v7718_v29, %v10208_v58  ;;  %v8098_v48 = vadd.f32 %v7797_v36, %v2409_v6  ;;  %v10212_v6 = vld [vmem:[#allocation92_spill] sm:$0xff] }
 0x1fa   : > { %10207 = vst [vmem:[#allocation59_spill] sm:$0xff] %v8090_v27  ;;  %v8093_v49 = vpop.eup %3870  ;;  %3896 = vpow2.f32 %v3715_v26  ;;  %v3719_v40 = vmul.f32 -1.442695, %v8066_v37  ;;  %v10210_v61 = vrot.slane %v7601_v50, 2  ;;  %v10211_v31 = vrot.slane %v7598_v55, 2 }
 0x1fb   : > { %10209 = vst [vmem:[#allocation101_spill] sm:$0xff] %v8098_v48  ;;  %v8101_v45 = vpop.eup %3872  ;;  %v8109_v41 = vadd.f32 %v7797_v36, %v2410_v63  ;;  %3898 = vpow2.f32 %v3716_v54  ;;  %v3720_v29 = vmul.f32 -1.442695, %v8074_v30  ;;  %v2360_v26 = vadd.f32 %v7721_v2, %v10212_v6  ;;  %v10214_v2 = vld [vmem:[#allocation96_spill] sm:$0xff]  ;;  %v10215_v6 = vld [vmem:[#allocation45_spill] sm:$0xff] }
 0x1fc   : > { %v2268_v5 = vsel %vm1638_vm4, %v10211_v31, %v10210_v61  ;;  %v8112_v58 = vpop.eup %3874  ;;  %v8117_v37 = vadd.f32 %v7797_v36, %v2411_v21  ;;  %3900 = vpow2.f32 %v3717_v33  ;;  %v3721_v22 = vmul.f32 -1.442695, %v8082_v32 }
 0x1fd   : > { %v8120_v12 = vpop.eup %3876  ;;  %v2413_v63 = vmul.f32 %v7752_v7, %v7900_v1  ;;  %v8125_v54 = vadd.f32 %v7797_v36, %v2412_v44  ;;  %3902 = vpow2.f32 %v3718_v56  ;;  %v3722_v61 = vmul.f32 -1.442695, %v8090_v27  ;;  %v10217_v1 = vld [vmem:[#allocation115_spill] sm:$0xff]  ;;  %v10220_v27 = vld [vmem:[#allocation97_spill] sm:$0xff] }
 0x1fe   : > { %v8128_v31 = vpop.eup %3878  ;;  %v10216_v21 = vrot.slane %v10215_v6, 2  ;;  %v2414_v33 = vmul.f32 %v7752_v7, %v2359_v24  ;;  %3904 = vpow2.f32 %v3719_v40  ;;  %v3723_v32 = vmul.f32 -1.442695, %v8098_v48  ;;  %v10222_v24 = vld [vmem:[#allocation102_spill] sm:$0xff]  ;;  %v10223_v40 = vld [vmem:[#allocation117_spill] sm:$0xff]  ;;  %v10224_v48 = vld [vmem:[#allocation103_spill] sm:$0xff] }
 0x1ff   : > { %10213 = vst [vmem:[#allocation108_spill] sm:$0xff] %v8125_v54  ;;  %v8135_v51 = vpop.eup %3880  ;;  %v10218_v47 = vrot.slane %v10217_v1, 2  ;;  %v10219_v44 = vrot.slane %v7601_v50, 2  ;;  %v2362_v19 = vadd.f32 %v10221_v20, %v10220_v27  ;;  %3906 = vpow2.f32 %v3720_v29 }
 0x200   : > { %v2361_v30 = vadd.f32 %v10216_v21, %v10214_v2  ;;  %v3724_v6 = vmul.f32 -1.442695, %v8109_v41  ;;  %v8145_v2 = vpop.eup %3882  ;;  %v2363_v21 = vadd.f32 %v10223_v40, %v10222_v24  ;;  %v10225_v46 = vrot.slane %v7598_v55, 2  ;;  %v10227_v24 = vld [vmem:[#allocation44_spill] sm:$0xff] }
 0x201   : > { %v2270_v56 = vsel %vm1638_vm4, %v10219_v44, %v10218_v47  ;;  %3908 = vpow2.f32 %v3721_v22  ;;  %v3725_v50 = vmul.f32 -1.442695, %v8117_v37  ;;  %v8153_v1 = vpop.eup %3884  ;;  %v2415_v47 = vmul.f32 %v7752_v7, %v2360_v26 }
 0x202   : > { %v2364_v60 = vadd.f32 %v10225_v46, %v10224_v48  ;;  %v8157_v20 = vadd.f32 %v7797_v36, %v2413_v63  ;;  %3910 = vpow2.f32 %v3722_v61  ;;  %v3726_v27 = vmul.f32 -1.442695, %v8125_v54  ;;  %v8160_v29 = vpop.eup %3886  ;;  %v10226_v48 = vld [vmem:[#allocation36_spill] sm:$0xff] }
 0x203   : > { %v2416_v44 = vmul.f32 %v7752_v7, %v2361_v30  ;;  %v8164_v55 = vadd.f32 %v7797_v36, %v2414_v33  ;;  %3912 = vpow2.f32 %v3723_v32  ;;  %v2621_v46 = vadd.f32 1.0, %v7981_v3  ;;  %v8167_v22 = vpop.eup %3888 }
 0x204   : > { %v2365_v26 = vadd.f32 %v2268_v5, %v10226_v48  ;;  %3914 = vpow2.f32 %v3724_v6  ;;  %v2622_v63 = vadd.f32 1.0, %v7989_v18  ;;  %v8171_v61 = vpop.eup %3890  ;;  %v2366_v40 = vadd.f32 %v2270_v56, %v10227_v24 }
 0x205   : > { %v2417_v54 = vmul.f32 %v7752_v7, %v2362_v19  ;;  %3916 = vpow2.f32 %v3725_v50  ;;  %v2623_v30 = vadd.f32 1.0, %v7997_v11  ;;  %v8176_v33 = vpop.eup %3892  ;;  %v2418_v3 = vmul.f32 %v7752_v7, %v2363_v21 }
 0x206   : > { %v8180_v32 = vadd.f32 %v7797_v36, %v2415_v47  ;;  %3918 = vpow2.f32 %v3726_v27  ;;  %v3727_v5 = vmul.f32 -1.442695, %v8157_v20  ;;  %v8183_v18 = vpop.eup %3894  ;;  %v2419_v6 = vmul.f32 %v7752_v7, %v2364_v60 }
 0x207   : > { %v8187_v56 = vadd.f32 %v7797_v36, %v2416_v44  ;;  %v3728_v19 = vmul.f32 -1.442695, %v8164_v55  ;;  %3920 = vrcp.f32 %v2621_v46  ;;  %v8190_v11 = vpop.eup %3896  ;;  %v2624_v21 = vadd.f32 1.0, %v8005_v52 }
 0x208   : > { %3922 = vrcp.f32 %v2622_v63  ;;  %v8193_v50 = vpop.eup %3898  ;;  %v8196_v47 = vadd.f32 %v7797_v36, %v2417_v54  ;;  %v2625_v27 = vadd.f32 1.0, %v8013_v16  ;;  %v2420_v44 = vmul.f32 %v7752_v7, %v2365_v26 }
 0x209   : > { %10228 = vst [vmem:[#allocation77_spill] sm:$0xff] %v8187_v56  ;;  %3924 = vrcp.f32 %v2623_v30  ;;  %v8199_v60 = vpop.eup %3900  ;;  %v8203_v48 = vadd.f32 %v7797_v36, %v2418_v3  ;;  %v3729_v46 = vmul.f32 -1.442695, %v8180_v32  ;;  %v2421_v63 = vmul.f32 %v7752_v7, %v2366_v40 }
 0x20a   : > { %10229 = vst [vmem:[#allocation126_spill] sm:$0xff] %v8196_v47  ;;  %3926 = vpow2.f32 %v3727_v5  ;;  %v8206_v52 = vpop.eup %3902  ;;  %v8210_v54 = vadd.f32 %v7797_v36, %v2419_v6  ;;  %v3730_v16 = vmul.f32 -1.442695, %v8187_v56  ;;  %v2626_v26 = vadd.f32 1.0, %v8021_v8 }
 0x20b   : > { %10230 = vst [vmem:[#allocation129_spill] sm:$0xff] %v8203_v48  ;;  %3928 = vpow2.f32 %v3728_v19  ;;  %v8213_v24 = vpop.eup %3904  ;;  %v3731_v3 = vmul.f32 -1.442695, %v8196_v47  ;;  %v8222_v7 = vadd.f32 %v7797_v36, %v2420_v44  ;;  %v3732_v40 = vmul.f32 -1.442695, %v8203_v48 }
 0x20c   : > { %10231 = vst [vmem:[#allocation83_spill] sm:$0xff] %v8210_v54  ;;  %3930 = vrcp.f32 %v2624_v21  ;;  %v8216_v30 = vpop.eup %3906  ;;  %v8228_v19 = vadd.f32 %v7797_v36, %v2421_v63  ;;  %v3733_v8 = vmul.f32 -1.442695, %v8210_v54  ;;  %v2628_v44 = vadd.f32 1.0, %v8037_v10 }
 0x20d   : > { %3932 = vrcp.f32 %v2625_v27  ;;  %10232 = vst [vmem:[#allocation131_spill] sm:$0xff] %v8222_v7  ;;  %v2627_v27 = vadd.f32 1.0, %v8029_v57  ;;  %v3734_v48 = vmul.f32 -1.442695, %v8222_v7  ;;  %v2629_v54 = vadd.f32 1.0, %v8045_v43 }
 0x20e   : > { %v8219_v5 = vpop.eup %3908  ;;  %3934 = vpow2.f32 %v3729_v46  ;;  %10233 = vst [vmem:[#allocation132_spill] sm:$0xff] %v8228_v19  ;;  %v3735_v63 = vmul.f32 -1.442695, %v8228_v19  ;;  %v2631_v10 = vadd.f32 1.0, %v8061_v53  ;;  %v2632_v7 = vadd.f32 1.0, %v8069_v42 }
 0x20f   : > { %v8225_v6 = vpop.eup %3910  ;;  %3936 = vpow2.f32 %v3730_v16  ;;  %v2633_v19 = vadd.f32 1.0, %v8077_v4  ;;  %v2634_v53 = vadd.f32 1.0, %v8085_v35  ;;  %v2635_v42 = vadd.f32 1.0, %v8093_v49 }
 0x210   : > { %v8231_v21 = vpop.eup %3912  ;;  %3938 = vrcp.f32 %v2626_v26  ;;  %v2630_v26 = vadd.f32 1.0, %v8053_v14  ;;  %v2636_v4 = vadd.f32 1.0, %v8101_v45 }
 0x211   : > { %v8234_v47 = vpop.eup %3914  ;;  %3940 = vpow2.f32 %v3731_v3 }
 0x212   : > { %v8237_v46 = vpop.eup %3916  ;;  %3942 = vpow2.f32 %v3732_v40 }
 0x213   : > { %v8240_v36 = vpop.eup %3918  ;;  %3944 = vpow2.f32 %v3733_v8 }
 0x214   : > { %v3921_v16 = vpop.eup %3920  ;;  %3946 = vrcp.f32 %v2627_v27 }
 0x215   : > { %v3923_v57 = vpop.eup %3922  ;;  %3948 = vrcp.f32 %v2628_v44  ;;  %v2765_v43 = vmul.f32 %v3921_v16, %v7833_v38 }
 0x216   : > { %v3925_v3 = vpop.eup %3924  ;;  %3950 = vpow2.f32 %v3734_v48  ;;  %v2766_v14 = vmul.f32 %v3923_v57, %v7845_v15 }
 0x217   : > { %v8246_v40 = vpop.eup %3926  ;;  %3952 = vpow2.f32 %v3735_v63  ;;  %v2767_v48 = vmul.f32 %v3925_v3, %v7857_v28  ;;  %v2862_v38 = vrot.slane %v2765_v43, 7 }
 0x218   : > { %v8249_v8 = vpop.eup %3928  ;;  %3954 = vrcp.f32 %v2629_v54  ;;  %v2863_v16 = vrot.slane %v2766_v14, 7 }
 0x219   : > { %v3931_v27 = vpop.eup %3930  ;;  %3956 = vrcp.f32 %v2630_v26  ;;  %v2865_v57 = vrot.slane %v2767_v48, 7  ;;  %v2637_v26 = vadd.f32 1.0, %v8112_v58  ;;  %v2642_v48 = vadd.f32 1.0, %v8153_v1 }
 0x21a   : > { %v3933_v44 = vpop.eup %3932  ;;  %3958 = vrcp.f32 %v2631_v10  ;;  %v2768_v15 = vmul.f32 %v3931_v27, %v7867_v0  ;;  %v8275_v3 = vsel %vm2861_vm5, %v2862_v38, %v2863_v16 }
 0x21b   : > { %v8256_v63 = vpop.eup %3934  ;;  %3960 = vrcp.f32 %v2632_v7  ;;  %v2769_v28 = vmul.f32 %v3933_v44, %v7876_v62  ;;  %v2638_v7 = vadd.f32 1.0, %v8120_v12  ;;  %v8278_v58 = vsel %vm2861_vm5, %v2863_v16, %v2865_v57 }
 0x21c   : > { %v8259_v56 = vpop.eup %3936  ;;  %3962 = vrcp.f32 %v2633_v19  ;;  %v2639_v19 = vadd.f32 1.0, %v8128_v31  ;;  %v2867_v10 = vrot.slane %v2768_v15, 7  ;;  %v2640_v12 = vadd.f32 1.0, %v8135_v51 }
 0x21d   : > { %v3939_v54 = vpop.eup %3938  ;;  %3964 = vrcp.f32 %v2634_v53  ;;  %v2868_v43 = vrot.slane %v2769_v28, 7  ;;  %v2641_v31 = vadd.f32 1.0, %v8145_v2  ;;  %v2643_v44 = vadd.f32 1.0, %v8160_v29 }
 0x21e   : > { %v8264_v35 = vpop.eup %3940  ;;  %3966 = vrcp.f32 %v2635_v42  ;;  %v2770_v0 = vmul.f32 %v3939_v54, %v7885_v34  ;;  %v2974_v53 = vsel %vm420_vm0, %v8275_v3, 0.0  ;;  %v2975_v42 = vsel %vm420_vm0, %v8278_v58, 0.0 }
 0x21f   : > { %v8267_v49 = vpop.eup %3942  ;;  %3968 = vrcp.f32 %v2636_v4  ;;  %v8295_v2 = vsel %vm2861_vm5, %v2867_v10, %v2868_v43  ;;  %v2644_v15 = vadd.f32 1.0, %v8167_v22  ;;  %v2645_v29 = vadd.f32 1.0, %v8171_v61 }
 0x220   : > { %v8270_v45 = vpop.eup %3944  ;;  %3970 = vrcp.f32 %v2637_v26  ;;  %v2870_v1 = vrot.slane %v2770_v0, 7  ;;  %v2646_v28 = vadd.f32 1.0, %v8176_v33  ;;  %v2647_v57 = vadd.f32 1.0, %v8183_v18 }
 0x221   : > { %v3947_v62 = vpop.eup %3946  ;;  %3972 = vrcp.f32 %v2638_v7  ;;  %v2648_v26 = vadd.f32 1.0, %v8190_v11  ;;  %v2649_v7 = vadd.f32 1.0, %v8193_v50  ;;  %v2977_v22 = vsel %vm420_vm0, %v8295_v2, 0.0 }
 0x222   : > { %v3949_v27 = vpop.eup %3948  ;;  %3974 = vrcp.f32 %v2639_v19  ;;  %v2771_v4 = vmul.f32 %v3947_v62, %v7894_v23  ;;  %v2976_v23 = vadd.f32 %v2975_v42, %v2974_v53  ;;  %v2650_v19 = vadd.f32 1.0, %v8199_v60  ;;  %v10234_v53 = vld [vmem:[#allocation120_spill] sm:$0xff] }
 0x223   : > { %v8281_v14 = vpop.eup %3950  ;;  %v2772_v38 = vmul.f32 %v3949_v27, %v7904_v25  ;;  %3976 = vrcp.f32 %v2640_v12  ;;  %v8308_v0 = vsel %vm2861_vm5, %v2868_v43, %v2870_v1  ;;  %v2651_v11 = vadd.f32 1.0, %v8206_v52 }
 0x224   : > { %v8285_v34 = vpop.eup %3952  ;;  %3978 = vrcp.f32 %v2641_v31  ;;  %v2872_v18 = vrot.slane %v2771_v4, 7  ;;  %v2652_v10 = vadd.f32 1.0, %v8213_v24  ;;  %v8313_v50 = vadd.f32 1.0, %v8216_v30 }
 0x225   : > { %v3955_v51 = vpop.eup %3954  ;;  %3980 = vrcp.f32 %v2642_v48  ;;  %v2873_v62 = vrot.slane %v2772_v38, 7  ;;  %v8316_v27 = vadd.f32 1.0, %v8219_v5  ;;  %v2978_v43 = vadd.f32 %v2977_v22, %v2976_v23  ;;  %v10236_v23 = vld [vmem:[#allocation123_spill] sm:$0xff] }
 0x226   : > { %v3957_v54 = vpop.eup %3956  ;;  %v2773_v33 = vmul.f32 %v3955_v51, %v7909_v59  ;;  %3982 = vrcp.f32 %v2643_v44  ;;  %v8321_v48 = vadd.f32 1.0, %v8225_v6  ;;  %v8324_v52 = vadd.f32 1.0, %v8231_v21 }
 0x227   : > { %v3959_v16 = vpop.eup %3958  ;;  %v2774_v12 = vmul.f32 %v3957_v54, %v7914_v17  ;;  %v8327_v24 = vadd.f32 1.0, %v8234_v47  ;;  %v2979_v30 = vsel %vm420_vm0, %v8308_v0, 0.0  ;;  %3984 = vrcp.f32 %v2644_v15 }
 0x228   : > { %v3961_v25 = vpop.eup %3960  ;;  %v2775_v59 = vmul.f32 %v3959_v16, %v7919_v39  ;;  %v8333_v39 = vsel %vm2861_vm5, %v2872_v18, %v2873_v62  ;;  %v2875_v44 = vrot.slane %v2773_v33, 7  ;;  %v8336_v6 = vadd.f32 1.0, %v8237_v46 }
 0x229   : > { %v3963_v61 = vpop.eup %3962  ;;  %v2776_v17 = vmul.f32 %v3961_v25, %v7924_v13  ;;  %3986 = vrcp.f32 %v2645_v29  ;;  %v2877_v51 = vrot.slane %v2774_v12, 7  ;;  %v2980_v38 = vadd.f32 %v2979_v30, %v2978_v43 }
 0x22a   : > { %v3965_v60 = vpop.eup %3964  ;;  %v2777_v21 = vmul.f32 %v3963_v61, %v7930_v9  ;;  %3988 = vrcp.f32 %v2646_v28  ;;  %v2878_v4 = vrot.slane %v2775_v59, 7  ;;  %v8341_v13 = vadd.f32 1.0, %v8240_v36  ;;  %v10235_v9 = vld [vmem:[#allocation121_spill] sm:$0xff] }
 0x22b   : > { %v3967_v31 = vpop.eup %3966  ;;  %v2778_v47 = vmul.f32 %v3965_v60, %v10234_v53  ;;  %v8344_v54 = vadd.f32 1.0, %v8246_v40  ;;  %3990 = vrcp.f32 %v2647_v57  ;;  %v2981_v46 = vsel %vm420_vm0, %v8333_v39, 0.0  ;;  %v10237_v40 = vld [vmem:[#allocation124_spill] sm:$0xff] }
 0x22c   : > { %v3969_v5 = vpop.eup %3968  ;;  %3992 = vrcp.f32 %v2648_v26  ;;  %v2779_v29 = vmul.f32 %v3967_v31, %v10235_v9  ;;  %v8350_v28 = vsel %vm2861_vm5, %v2873_v62, %v2875_v44  ;;  %v2880_v16 = vrot.slane %v2776_v17, 7  ;;  %v10239_v17 = vld [vmem:[#allocation41_spill] sm:$0xff]  ;;  %v10242_v9 = vld [vmem:[#allocation68_spill] sm:$0xff] }
 0x22d   : > { %v3971_v42 = vpop.eup %3970  ;;  %3994 = vrcp.f32 %v2649_v7  ;;  %v2780_v25 = vmul.f32 %v3969_v5, %v10236_v23  ;;  %v2882_v36 = vrot.slane %v2777_v21, 7  ;;  %v2883_v22 = vrot.slane %v2778_v47, 7  ;;  %v10238_v7 = vld [vmem:[#allocation125_spill] sm:$0xff] }
 0x22e   : > { %v3973_v1 = vpop.eup %3972  ;;  %3996 = vrcp.f32 %v2650_v19  ;;  %v2781_v57 = vmul.f32 %v3971_v42, %v10237_v40  ;;  %v8355_v33 = vsel %vm2861_vm5, %v2877_v51, %v2878_v4  ;;  %v2982_v18 = vadd.f32 %v2981_v46, %v2980_v38 }
 0x22f   : > { %v3975_v15 = vpop.eup %3974  ;;  %v8358_v60 = vadd.f32 1.0, %v8249_v8  ;;  %v8361_v62 = vadd.f32 1.0, %v8256_v63  ;;  %3998 = vrcp.f32 %v2651_v11  ;;  %v2782_v12 = vmul.f32 %v3973_v1, %v10238_v7 }
 0x230   : > { %v3977_v61 = vpop.eup %3976  ;;  %v8365_v43 = vadd.f32 1.0, %v8259_v56  ;;  %4000 = vrcp.f32 %v2652_v10  ;;  %v8368_v19 = vsel %vm2861_vm5, %v2878_v4, %v2880_v16  ;;  %v2885_v31 = vrot.slane %v2779_v29, 7  ;;  %v10240_v56 = vld [vmem:[#allocation63_spill] sm:$0xff]  ;;  %v10243_v29 = vld [vmem:[#allocation76_spill] sm:$0xff] }
 0x231   : > { %v3979_v26 = vpop.eup %3978  ;;  %v8371_v30 = vsel %vm2861_vm5, %v2882_v36, %v2883_v22  ;;  %v2887_v8 = vrot.slane %v2780_v25, 7  ;;  %v2983_v63 = vsel %vm420_vm0, %v8350_v28, 0.0  ;;  %v2985_v11 = vsel %vm420_vm0, %v8355_v33, 0.0  ;;  %v10241_v4 = vld [vmem:[#allocation67_spill] sm:$0xff] }
 0x232   : > { %v3981_v59 = vpop.eup %3980  ;;  %v2783_v44 = vmul.f32 %v3975_v15, %v10239_v17  ;;  %v2784_v21 = vmul.f32 %v3977_v61, %v10240_v56  ;;  %v2888_v10 = vrot.slane %v2781_v57, 7  ;;  %v2984_v53 = vadd.f32 %v2983_v63, %v2982_v18  ;;  %v10246_v17 = vld [vmem:[#allocation62_spill] sm:$0xff] }
 0x233   : > { %v3983_v5 = vpop.eup %3982  ;;  %v8380_v47 = vadd.f32 1.0, %v8264_v35  ;;  %4002 = vrcp.f32 %v8313_v50  ;;  %v2890_v42 = vrot.slane %v2782_v12, 7  ;;  %v2987_v51 = vsel %vm420_vm0, %v8368_v19, 0.0 }
 0x234   : > { %4004 = vrcp.f32 %v8316_v27  ;;  %v2785_v38 = vmul.f32 %v3979_v26, %v10241_v4  ;;  %v8388_v1 = vsel %vm2861_vm5, %v2883_v22, %v2885_v31  ;;  %v2986_v46 = vadd.f32 %v2985_v11, %v2984_v53  ;;  %v3985_v15 = vpop.eup %3984  ;;  %v10244_v26 = vld [vmem:[#allocation81_spill] sm:$0xff]  ;;  %v10247_v53 = vld [vmem:[#allocation87_spill] sm:$0xff] }
 0x235   : > { %4006 = vrcp.f32 %v8321_v48  ;;  %v2786_v35 = vmul.f32 %v3981_v59, %v10242_v9  ;;  %v2787_v16 = vmul.f32 %v3983_v5, %v10243_v29  ;;  %v2989_v50 = vsel %vm420_vm0, %v8371_v30, 0.0 }
 0x236   : > { %v3987_v23 = vpop.eup %3986  ;;  %v8396_v25 = vsel %vm2861_vm5, %v2887_v8, %v2888_v10  ;;  %v2892_v27 = vrot.slane %v2783_v44, 7  ;;  %v2893_v36 = vrot.slane %v2784_v21, 7  ;;  %v2988_v61 = vadd.f32 %v2987_v51, %v2986_v46  ;;  %v10245_v8 = vld [vmem:[#allocation50_spill] sm:$0xff] }
 0x237   : > { %v3989_v22 = vpop.eup %3988  ;;  %v2665_v40 = vadd.f32 1.0, %v8267_v49  ;;  %4008 = vrcp.f32 %v8324_v52  ;;  %v8401_v48 = vsel %vm2861_vm5, %v2888_v10, %v2890_v42  ;;  %v2991_v57 = vsel %vm420_vm0, %v8388_v1, 0.0 }
 0x238   : > { %v3991_v18 = vpop.eup %3990  ;;  %4010 = vrcp.f32 %v8327_v24  ;;  %v2788_v7 = vmul.f32 %v3985_v15, %v10244_v26  ;;  %v2895_v12 = vrot.slane %v2785_v38, 7  ;;  %v2990_v59 = vadd.f32 %v2989_v50, %v2988_v61 }
 0x239   : > { %v3993_v31 = vpop.eup %3992  ;;  %v2789_v63 = vmul.f32 %v3987_v23, %v10245_v8  ;;  %v2897_v11 = vrot.slane %v2786_v35, 7  ;;  %v2898_v49 = vrot.slane %v2787_v16, 7  ;;  %v2993_v52 = vsel %vm420_vm0, %v8396_v25, 0.0  ;;  %v10248_v35 = vld [vmem:[#allocation66_spill] sm:$0xff]  ;;  %v10249_v16 = vld [vmem:[#allocation53_spill] sm:$0xff] }
 0x23a   : > { %v3995_v5 = vpop.eup %3994  ;;  %4012 = vrcp.f32 %v8336_v6  ;;  %v2790_v44 = vmul.f32 %v3989_v22, %v10246_v17  ;;  %v8413_v56 = vsel %vm2861_vm5, %v2892_v27, %v2893_v36  ;;  %v2992_v24 = vadd.f32 %v2991_v57, %v2990_v59  ;;  %v10250_v22 = vld [vmem:[#allocation93_spill] sm:$0xff]  ;;  %v10252_v59 = vld [vmem:[#allocation56_spill] sm:$0xff] }
 0x23b   : > { %v3997_v21 = vpop.eup %3996  ;;  %v2666_v10 = vadd.f32 1.0, %v8270_v45  ;;  %4014 = vrcp.f32 %v8341_v13  ;;  %v2791_v42 = vmul.f32 %v3991_v18, %v10247_v53  ;;  %v2995_v51 = vsel %vm420_vm0, %v8401_v48, 0.0 }
 0x23c   : > { %v3999_v4 = vpop.eup %3998  ;;  %4016 = vrcp.f32 %v8344_v54  ;;  %v8422_v6 = vsel %vm2861_vm5, %v2893_v36, %v2895_v12  ;;  %v2900_v38 = vrot.slane %v2788_v7, 7  ;;  %v2994_v46 = vadd.f32 %v2993_v52, %v2992_v24  ;;  %v10251_v12 = vld [vmem:[#allocation64_spill] sm:$0xff] }
 0x23d   : > { %v4001_v15 = vpop.eup %4000  ;;  %4018 = vrcp.f32 %v8358_v60  ;;  %v8426_v45 = vsel %vm2861_vm5, %v2897_v11, %v2898_v49  ;;  %v2902_v13 = vrot.slane %v2789_v63, 7  ;;  %v2997_v9 = vsel %vm420_vm0, %v8413_v56, 0.0 }
 0x23e   : > { %v2792_v29 = vmul.f32 %v3993_v31, %v10248_v35  ;;  %v2793_v50 = vmul.f32 %v3995_v5, %v10249_v16  ;;  %v2903_v54 = vrot.slane %v2790_v44, 7  ;;  %v2996_v23 = vadd.f32 %v2995_v51, %v2994_v46  ;;  %v10253_v44 = vld [vmem:[#allocation72_spill] sm:$0xff]  ;;  %v10254_v51 = vld [vmem:[#allocation94_spill] sm:$0xff]  ;;  %v10256_v16 = vld [vmem:[#allocation101_spill] sm:$0xff] }
 0x23f   : > { %v2667_v27 = vadd.f32 1.0, %v8281_v14  ;;  %4020 = vrcp.f32 %v8361_v62  ;;  %v2905_v36 = vrot.slane %v2791_v42, 7  ;;  %v2999_v60 = vsel %vm420_vm0, %v8422_v6, 0.0 }
 0x240   : > { %v4003_v61 = vpop.eup %4002  ;;  %4022 = vrcp.f32 %v8365_v43  ;;  %v2794_v57 = vmul.f32 %v3997_v21, %v10250_v22  ;;  %v8439_v18 = vsel %vm2861_vm5, %v2898_v49, %v2900_v38  ;;  %v2998_v26 = vadd.f32 %v2997_v9, %v2996_v23 }
 0x241   : > { %v4005_v7 = vpop.eup %4004  ;;  %4024 = vrcp.f32 %v8380_v47  ;;  %v2795_v14 = vmul.f32 %v3999_v4, %v10251_v12  ;;  %v2796_v62 = vmul.f32 %v4001_v15, %v10252_v59  ;;  %v3001_v31 = vsel %vm420_vm0, %v8426_v45, 0.0 }
 0x242   : > { %v4007_v8 = vpop.eup %4006  ;;  %v8447_v63 = vsel %vm2861_vm5, %v2902_v13, %v2903_v54  ;;  %v2907_v43 = vrot.slane %v2792_v29, 7  ;;  %v2908_v11 = vrot.slane %v2793_v50, 7  ;;  %v3000_v52 = vadd.f32 %v2999_v60, %v2998_v26 }
 0x243   : > { %v2668_v49 = vadd.f32 1.0, %v8285_v34  ;;  %4026 = vrcp.f32 %v2665_v40  ;;  %v8451_v5 = vsel %vm2861_vm5, %v2903_v54, %v2905_v36  ;;  %v3003_v47 = vsel %vm420_vm0, %v8439_v18, 0.0  ;;  %v10255_v40 = vld [vmem:[#allocation59_spill] sm:$0xff] }
 0x244   : > { %v4009_v17 = vpop.eup %4008  ;;  %4028 = vrcp.f32 %v2666_v10  ;;  %v2797_v24 = vmul.f32 %v4003_v61, %v10253_v44  ;;  %v2910_v21 = vrot.slane %v2794_v57, 7  ;;  %v3002_v53 = vadd.f32 %v3001_v31, %v3000_v52  ;;  %v10257_v31 = vld [vmem:[#allocation108_spill] sm:$0xff] }
 0x245   : > { %v4011_v42 = vpop.eup %4010  ;;  %v2798_v4 = vmul.f32 %v4005_v7, %v10254_v51  ;;  %v2912_v38 = vrot.slane %v2795_v14, 7  ;;  %v2913_v46 = vrot.slane %v2796_v62, 7  ;;  %v3005_v34 = vsel %vm420_vm0, %v8447_v63, 0.0 }
 0x246   : > { %4030 = vrcp.f32 %v2667_v27  ;;  %v2799_v15 = vmul.f32 %v4007_v8, %v10255_v40  ;;  %v8461_v13 = vsel %vm2861_vm5, %v2907_v43, %v2908_v11  ;;  %v3004_v9 = vadd.f32 %v3003_v47, %v3002_v53 }
 0x247   : > { %v4013_v10 = vpop.eup %4012  ;;  %4032 = vrcp.f32 %v2668_v49  ;;  %v3007_v35 = vsel %vm420_vm0, %v8451_v5, 0.0  ;;  %v2800_v50 = vmul.f32 %v4009_v17, %v10256_v16  ;;  %v8467_v54 = vsel %vm2861_vm5, %v2908_v11, %v2910_v21 }
 0x248   : > { %v4015_v29 = vpop.eup %4014  ;;  %v2915_v23 = vrot.slane %v2797_v24, 7  ;;  %v3006_v36 = vadd.f32 %v3005_v34, %v3004_v9  ;;  %v8470_v60 = vsel %vm2861_vm5, %v2912_v38, %v2913_v46  ;;  %v2917_v61 = vrot.slane %v2798_v4, 7  ;;  %v10258_v34 = vld [vmem:[#allocation77_spill] sm:$0xff] }
 0x249   : > { %v4017_v27 = vpop.eup %4016  ;;  %v3009_v22 = vsel %vm420_vm0, %v8461_v13, 0.0  ;;  %v2801_v26 = vmul.f32 %v4011_v42, %v8109_v41  ;;  %v2802_v7 = vmul.f32 %v4013_v10, %v8117_v37  ;;  %v2918_v12 = vrot.slane %v2799_v15, 7 }
 0x24a   : > { %v4019_v57 = vpop.eup %4018  ;;  %v3008_v14 = vadd.f32 %v3007_v35, %v3006_v36  ;;  %v3011_v59 = vsel %vm420_vm0, %v8467_v54, 0.0  ;;  %v2803_v8 = vmul.f32 %v4015_v29, %v10257_v31  ;;  %v8480_v43 = vsel %vm2861_vm5, %v2913_v46, %v2915_v23  ;;  %v10259_v35 = vld [vmem:[#allocation126_spill] sm:$0xff]  ;;  %v10262_v31 = vld [vmem:[#allocation131_spill] sm:$0xff] }
 0x24b   : > { %v2920_v11 = vrot.slane %v2800_v50, 7  ;;  %v2804_v47 = vmul.f32 %v4017_v27, %v8157_v20  ;;  %v2805_v41 = vmul.f32 %v4019_v57, %v8164_v55  ;;  %v3013_v37 = vsel %vm420_vm0, %v8470_v60, 0.0  ;;  %v10260_v27 = vld [vmem:[#allocation129_spill] sm:$0xff] }
 0x24c   : > { %v4021_v62 = vpop.eup %4020  ;;  %v3010_v52 = vadd.f32 %v3009_v22, %v3008_v14  ;;  %v8487_v44 = vsel %vm2861_vm5, %v2917_v61, %v2918_v12  ;;  %v2922_v24 = vrot.slane %v2801_v26, 7  ;;  %v2923_v21 = vrot.slane %v2802_v7, 7 }
 0x24d   : > { %v4023_v49 = vpop.eup %4022  ;;  %v3015_v42 = vsel %vm420_vm0, %v8480_v43, 0.0  ;;  %v2806_v4 = vmul.f32 %v4021_v62, %v8180_v32  ;;  %v8493_v20 = vsel %vm2861_vm5, %v2918_v12, %v2920_v11  ;;  %v2925_v55 = vrot.slane %v2803_v8, 7 }
 0x24e   : > { %v4025_v17 = vpop.eup %4024  ;;  %v3012_v53 = vadd.f32 %v3011_v59, %v3010_v52  ;;  %v2807_v40 = vmul.f32 %v4023_v49, %v10258_v34  ;;  %v2927_v15 = vrot.slane %v2804_v47, 7  ;;  %v2928_v9 = vrot.slane %v2805_v41, 7  ;;  %v10261_v59 = vld [vmem:[#allocation83_spill] sm:$0xff]  ;;  %v10263_v47 = vld [vmem:[#allocation132_spill] sm:$0xff] }
 0x24f   : > { %v3017_v10 = vsel %vm420_vm0, %v8487_v44, 0.0  ;;  %v2808_v29 = vmul.f32 %v4025_v17, %v10259_v35  ;;  %v8500_v16 = vsel %vm2861_vm5, %v2922_v24, %v2923_v21  ;;  %v3019_v23 = vsel %vm420_vm0, %v8493_v20, 0.0 }
 0x250   : > { %v4027_v51 = vpop.eup %4026  ;;  %v3014_v38 = vadd.f32 %v3013_v37, %v3012_v53  ;;  %v8506_v22 = vsel %vm2861_vm5, %v2923_v21, %v2925_v55  ;;  %v2930_v57 = vrot.slane %v2806_v4, 7  ;;  %v8509_v7 = vsel %vm2861_vm5, %v2927_v15, %v2928_v9 }
 0x251   : > { %v4029_v46 = vpop.eup %4028  ;;  %v2809_v61 = vmul.f32 %v4027_v51, %v10260_v27  ;;  %v2932_v12 = vrot.slane %v2807_v40, 7  ;;  %v3021_v14 = vsel %vm420_vm0, %v8500_v16, 0.0  ;;  %v2933_v11 = vrot.slane %v2808_v29, 7 }
 0x252   : > { %v3016_v50 = vadd.f32 %v3015_v42, %v3014_v38  ;;  %v2810_v62 = vmul.f32 %v4029_v46, %v10261_v59  ;;  %v3023_v49 = vsel %vm420_vm0, %v8506_v22, 0.0  ;;  %v8519_v37 = vsel %vm2861_vm5, %v2928_v9, %v2930_v57 }
 0x253   : > { %v4031_v32 = vpop.eup %4030  ;;  %v2935_v17 = vrot.slane %v2809_v61, 7  ;;  %v3025_v21 = vsel %vm420_vm0, %v8509_v7, 0.0  ;;  %v8524_v53 = vsel %vm2861_vm5, %v2932_v12, %v2933_v11  ;;  %v3027_v55 = vsel %vm420_vm0, %v8519_v37, 0.0 }
 0x254   : > { %v4033_v36 = vpop.eup %4032  ;;  %v3018_v26 = vadd.f32 %v3017_v10, %v3016_v50  ;;  %v2811_v8 = vmul.f32 %v4031_v32, %v10262_v31  ;;  %v2937_v42 = vrot.slane %v2810_v62, 7  ;;  %v3029_v40 = vsel %vm420_vm0, %v8524_v53, 0.0  ;;  %v3127_v31 = vld [vmem:[%s8794_s6] sm:$0x3] }
 0x255   : > { %v2812_v41 = vmul.f32 %v4033_v36, %v10263_v47  ;;  %v8529_v38 = vsel %vm2861_vm5, %v2933_v11, %v2935_v17  ;;  %3790 = vmatpush3.msk.msra.mxu1 %vm3133_vm6, %v3127_v31 }
 0x256   : > { %v3020_v52 = vadd.f32 %v3019_v23, %v3018_v26  ;;  %v2938_v51 = vrot.slane %v2811_v8, 7  ;;  %v3031_v10 = vsel %vm420_vm0, %v8529_v38, 0.0  ;;  %v3046_v8 = vld [vmem:[%s8793_s5] sm:$0x1] }
 0x257   : > { %v2940_v46 = vrot.slane %v2812_v41, 7 }
 0x258   : > { %v3022_v24 = vadd.f32 %v3021_v14, %v3020_v52  ;;  %v8534_v15 = vsel %vm2861_vm5, %v2937_v42, %v2938_v51  ;;  %v3265_v42 = vld [vmem:[%s8796_s8] sm:$0xf] }
 0x259   : > { %v8539_v35 = vsel %vm2861_vm5, %v2938_v51, %v2940_v46  ;;  %v3033_v50 = vsel %vm420_vm0, %v8534_v15, 0.0  ;;  %3830 = vmatprep.subr.msk.bf16.mxu0 %vm3314_vm8, %v3265_v42  ;;  %3831 = vmatprep.subr.msk.bf16.mxu1 %vm3314_vm8, %v3265_v42  ;;  %v3316_v51 = vsel %vm3314_vm8, %v3265_v42, 0 }
 0x25a   : > { %v3024_v4 = vadd.f32 %v3023_v49, %v3022_v24  ;;  %v3035_v23 = vsel %vm420_vm0, %v8539_v35, 0.0 }
 0x25c   : > { %v3026_v34 = vadd.f32 %v3025_v21, %v3024_v4  ;;  %v3128_v4 = vld [vmem:[%s8795_s7] sm:$0x1] }
 0x25e   : > { %v3028_v9 = vadd.f32 %v3027_v55, %v3026_v34 }
 0x260   : > { %v3030_v29 = vadd.f32 %v3029_v40, %v3028_v9 }
 0x262   : > { %v3032_v32 = vadd.f32 %v3031_v10, %v3030_v29 }
 0x264   : > { %v3034_v36 = vadd.f32 %v3033_v50, %v3032_v32  ;;  %v10264_v50 = vld [vmem:[#allocation35_spill] sm:$0xff] }
 0x265   : > { %v10265_v32 = vsub.s32 0, %v10264_v50 }
 0x266   : > { %v3036_v27 = vadd.f32 %v3035_v23, %v3034_v36 }
 0x268   : > { %v3037_v61 = vrot.slane %v3036_v27, 4 }
 0x26a   : > { %v3038_v57 = vadd.f32 %v3037_v61, %v3036_v27 }
 0x26c   : > { %v3039_v26 = vrot.slane %v3038_v57, 2 }
 0x26e   : > { %v3040_v12 = vadd.f32 %v3039_v26, %v3038_v57 }
 0x270   : > { %v3041_v14 = vrot.slane %v3040_v12, 1 }
 0x272   : > { %v3042_v59 = vadd.f32 %v3041_v14, %v3040_v12 }
 0x274   : > { %v3044_v62 = vmul.f32 0.00390625, %v3042_v59 }
 0x276   : > { %3787 = vmatmul.mubr.msk.f32.vlgmr.msra.gmra.mxu0 %vm420_vm0, %v3044_v62 }
 0x277   : > { %3795 = vmatpush3.bf16.msra.mxu0 %v3316_v51 }
 0x336   : > { %v3116_v11 = vpop.f32.mrf.mxu0 }
 0x337   : > { %v3117_v52 = vadd.f32 %v3116_v11, %v3046_v8 }
 0x338   : > { %v3788_v49 = vpop.f32.mrf.mxu0 }
 0x339   : > { %v3737_v47 = vmul.f32 -1.442695, %v3117_v52 }
 0x33b   : > { %4034 = vpow2.f32 %v3737_v47 }
 0x348   : > { %v4035_v41 = vpop.eup %4034 }
 0x349   : > { %v3123_v17 = vadd.f32 1.0, %v4035_v41 }
 0x34b   : > { %4036 = vrcp.f32 %v3123_v17 }
 0x358   : > { %v4037_v24 = vpop.eup %4036 }
 0x359   : > { %v3126_v21 = vmul.f32 %v4037_v24, %v3117_v52 }
 0x35b   : > { %3792 = vmatmul.mubr.msk.f32.vlgmr.msra.gmra.mxu1 %vm3129_vm7, %v3126_v21 }
 0x35c   : > { %3829 = vmatpush3.bf16.msra.mxu1 %v3316_v51 }
 0x41b   : > { %v3203_v55 = vpop.f32.mrf.mxu1 }
 0x41c   : > { %v3204_v46 = vadd.f32 %v3203_v55, %v3128_v4 }
 0x41d   : > { %v3793_v34 = vpop.f32.mrf.mxu1 }
 0x41e   : > { %v3740_v40 = vmul.f32 -1.442695, %v3204_v46 }
 0x420   : > { %4038 = vpow2.f32 %v3740_v40 }
 0x42d   : > { %v4039_v9 = vpop.eup %4038 }
 0x42e   : > { %v3210_v10 = vadd.f32 1.0, %v4039_v9 }
 0x430   : > { %4040 = vrcp.f32 %v3210_v10 }
 0x43d   : > { %v4041_v29 = vpop.eup %4040 }
 0x43e   : > { %v3216_v23 = vrot.slane %v4041_v29, %v10265_v32  ;;  %v10266_v32 = vld [vmem:[#allocation5_spill] sm:$0xff] }
 0x440   : > { %v3217_v36 = vmul.f32 %v3216_v23, %v8275_v3  ;;  %v3218_v27 = vmul.f32 %v3216_v23, %v8278_v58  ;;  %v3233_v61 = vmul.f32 %v3216_v23, %v8447_v63  ;;  %v3234_v57 = vmul.f32 %v3216_v23, %v8451_v5 }
 0x441   : > { %v3219_v26 = vmul.f32 %v3216_v23, %v8295_v2  ;;  %v3220_v12 = vmul.f32 %v3216_v23, %v8308_v0  ;;  %v3235_v14 = vmul.f32 %v3216_v23, %v8461_v13  ;;  %v3236_v59 = vmul.f32 %v3216_v23, %v8467_v54 }
 0x442   : > { %v3249_v62 = vpack.c.bf16 %v3218_v27, %v3217_v36  ;;  %v3257_v31 = vpack.c.bf16 %v3234_v57, %v3233_v61  ;;  %v3221_v8 = vmul.f32 %v3216_v23, %v8333_v39  ;;  %v3222_v3 = vmul.f32 %v3216_v23, %v8350_v28  ;;  %v10267_v36 = vld [vmem:[#allocation21_spill] sm:$0xff] }
 0x443   : > { %v3250_v11 = vpack.c.bf16 %v3220_v12, %v3219_v26  ;;  %v3258_v58 = vpack.c.bf16 %v3236_v59, %v3235_v14  ;;  %v3237_v63 = vmul.f32 %v3216_v23, %v8470_v60  ;;  %v3238_v5 = vmul.f32 %v3216_v23, %v8480_v43 }
 0x444   : > { %3796 = vmatprep.mubr.msk.bf16.mxu0 %vm420_vm0, %v3249_v62  ;;  %3812 = vmatprep.mubr.msk.bf16.mxu1 %vm420_vm0, %v3257_v31  ;;  %v3251_v2 = vpack.c.bf16 %v3222_v3, %v3221_v8  ;;  %v3223_v39 = vmul.f32 %v3216_v23, %v8355_v33  ;;  %v3224_v28 = vmul.f32 %v3216_v23, %v8368_v19  ;;  %v10268_v62 = vld [vmem:[#allocation3_spill] sm:$0xff] }
 0x445   : > { %3797 = vmatmul.mubr.msk.bf16.vlgmr.msra.gmra.mxu0 %vm420_vm0, %v3250_v11  ;;  %3813 = vmatmul.mubr.msk.bf16.vlgmr.msra.gmra.mxu1 %vm420_vm0, %v3258_v58  ;;  %v3259_v0 = vpack.c.bf16 %v3238_v5, %v3237_v63  ;;  %v3239_v13 = vmul.f32 %v3216_v23, %v8487_v44  ;;  %v3240_v54 = vmul.f32 %v3216_v23, %v8493_v20  ;;  %v10269_v8 = vld [vmem:[#allocation19_spill] sm:$0xff] }
 0x446   : > { %3800 = vmatprep.mubr.msk.bf16.mxu0 %vm420_vm0, %v3251_v2  ;;  %v3225_v60 = vmul.f32 %v3216_v23, %v8371_v30  ;;  %v3226_v43 = vmul.f32 %v3216_v23, %v8388_v1  ;;  %v3241_v52 = vmul.f32 %v3216_v23, %v8500_v16  ;;  %v3242_v49 = vmul.f32 %v3216_v23, %v8506_v22 }
 0x447   : > { %3816 = vmatprep.mubr.msk.bf16.mxu1 %vm420_vm0, %v3259_v0  ;;  %v3252_v47 = vpack.c.bf16 %v3224_v28, %v3223_v39  ;;  %v3260_v41 = vpack.c.bf16 %v3240_v54, %v3239_v13  ;;  %v3227_v33 = vmul.f32 %v3216_v23, %v8396_v25  ;;  %v3228_v19 = vmul.f32 %v3216_v23, %v8401_v48 }
 0x448   : > { %v3253_v17 = vpack.c.bf16 %v3226_v43, %v3225_v60  ;;  %v3261_v24 = vpack.c.bf16 %v3242_v49, %v3241_v52  ;;  %v3243_v30 = vmul.f32 %v3216_v23, %v8509_v7  ;;  %v3244_v1 = vmul.f32 %v3216_v23, %v8519_v37  ;;  %v10270_v60 = vld [vmem:[#allocation6_spill] sm:$0xff] }
 0x449   : > { %v3229_v44 = vmul.f32 %v3216_v23, %v8413_v56  ;;  %v3230_v20 = vmul.f32 %v3216_v23, %v8422_v6  ;;  %v3245_v16 = vmul.f32 %v3216_v23, %v8524_v53  ;;  %v3246_v22 = vmul.f32 %v3216_v23, %v8529_v38  ;;  %v8611_v53 = vld [vmem:[%s8797_s9] ss:$0 sm:$0xff]  ;;  %v10271_v52 = vld [vmem:[#allocation22_spill] sm:$0xff] }
 0x44a   : > { %v3254_v21 = vpack.c.bf16 %v3228_v19, %v3227_v33  ;;  %v3262_v42 = vpack.c.bf16 %v3244_v1, %v3243_v30  ;;  %v3231_v25 = vmul.f32 %v3216_v23, %v8426_v45  ;;  %v3232_v48 = vmul.f32 %v3216_v23, %v8439_v18  ;;  %v8616_v45 = vld [vmem:[%s8798_s10] ss:$0 sm:$0xff]  ;;  %v10273_v33 = vld [vmem:[#allocation20_spill] sm:$0xff] }
 0x44b   : > { %v3255_v51 = vpack.c.bf16 %v3230_v20, %v3229_v44  ;;  %v3263_v4 = vpack.c.bf16 %v3246_v22, %v3245_v16  ;;  %v3247_v56 = vmul.f32 %v3216_v23, %v8534_v15  ;;  %v3248_v6 = vmul.f32 %v3216_v23, %v8539_v35 }
 0x44c   : > { %v3256_v7 = vpack.c.bf16 %v3232_v48, %v3231_v25 }
 0x44d   : > { %3801 = vmatmul.mubr.msk.bf16.gmra.mxu0 %vm420_vm0, %v3252_v47  ;;  %3817 = vmatmul.mubr.msk.bf16.gmra.mxu1 %vm420_vm0, %v3260_v41  ;;  %v3264_v37 = vpack.c.bf16 %v3248_v6, %v3247_v56 }
 0x44e   : > { %3804 = vmatprep.mubr.msk.bf16.mxu0 %vm420_vm0, %v3253_v17  ;;  %3820 = vmatprep.mubr.msk.bf16.mxu1 %vm420_vm0, %v3261_v24  ;;  %v10272_v17 = vld [vmem:[#allocation4_spill] sm:$0xff] }
 0x455   : > { %3805 = vmatmul.mubr.msk.bf16.gmra.mxu0 %vm420_vm0, %v3254_v21  ;;  %3821 = vmatmul.mubr.msk.bf16.gmra.mxu1 %vm420_vm0, %v3262_v42  ;;  %v10274_v21 = vld [vmem:[#allocation9_spill] sm:$0xff] }
 0x456   : > { %3808 = vmatprep.mubr.msk.bf16.mxu0 %vm420_vm0, %v3255_v51  ;;  %3824 = vmatprep.mubr.msk.bf16.mxu1 %vm420_vm0, %v3263_v4  ;;  %v10275_v51 = vld [vmem:[#allocation25_spill] sm:$0xff] }
 0x45d   : > { %3809 = vmatmul.mubr.msk.bf16.gmra.mxu0 %vm420_vm0, %v3256_v7  ;;  %3825 = vmatmul.mubr.msk.bf16.gmra.mxu1 %vm420_vm0, %v3264_v37 }
 0x505   : > { %v3798_v38 = vpop.f32.mrf.mxu0  ;;  %v3814_v18 = vpop.f32.mrf.mxu1 }
 0x506   : > { %v3488_v15 = vmul.f32 %v3798_v38, %v8611_v53  ;;  %v3504_v35 = vmul.f32 %v3814_v18, %v8611_v53 }
 0x507   : > { %v3352_v55 = vpop.f32.mrf.mxu0  ;;  %v3416_v46 = vpop.f32.mrf.mxu1 }
 0x508   : > { %v3527_v34 = vadd.f32 %v8616_v45, %v3488_v15  ;;  %v3543_v40 = vadd.f32 %v8616_v45, %v3504_v35  ;;  %v3486_v9 = vmul.f32 %v8611_v53, %v3352_v55  ;;  %v3502_v10 = vmul.f32 %v8611_v53, %v3416_v46  ;;  %v10276_v55 = vld [vmem:[#allocation7_spill] sm:$0xff] }
 0x509   : > { %v3799_v29 = vpop.f32.mrf.mxu0  ;;  %v3815_v50 = vpop.f32.mrf.mxu1 }
 0x50a   : > { %v3559_v23 = vadd.f32 %v3527_v34, %v10266_v32  ;;  %v3575_v27 = vadd.f32 %v3543_v40, %v10267_v36  ;;  %v3525_v61 = vadd.f32 %v8616_v45, %v3486_v9  ;;  %v3541_v57 = vadd.f32 %v8616_v45, %v3502_v10  ;;  %v10277_v34 = vld [vmem:[#allocation23_spill] sm:$0xff]  ;;  %v10279_v32 = vld [vmem:[#allocation26_spill] sm:$0xff] }
 0x50b   : > { %v3489_v26 = vmul.f32 %v3799_v29, %v8611_v53  ;;  %v3505_v12 = vmul.f32 %v3815_v50, %v8611_v53  ;;  %v3355_v14 = vpop.f32.mrf.mxu0  ;;  %v3419_v59 = vpop.f32.mrf.mxu1  ;;  %v10278_v29 = vld [vmem:[#allocation10_spill] sm:$0xff] }
 0x50c   : > { %3591 = vst.msk [vmem:[%s8629_s15 + $0x10] sm:$0xff] %vm420_vm0, %v3559_v23  ;;  %3607 = vst.msk [vmem:[%s8629_s15 + $0x90] sm:$0xff] %vm420_vm0, %v3575_v27  ;;  %v3557_v31 = vadd.f32 %v3525_v61, %v10268_v62  ;;  %v3573_v3 = vadd.f32 %v3541_v57, %v10269_v8  ;;  %v3487_v11 = vmul.f32 %v8611_v53, %v3355_v14  ;;  %v10280_v14 = vld [vmem:[#allocation8_spill] sm:$0xff] }
 0x50d   : > { %v3503_v58 = vmul.f32 %v8611_v53, %v3419_v59  ;;  %v3528_v63 = vadd.f32 %v8616_v45, %v3489_v26  ;;  %v3544_v5 = vadd.f32 %v8616_v45, %v3505_v12  ;;  %v3802_v2 = vpop.f32.mrf.mxu0  ;;  %v3818_v0 = vpop.f32.mrf.mxu1  ;;  %v10281_v62 = vld [vmem:[#allocation24_spill] sm:$0xff] }
 0x50e   : > { %3589 = vst.msk [vmem:[%s8629_s15] sm:$0xff] %vm420_vm0, %v3557_v31  ;;  %3605 = vst.msk [vmem:[%s8629_s15 + $0x80] sm:$0xff] %vm420_vm0, %v3573_v3  ;;  %v3526_v39 = vadd.f32 %v8616_v45, %v3487_v11  ;;  %v3492_v13 = vmul.f32 %v3802_v2, %v8611_v53  ;;  %v3508_v54 = vmul.f32 %v3818_v0, %v8611_v53 }
 0x50f   : > { %v3542_v28 = vadd.f32 %v8616_v45, %v3503_v58  ;;  %v3560_v43 = vadd.f32 %v3528_v63, %v10270_v60  ;;  %v3576_v49 = vadd.f32 %v3544_v5, %v10271_v52  ;;  %v3368_v47 = vpop.f32.mrf.mxu0  ;;  %v3432_v41 = vpop.f32.mrf.mxu1  ;;  %v10283_v60 = vld [vmem:[#allocation29_spill] sm:$0xff] }
 0x510   : > { %v3558_v24 = vadd.f32 %v3526_v39, %v10272_v17  ;;  %v3531_v30 = vadd.f32 %v8616_v45, %v3492_v13  ;;  %v3547_v1 = vadd.f32 %v8616_v45, %v3508_v54  ;;  %v3490_v44 = vmul.f32 %v8611_v53, %v3368_v47  ;;  %v10282_v13 = vld [vmem:[#allocation13_spill] sm:$0xff]  ;;  %v10284_v47 = vld [vmem:[#allocation11_spill] sm:$0xff] }
 0x511   : > { %v3574_v19 = vadd.f32 %v3542_v28, %v10273_v33  ;;  %3592 = vst.msk [vmem:[%s8629_s15 + $0x18] sm:$0xff] %vm420_vm0, %v3560_v43  ;;  %3608 = vst.msk [vmem:[%s8629_s15 + $0x98] sm:$0xff] %vm420_vm0, %v3576_v49  ;;  %v3506_v20 = vmul.f32 %v8611_v53, %v3432_v41  ;;  %v3803_v16 = vpop.f32.mrf.mxu0  ;;  %v3819_v22 = vpop.f32.mrf.mxu1  ;;  %v10285_v17 = vld [vmem:[#allocation27_spill] sm:$0xff] }
 0x512   : > { %3590 = vst.msk [vmem:[%s8629_s15 + $0x8] sm:$0xff] %vm420_vm0, %v3558_v24  ;;  %v3563_v42 = vadd.f32 %v3531_v30, %v10274_v21  ;;  %v3579_v4 = vadd.f32 %v3547_v1, %v10275_v51  ;;  %v3493_v25 = vmul.f32 %v3803_v16, %v8611_v53  ;;  %v3509_v48 = vmul.f32 %v3819_v22, %v8611_v53  ;;  %v10286_v16 = vld [vmem:[#allocation14_spill] sm:$0xff] }
 0x513   : > { %3606 = vst.msk [vmem:[%s8629_s15 + $0x88] sm:$0xff] %vm420_vm0, %v3574_v19  ;;  %v3529_v56 = vadd.f32 %v8616_v45, %v3490_v44  ;;  %v3545_v6 = vadd.f32 %v8616_v45, %v3506_v20  ;;  %v3371_v7 = vpop.f32.mrf.mxu0  ;;  %v3435_v37 = vpop.f32.mrf.mxu1  ;;  %v10287_v21 = vld [vmem:[#allocation30_spill] sm:$0xff] }
 0x514   : > { %3595 = vst.msk [vmem:[%s8629_s15 + $0x30] sm:$0xff] %vm420_vm0, %v3563_v42  ;;  %3611 = vst.msk [vmem:[%s8629_s15 + $0xb0] sm:$0xff] %vm420_vm0, %v3579_v4  ;;  %v3532_v38 = vadd.f32 %v8616_v45, %v3493_v25  ;;  %v3548_v18 = vadd.f32 %v8616_v45, %v3509_v48  ;;  %v3491_v15 = vmul.f32 %v8611_v53, %v3371_v7 }
 0x515   : > { %v3507_v35 = vmul.f32 %v8611_v53, %v3435_v37  ;;  %v3561_v46 = vadd.f32 %v3529_v56, %v10276_v55  ;;  %v3577_v40 = vadd.f32 %v3545_v6, %v10277_v34  ;;  %v3806_v9 = vpop.f32.mrf.mxu0  ;;  %v3822_v10 = vpop.f32.mrf.mxu1  ;;  %v10289_v55 = vld [vmem:[#allocation28_spill] sm:$0xff] }
 0x516   : > { %v3564_v50 = vadd.f32 %v3532_v38, %v10278_v29  ;;  %v3580_v23 = vadd.f32 %v3548_v18, %v10279_v32  ;;  %v3530_v36 = vadd.f32 %v8616_v45, %v3491_v15  ;;  %v3496_v61 = vmul.f32 %v3806_v9, %v8611_v53  ;;  %v10288_v15 = vld [vmem:[#allocation12_spill] sm:$0xff]  ;;  %v10290_v9 = vld [vmem:[#allocation17_spill] sm:$0xff] }
 0x517   : > { %v3546_v27 = vadd.f32 %v8616_v45, %v3507_v35  ;;  %3593 = vst.msk [vmem:[%s8629_s15 + $0x20] sm:$0xff] %vm420_vm0, %v3561_v46  ;;  %3609 = vst.msk [vmem:[%s8629_s15 + $0xa0] sm:$0xff] %vm420_vm0, %v3577_v40  ;;  %v3512_v57 = vmul.f32 %v3822_v10, %v8611_v53  ;;  %v3384_v26 = vpop.f32.mrf.mxu0  ;;  %v3448_v12 = vpop.f32.mrf.mxu1  ;;  %v10291_v29 = vld [vmem:[#allocation33_spill] sm:$0xff] }
 0x518   : > { %3596 = vst.msk [vmem:[%s8629_s15 + $0x38] sm:$0xff] %vm420_vm0, %v3564_v50  ;;  %3612 = vst.msk [vmem:[%s8629_s15 + $0xb8] sm:$0xff] %vm420_vm0, %v3580_v23  ;;  %v3562_v59 = vadd.f32 %v3530_v36, %v10280_v14  ;;  %v3494_v8 = vmul.f32 %v8611_v53, %v3384_v26  ;;  %v3510_v3 = vmul.f32 %v8611_v53, %v3448_v12  ;;  %v10292_v26 = vld [vmem:[#allocation15_spill] sm:$0xff] }
 0x519   : > { %v3578_v31 = vadd.f32 %v3546_v27, %v10281_v62  ;;  %v3535_v11 = vadd.f32 %v8616_v45, %v3496_v61  ;;  %v3551_v58 = vadd.f32 %v8616_v45, %v3512_v57  ;;  %v3807_v63 = vpop.f32.mrf.mxu0  ;;  %v3823_v5 = vpop.f32.mrf.mxu1  ;;  %v10293_v14 = vld [vmem:[#allocation31_spill] sm:$0xff] }
 0x51a   : > { %3594 = vst.msk [vmem:[%s8629_s15 + $0x28] sm:$0xff] %vm420_vm0, %v3562_v59  ;;  %v3533_v2 = vadd.f32 %v8616_v45, %v3494_v8  ;;  %v3549_v0 = vadd.f32 %v8616_v45, %v3510_v3  ;;  %v3497_v39 = vmul.f32 %v3807_v63, %v8611_v53  ;;  %v3513_v28 = vmul.f32 %v3823_v5, %v8611_v53  ;;  %v10294_v63 = vld [vmem:[#allocation18_spill] sm:$0xff] }
 0x51b   : > { %3610 = vst.msk [vmem:[%s8629_s15 + $0xa8] sm:$0xff] %vm420_vm0, %v3578_v31  ;;  %v3567_v54 = vadd.f32 %v3535_v11, %v10282_v13  ;;  %v3583_v43 = vadd.f32 %v3551_v58, %v10283_v60  ;;  %v3387_v52 = vpop.f32.mrf.mxu0  ;;  %v3451_v49 = vpop.f32.mrf.mxu1  ;;  %v10297_v13 = vld [vmem:[#allocation32_spill] sm:$0xff] }
 0x51c   : > { %v3565_v41 = vadd.f32 %v3533_v2, %v10284_v47  ;;  %v3581_v24 = vadd.f32 %v3549_v0, %v10285_v17  ;;  %v3536_v33 = vadd.f32 %v8616_v45, %v3497_v39  ;;  %v3552_v19 = vadd.f32 %v8616_v45, %v3513_v28  ;;  %v10295_v2 = vld [vmem:[#allocation34_spill] sm:$0xff]  ;;  %v10296_v39 = vld [vmem:[#allocation16_spill] sm:$0xff] }
 0x51d   : > { %3599 = vst.msk [vmem:[%s8629_s15 + $0x50] sm:$0xff] %vm420_vm0, %v3567_v54  ;;  %3615 = vst.msk [vmem:[%s8629_s15 + $0xd0] sm:$0xff] %vm420_vm0, %v3583_v43  ;;  %v3495_v30 = vmul.f32 %v8611_v53, %v3387_v52  ;;  %v3511_v1 = vmul.f32 %v8611_v53, %v3451_v49  ;;  %v3810_v44 = vpop.f32.mrf.mxu0  ;;  %v3826_v20 = vpop.f32.mrf.mxu1 }
 0x51e   : > { %3597 = vst.msk [vmem:[%s8629_s15 + $0x40] sm:$0xff] %vm420_vm0, %v3565_v41  ;;  %3613 = vst.msk [vmem:[%s8629_s15 + $0xc0] sm:$0xff] %vm420_vm0, %v3581_v24  ;;  %v3568_v22 = vadd.f32 %v3536_v33, %v10286_v16  ;;  %v3584_v42 = vadd.f32 %v3552_v19, %v10287_v21  ;;  %v3500_v51 = vmul.f32 %v3810_v44, %v8611_v53 }
 0x51f   : > { %v3516_v4 = vmul.f32 %v3826_v20, %v8611_v53  ;;  %v3534_v25 = vadd.f32 %v8616_v45, %v3495_v30  ;;  %v3550_v48 = vadd.f32 %v8616_v45, %v3511_v1  ;;  %v3400_v56 = vpop.f32.mrf.mxu0  ;;  %v3464_v6 = vpop.f32.mrf.mxu1 }
 0x520   : > { %3600 = vst.msk [vmem:[%s8629_s15 + $0x58] sm:$0xff] %vm420_vm0, %v3568_v22  ;;  %3616 = vst.msk [vmem:[%s8629_s15 + $0xd8] sm:$0xff] %vm420_vm0, %v3584_v42  ;;  %v3539_v7 = vadd.f32 %v8616_v45, %v3500_v51  ;;  %v3498_v38 = vmul.f32 %v8611_v53, %v3400_v56  ;;  %v3514_v18 = vmul.f32 %v8611_v53, %v3464_v6 }
 0x521   : > { %v3555_v37 = vadd.f32 %v8616_v45, %v3516_v4  ;;  %v3566_v35 = vadd.f32 %v3534_v25, %v10288_v15  ;;  %v3582_v46 = vadd.f32 %v3550_v48, %v10289_v55  ;;  %v3811_v34 = vpop.f32.mrf.mxu0  ;;  %v3827_v40 = vpop.f32.mrf.mxu1 }
 0x522   : > { %v3571_v10 = vadd.f32 %v3539_v7, %v10290_v9  ;;  %v3537_v32 = vadd.f32 %v8616_v45, %v3498_v38  ;;  %v3553_v23 = vadd.f32 %v8616_v45, %v3514_v18  ;;  %v3501_v36 = vmul.f32 %v3811_v34, %v8611_v53 }
 0x523   : > { %v3587_v50 = vadd.f32 %v3555_v37, %v10291_v29  ;;  %3598 = vst.msk [vmem:[%s8629_s15 + $0x48] sm:$0xff] %vm420_vm0, %v3566_v35  ;;  %3614 = vst.msk [vmem:[%s8629_s15 + $0xc8] sm:$0xff] %vm420_vm0, %v3582_v46  ;;  %v3517_v27 = vmul.f32 %v3827_v40, %v8611_v53  ;;  %v3403_v61 = vpop.f32.mrf.mxu0  ;;  %v3467_v57 = vpop.f32.mrf.mxu1 }
 0x524   : > { %3603 = vst.msk [vmem:[%s8629_s15 + $0x70] sm:$0xff] %vm420_vm0, %v3571_v10  ;;  %v3569_v12 = vadd.f32 %v3537_v32, %v10292_v26  ;;  %v3585_v59 = vadd.f32 %v3553_v23, %v10293_v14  ;;  %v3499_v62 = vmul.f32 %v8611_v53, %v3403_v61  ;;  %v3515_v31 = vmul.f32 %v8611_v53, %v3467_v57 }
 0x525   : > { %3619 = vst.msk [vmem:[%s8629_s15 + $0xf0] sm:$0xff] %vm420_vm0, %v3587_v50  ;;  %v3540_v8 = vadd.f32 %v8616_v45, %v3501_v36  ;;  %v3556_v3 = vadd.f32 %v8616_v45, %v3517_v27 }
 0x526   : > { %3601 = vst.msk [vmem:[%s8629_s15 + $0x60] sm:$0xff] %vm420_vm0, %v3569_v12  ;;  %3617 = vst.msk [vmem:[%s8629_s15 + $0xe0] sm:$0xff] %vm420_vm0, %v3585_v59  ;;  %v3538_v11 = vadd.f32 %v8616_v45, %v3499_v62  ;;  %v3554_v58 = vadd.f32 %v8616_v45, %v3515_v31 }
 0x527   : > { %v3572_v5 = vadd.f32 %v3540_v8, %v10294_v63  ;;  %v3588_v0 = vadd.f32 %v3556_v3, %v10295_v2 }
 0x528   : > { %v3570_v28 = vadd.f32 %v3538_v11, %v10296_v39  ;;  %v3586_v53 = vadd.f32 %v3554_v58, %v10297_v13 }
 0x529   : > { %3604 = vst.msk [vmem:[%s8629_s15 + $0x78] sm:$0xff] %vm420_vm0, %v3572_v5  ;;  %3620 = vst.msk [vmem:[%s8629_s15 + $0xf8] sm:$0xff] %vm420_vm0, %v3588_v0 }
 0x52a   : > { %3602 = vst.msk [vmem:[%s8629_s15 + $0x68] sm:$0xff] %vm420_vm0, %v3570_v28  ;;  %3618 = vst.msk [vmem:[%s8629_s15 + $0xe8] sm:$0xff] %vm420_vm0, %v3586_v53 }
 0x52b PF: > { %s21_s17 = sadd.s32 1, %s4085_s17  }
 0x52c   : > { %p18_p4 = scmp.ge.s32.totalorder %s21_s17, 4  }
 0x52e   :  { %20 = sbr.rel (!%p18_p4) target bundleno = 1 (0x1), region = 95 }

</bundles_post_ra>
